<compile_context>
chip_gen: v6e
topology: v6e:2x2x1
jax: 0.10.0
libtpu: 0.0.40
codegen_flags: <defaults>
</compile_context>

<pallas_src>
import functools

import numpy as np
import jax
import jax.numpy as jnp
from jax import lax
from jax.experimental import pallas as pl
from jax.experimental.pallas import tpu as pltpu

EPS = 1e-5  # nn.BatchNorm1d default eps


# ------------------------------- static in-kernel helpers -------------------------------

def _same_pads(k):
    # PyTorch padding='same' for stride-1 convs: left = (k-1)//2, right = the rest.
    total = k - 1
    return total // 2, total - total // 2


def _pad_lanes(h, padl, padr):
    # Zero-pad along lanes (length axis of the (C, L) layout): (C, L) -> (C, padl+L+padr).
    c = h.shape[0]
    parts = []
    if padl:
        parts.append(jnp.zeros((c, padl), jnp.float32))
    parts.append(h)
    if padr:
        parts.append(jnp.zeros((c, padr), jnp.float32))
    return parts[0] if len(parts) == 1 else jnp.concatenate(parts, axis=1)


def _pad_sublanes(h, padl, padr):
    # Zero-pad along sublanes (length axis of the flipped (L, C) layout): (L, C) -> (padl+L+padr, C).
    c = h.shape[1]
    parts = []
    if padl:
        parts.append(jnp.zeros((padl, c), jnp.float32))
    parts.append(h)
    if padr:
        parts.append(jnp.zeros((padr, c), jnp.float32))
    return parts[0] if len(parts) == 1 else jnp.concatenate(parts, axis=0)


def _im2col_cl(hp, k, n_out):
    # channels-on-sublanes layout: (C, Lp) -> (k*C, n_out), row order tap*C + channel.
    return jnp.concatenate([hp[:, j:j + n_out] for j in range(k)], axis=0)


def _im2col_lc(hp, k, n_out):
    # length-on-sublanes (flipped) layout: (Lp, C) -> (n_out, k*C), column order tap*C + channel.
    return jnp.concatenate([hp[j:j + n_out, :] for j in range(k)], axis=1)


# -------------------- host-built constant matrices (packed once, outside jit) --------------------

def _np_pool_matrix(l_in, l_out):
    # P[u, t] = 0.5 iff u // 2 == t : AvgPool1d(kernel_size=2, stride=2) as one matmul.
    rows = np.arange(l_in)[:, None]
    cols = np.arange(l_out)[None, :]
    return (((rows // 2) == cols) * 0.5).astype(np.float32)


def _np_select_block_diag(l_dense, l_next, stride, batch):
    # Block-diagonal 0/1 selector for the batch-stacked dense conv2 output:
    # S[b*l_dense + t*stride, b*l_next + t] = 1  (stride selection as a tiny matmul).
    s = np.zeros((batch * l_dense, batch * l_next), np.float32)
    t = np.arange(l_next)
    for b in range(batch):
        s[b * l_dense + t * stride, b * l_next + t] = 1.0
    return s


# ------------------------------- static shape / layout plan -------------------------------

def _plan(batch, in_channels, l_in, strides, kb, kf, hidden, emb):
    lens, flips = [], []
    flipped = False
    l = l_in // 2                                   # AvgPool1d(kernel_size=2)
    for s in strides:
        lens.append(l)
        f = (not flipped) and (batch * l < hidden)  # flip once channel lane fill beats length fill
        flips.append(f)
        flipped = flipped or f
        l = (l - kb) // s + 1                       # valid conv, stride s
    return dict(batch=batch, cin=in_channels, l_in=l_in, kb=kb, kf=kf,
                hidden=hidden, emb=emb, lens=tuple(lens), strides=tuple(strides),
                flips=tuple(flips), flip_before_final=not flipped, l_out=l)


def pack_inputs(params, strides, *, batch, in_channels, l_in, block_kernel=8):
    """One-time (outside the jitted path) packing of weights + constant matrices into operands."""
    hidden = params["blocks"][0]["w1"].shape[0]
    emb, _, kf = params["final_w"].shape
    kb = block_kernel
    meta = _plan(batch, in_channels, l_in, tuple(strides), kb, kf, hidden, emb)

    inputs = [jnp.asarray(_np_pool_matrix(l_in, l_in // 2))]
    flipped = False
    for i, p in enumerate(params["blocks"]):
        flipped = flipped or meta["flips"][i]
        cin = p["w1"].shape[1]
        # (Cout, K*Cin) with column order tap*Cin + channel, matching the in-kernel im2col.
        w1 = jnp.asarray(p["w1"]).transpose(0, 2, 1).reshape(hidden, kb * cin)
        w2 = jnp.asarray(p["w2"]).transpose(0, 2, 1).reshape(hidden, kb * hidden)
        l_cur = meta["lens"][i]
        l_dense = l_cur - kb + 1
        l_next = (l_cur - kb) // strides[i] + 1
        sel = _np_select_block_diag(l_dense, l_next, strides[i], batch)
        g = jnp.asarray(p["gamma"])
        bta = jnp.asarray(p["beta"])
        b2 = jnp.asarray(p["b2"])
        if flipped:   # this block runs in (B*L, C) orientation
            inputs += [w1.T, g.reshape(1, hidden), bta.reshape(1, hidden),
                       w2.T, b2.reshape(1, hidden), jnp.asarray(sel.T)]
        else:         # this block runs in (C, B*L) orientation
            inputs += [w1, g.reshape(hidden, 1), bta.reshape(hidden, 1),
                       w2, b2.reshape(hidden, 1), jnp.asarray(sel)]
        # NOTE: p["b1"] is intentionally NOT passed: training-mode BN cancels it exactly.
    wf = jnp.asarray(params["final_w"]).transpose(0, 2, 1).reshape(emb, kf * hidden)
    inputs += [wf.T, jnp.asarray(params["final_b"]).reshape(1, emb)]  # final conv always flipped
    return inputs, meta


# ------------------------------- fused network kernel -------------------------------

def _make_kernel(meta):
    B, cin0 = meta["batch"], meta["cin"]
    kb, kf = meta["kb"], meta["kf"]
    strides, flips, lens = meta["strides"], meta["flips"], meta["lens"]
    hidden = meta["hidden"]
    n_blocks = len(strides)

    def kernel(x_ref, pool_ref, *refs):
        blocks = [refs[6 * i: 6 * i + 6] for i in range(n_blocks)]
        wf_ref = refs[6 * n_blocks]
        bf_ref = refs[6 * n_blocks + 1]
        out_ref = refs[6 * n_blocks + 2]

        # ---- AvgPool1d(kernel_size=2): one matmul against the host-built 0.5 matrix.
        # Result is batch-stacked along lanes: h[:, b*Lp:(b+1)*Lp] belongs to batch b.
        x = x_ref[...]                                            # (B, Cin, L)
        pool = pool_ref[...]                                      # (L, Lp)
        l_cur = lens[0]
        if cin0 == 1:
            pooled = jnp.dot(x[:, 0, :], pool, preferred_element_type=jnp.float32)  # (B, Lp)
            h = jnp.concatenate([pooled[b:b + 1, :] for b in range(B)], axis=1)     # (1, B*Lp)
        else:
            h = jnp.concatenate(
                [jnp.dot(x[b], pool, preferred_element_type=jnp.float32) for b in range(B)],
                axis=1)                                           # (Cin, B*Lp)

        flipped = False
        for i, stride in enumerate(strides):
            w1_ref, g_ref, bta_ref, w2_ref, b2_ref, sel_ref = blocks[i]
            if flips[i] and not flipped:
                h = h.T                                           # (C, B*L) -> (B*L, C): one transpose
                flipped = True
            cin = cin0 if i == 0 else hidden
            padl, padr = _same_pads(kb)
            l_dense = l_cur - kb + 1
            l_next = (l_cur - kb) // stride + 1
            n = float(B * l_cur)

            if not flipped:
                # -------- channels on sublanes, (batch*length) on lanes --------
                # conv1 'same' (bias omitted: cancelled by the training-mode BN mean).
                if cin == 1:
                    # Depth-kb contraction is MXU-hostile -> VPU shift-and-accumulate.
                    w1 = w1_ref[...]                              # (hidden, kb)
                    hps = [_pad_lanes(h[:, b * l_cur:(b + 1) * l_cur], padl, padr)
                           for b in range(B)]
                    y = None
                    for j in range(kb):
                        tap = jnp.concatenate([hp[:, j:j + l_cur] for hp in hps], axis=1)
                        term = w1[:, j:j + 1] * tap
                        y = term if y is None else y + term       # (hidden, B*L)
                else:
                    xcol = jnp.concatenate(
                        [_im2col_cl(_pad_lanes(h[:, b * l_cur:(b + 1) * l_cur], padl, padr),
                                    kb, l_cur) for b in range(B)], axis=1)    # (kb*cin, B*L)
                    y = jnp.dot(w1_ref[...], xcol, preferred_element_type=jnp.float32)

                # BatchNorm1d training-mode biased stats over the full B*L, one pass, folded to
                # a per-channel scale/shift.
                s1 = jnp.sum(y, axis=1, keepdims=True)
                s2 = jnp.sum(y * y, axis=1, keepdims=True)
                mean = s1 / n
                var = jnp.maximum(s2 / n - mean * mean, 0.0)
                scale = g_ref[...] * lax.rsqrt(var + EPS)
                shift = bta_ref[...] - mean * scale

                # ReLU + residual (broadcasts over channels when cin == 1, as in PyTorch).
                act = jnp.maximum(y * scale + shift, 0.0) + h

                # conv2 (valid, stride=s): dense MXU matmul, stride selection via the host-built
                # block-diagonal 0/1 matrix, bias added AFTER the selection.
                xcol2 = jnp.concatenate(
                    [_im2col_cl(act[:, b * l_cur:(b + 1) * l_cur], kb, l_dense) for b in range(B)],
                    axis=1)                                       # (kb*hidden, B*l_dense)
                yd = jnp.dot(w2_ref[...], xcol2, preferred_element_type=jnp.float32)
                h = jnp.dot(yd, sel_ref[...], preferred_element_type=jnp.float32) + b2_ref[...]
            else:
                # -------- (batch*length) on sublanes, channels on lanes --------
                xcol = jnp.concatenate(
                    [_im2col_lc(_pad_sublanes(h[b * l_cur:(b + 1) * l_cur, :], padl, padr),
                                kb, l_cur) for b in range(B)], axis=0)        # (B*L, kb*cin)
                y = jnp.dot(xcol, w1_ref[...], preferred_element_type=jnp.float32)  # (B*L, hidden)

                s1 = jnp.sum(y, axis=0, keepdims=True)
                s2 = jnp.sum(y * y, axis=0, keepdims=True)
                mean = s1 / n
                var = jnp.maximum(s2 / n - mean * mean, 0.0)
                scale = g_ref[...] * lax.rsqrt(var + EPS)         # (1, hidden)
                shift = bta_ref[...] - mean * scale

                act = jnp.maximum(y * scale + shift, 0.0) + h

                xcol2 = jnp.concatenate(
                    [_im2col_lc(act[b * l_cur:(b + 1) * l_cur, :], kb, l_dense) for b in range(B)],
                    axis=0)                                       # (B*l_dense, kb*hidden)
                yd = jnp.dot(xcol2, w2_ref[...], preferred_element_type=jnp.float32)
                h = jnp.dot(sel_ref[...], yd, preferred_element_type=jnp.float32) + b2_ref[...]
            l_cur = l_next

        # ---- final conv ('same', stride 1), always in flipped layout so the store is lane-dense
        # (emb on lanes) and already matches the module's trailing transpose(1, 2).
        if not flipped:
            h = h.T
        padl, padr = _same_pads(kf)
        xcol = jnp.concatenate(
            [_im2col_lc(_pad_sublanes(h[b * l_cur:(b + 1) * l_cur, :], padl, padr), kf, l_cur)
             for b in range(B)], axis=0)                          # (B*l_out, kf*hidden)
        res = jnp.dot(xcol, wf_ref[...], preferred_element_type=jnp.float32) + bf_ref[...]
        for b in range(B):
            out_ref[b] = res[b * l_cur:(b + 1) * l_cur, :]

    return kernel


# ----------------------------------- jitted forward -----------------------------------

def downsampling_forward(x, packed, *, meta):
    """Fused forward.  `packed`/`meta` come from pack_inputs (built once, outside jit)."""
    vmem = pl.BlockSpec(memory_space=pltpu.MemorySpace.VMEM)
    return pl.pallas_call(
        _make_kernel(meta),
        out_shape=jax.ShapeDtypeStruct((meta["batch"], meta["l_out"], meta["emb"]), jnp.float32),
        in_specs=[vmem] * (1 + len(packed)),
        out_specs=vmem,
    )(x.astype(jnp.float32), *packed)


# --------------------------- pure-JAX reference (check only) --------------------------

def _reference_forward(x, params, strides, *, block_kernel=8, final_kernel=4):
    prec = lax.Precision.HIGHEST
    dn = ("NCH", "OIH", "NCH")
    b_, c_, l_ = x.shape
    lp = l_ // 2
    h = x[:, :, :2 * lp].reshape(b_, c_, lp, 2).mean(axis=-1)
    for i, s in enumerate(strides):
        p = params["blocks"][i]
        padl, padr = _same_pads(block_kernel)
        y = lax.conv_general_dilated(h, p["w1"], (1,), [(padl, padr)],
                                     dimension_numbers=dn, precision=prec)
        y = y + p["b1"][None, :, None]
        mean = jnp.mean(y, axis=(0, 2), keepdims=True)
        var = jnp.mean((y - mean) ** 2, axis=(0, 2), keepdims=True)
        y = p["gamma"][None, :, None] * (y - mean) * lax.rsqrt(var + EPS) + p["beta"][None, :, None]
        h = jnp.maximum(y, 0.0) + h
        h = lax.conv_general_dilated(h, p["w2"], (s,), [(0, 0)],
                                     dimension_numbers=dn, precision=prec) + p["b2"][None, :, None]
    padl, padr = _same_pads(final_kernel)
    h = lax.conv_general_dilated(h, params["final_w"], (1,), [(padl, padr)],
                                 dimension_numbers=dn, precision=prec)
    h = h + params["final_b"][None, :, None]
    return h.transpose(0, 2, 1)


# ----------------------------------- parameter init -----------------------------------

def init_params(key, *, embedding_dim, hidden_dim, in_channels, strides,
                block_kernel=8, final_kernel=4):
    params = {"blocks": []}
    for i in range(len(strides)):
        cin = in_channels if i == 0 else hidden_dim
        key, k1, k2, k3, k4, k5, k6 = jax.random.split(key, 7)
        params["blocks"].append({
            # b1 is kept for module parity but is a mathematical no-op before training-mode BN.
            "w1": 0.10 * jax.random.normal(k1, (hidden_dim, cin, block_kernel), jnp.float32),
            "b1": 0.10 * jax.random.normal(k2, (hidden_dim,), jnp.float32),
            "gamma": 1.0 + 0.10 * jax.random.normal(k3, (hidden_dim,), jnp.float32),
            "beta": 0.10 * jax.random.normal(k4, (hidden_dim,), jnp.float32),
            "w2": 0.05 * jax.random.normal(k5, (hidden_dim, hidden_dim, block_kernel), jnp.float32),
            "b2": 0.10 * jax.random.normal(k6, (hidden_dim,), jnp.float32),
        })
    key, kf1, kf2 = jax.random.split(key, 3)
    params["final_w"] = 0.10 * jax.random.normal(
        kf1, (embedding_dim, hidden_dim, final_kernel), jnp.float32)
    params["final_b"] = 0.10 * jax.random.normal(kf2, (embedding_dim,), jnp.float32)
    return params


# ----------------------------------------- main -----------------------------------------

if __name__ == "__main__":
    # DownsamplingNetwork(embedding_dim=64, hidden_dim=32, in_channels=1,
    #                     initial_mean_pooling_kernel_size=2, strides=[2, 2, 2])
    B, in_channels, L = 2, 1, 128
    hidden_dim, embedding_dim = 32, 64
    strides = [2, 2, 2]

    key = jax.random.PRNGKey(0)
    kx, kp = jax.random.split(key)
    x = jax.random.normal(kx, (B, in_channels, L), jnp.float32)
    params = init_params(kp, embedding_dim=embedding_dim, hidden_dim=hidden_dim,
                         in_channels=in_channels, strides=strides)

    # Weight packing / constant-matrix construction happens exactly ONCE, outside the jitted path.
    packed, meta = pack_inputs(params, strides, batch=B, in_channels=in_channels, l_in=L)

    fwd = jax.jit(functools.partial(downsampling_forward, meta=meta))
    out = jax.block_until_ready(fwd(x, packed))

    # Shape implied by the module: 128 -> pool 64 -> 29 -> 11 -> 2 -> final 'same' conv -> 2,
    # already transposed to (B, L_out, emb) by the lane-dense kernel output.
    assert out.shape == (B, 2, embedding_dim), out.shape
    assert out.dtype == jnp.float32

    # Numerical sanity check against a pure-JAX/XLA reference of the PyTorch module.
    ref = jax.block_until_ready(_reference_forward(x, params, strides))
    max_err = float(jnp.max(jnp.abs(out - ref)))
    assert max_err < 1e-2, max_err

    print("KERNEL_OK")
</pallas_src>

<mosaic_0001>
module attributes {stable_mosaic.version = 11 : i64} {
  func.func @kernel(%arg0: memref<2x1x128xf32, #tpu.memory_space<vmem>>, %arg1: memref<128x64xf32, #tpu.memory_space<vmem>>, %arg2: memref<32x8xf32, #tpu.memory_space<vmem>>, %arg3: memref<32x1xf32, #tpu.memory_space<vmem>>, %arg4: memref<32x1xf32, #tpu.memory_space<vmem>>, %arg5: memref<32x256xf32, #tpu.memory_space<vmem>>, %arg6: memref<32x1xf32, #tpu.memory_space<vmem>>, %arg7: memref<114x58xf32, #tpu.memory_space<vmem>>, %arg8: memref<32x256xf32, #tpu.memory_space<vmem>>, %arg9: memref<32x1xf32, #tpu.memory_space<vmem>>, %arg10: memref<32x1xf32, #tpu.memory_space<vmem>>, %arg11: memref<32x256xf32, #tpu.memory_space<vmem>>, %arg12: memref<32x1xf32, #tpu.memory_space<vmem>>, %arg13: memref<44x22xf32, #tpu.memory_space<vmem>>, %arg14: memref<256x32xf32, #tpu.memory_space<vmem>>, %arg15: memref<1x32xf32, #tpu.memory_space<vmem>>, %arg16: memref<1x32xf32, #tpu.memory_space<vmem>>, %arg17: memref<256x32xf32, #tpu.memory_space<vmem>>, %arg18: memref<1x32xf32, #tpu.memory_space<vmem>>, %arg19: memref<4x8xf32, #tpu.memory_space<vmem>>, %arg20: memref<128x64xf32, #tpu.memory_space<vmem>>, %arg21: memref<1x64xf32, #tpu.memory_space<vmem>>, %arg22: memref<2x2x64xf32, #tpu.memory_space<vmem>>) attributes {dimension_semantics = [], scalar_prefetch = 0 : i64, scratch_operands = 0 : i64, tpu.core_type = #tpu.core_type<tc>} {
    %c0 = arith.constant 0 : index
    %c0_0 = arith.constant 0 : index
    %c0_1 = arith.constant 0 : index
    %0 = vector.load %arg0[%c0, %c0_0, %c0_1] : memref<2x1x128xf32, #tpu.memory_space<vmem>>, vector<2x1x128xf32>
    %c0_2 = arith.constant 0 : index
    %c0_3 = arith.constant 0 : index
    %1 = vector.load %arg1[%c0_2, %c0_3] : memref<128x64xf32, #tpu.memory_space<vmem>>, vector<128x64xf32>
    %2 = vector.shape_cast %0 : vector<2x1x128xf32> to vector<2x128xf32>
    %cst = arith.constant dense<0.000000e+00> : vector<2x64xf32>
    %3 = tpu.matmul %2, %1, %cst {dimension_numbers = #tpu.dot_dimension_numbers<[1], [0], [0], [1], [0, 0, 1, 1], [], []>} : vector<2x128xf32>, vector<128x64xf32>, vector<2x64xf32> -> vector<2x64xf32>
    %4 = vector.extract_strided_slice %3 {offsets = [0, 0], sizes = [1, 64], strides = [1, 1]} : vector<2x64xf32> to vector<1x64xf32>
    %5 = vector.extract_strided_slice %3 {offsets = [1, 0], sizes = [1, 64], strides = [1, 1]} : vector<2x64xf32> to vector<1x64xf32>
    %6 = tpu.concatenate %4, %5 in 1 : vector<1x64xf32>, vector<1x64xf32> -> vector<1x128xf32>
    %c0_4 = arith.constant 0 : index
    %c0_5 = arith.constant 0 : index
    %7 = vector.load %arg2[%c0_4, %c0_5] : memref<32x8xf32, #tpu.memory_space<vmem>>, vector<32x8xf32>
    %8 = vector.extract_strided_slice %6 {offsets = [0, 0], sizes = [1, 64], strides = [1, 1]} : vector<1x128xf32> to vector<1x64xf32>
    %cst_6 = arith.constant 0.000000e+00 : f32
    %9 = vector.broadcast %cst_6 : f32 to vector<1x3xf32>
    %cst_7 = arith.constant 0.000000e+00 : f32
    %10 = vector.broadcast %cst_7 : f32 to vector<1x4xf32>
    %11 = tpu.concatenate %9, %8, %10 in 1 : vector<1x3xf32>, vector<1x64xf32>, vector<1x4xf32> -> vector<1x71xf32>
    %12 = vector.extract_strided_slice %6 {offsets = [0, 64], sizes = [1, 64], strides = [1, 1]} : vector<1x128xf32> to vector<1x64xf32>
    %cst_8 = arith.constant 0.000000e+00 : f32
    %13 = vector.broadcast %cst_8 : f32 to vector<1x3xf32>
    %cst_9 = arith.constant 0.000000e+00 : f32
    %14 = vector.broadcast %cst_9 : f32 to vector<1x4xf32>
    %15 = tpu.concatenate %13, %12, %14 in 1 : vector<1x3xf32>, vector<1x64xf32>, vector<1x4xf32> -> vector<1x71xf32>
    %16 = vector.extract_strided_slice %11 {offsets = [0, 0], sizes = [1, 64], strides = [1, 1]} : vector<1x71xf32> to vector<1x64xf32>
    %17 = vector.extract_strided_slice %15 {offsets = [0, 0], sizes = [1, 64], strides = [1, 1]} : vector<1x71xf32> to vector<1x64xf32>
    %18 = tpu.concatenate %16, %17 in 1 : vector<1x64xf32>, vector<1x64xf32> -> vector<1x128xf32>
    %19 = vector.extract_strided_slice %7 {offsets = [0, 0], sizes = [32, 1], strides = [1, 1]} : vector<32x8xf32> to vector<32x1xf32>
    %20 = vector.broadcast %19 : vector<32x1xf32> to vector<32x128xf32>
    %21 = vector.broadcast %18 : vector<1x128xf32> to vector<32x128xf32>
    %22 = arith.mulf %20, %21 : vector<32x128xf32>
    %23 = vector.extract_strided_slice %11 {offsets = [0, 1], sizes = [1, 64], strides = [1, 1]} : vector<1x71xf32> to vector<1x64xf32>
    %24 = vector.extract_strided_slice %15 {offsets = [0, 1], sizes = [1, 64], strides = [1, 1]} : vector<1x71xf32> to vector<1x64xf32>
    %25 = tpu.concatenate %23, %24 in 1 : vector<1x64xf32>, vector<1x64xf32> -> vector<1x128xf32>
    %26 = vector.extract_strided_slice %7 {offsets = [0, 1], sizes = [32, 1], strides = [1, 1]} : vector<32x8xf32> to vector<32x1xf32>
    %27 = vector.broadcast %26 : vector<32x1xf32> to vector<32x128xf32>
    %28 = vector.broadcast %25 : vector<1x128xf32> to vector<32x128xf32>
    %29 = arith.mulf %27, %28 : vector<32x128xf32>
    %30 = arith.addf %22, %29 : vector<32x128xf32>
    %31 = vector.extract_strided_slice %11 {offsets = [0, 2], sizes = [1, 64], strides = [1, 1]} : vector<1x71xf32> to vector<1x64xf32>
    %32 = vector.extract_strided_slice %15 {offsets = [0, 2], sizes = [1, 64], strides = [1, 1]} : vector<1x71xf32> to vector<1x64xf32>
    %33 = tpu.concatenate %31, %32 in 1 : vector<1x64xf32>, vector<1x64xf32> -> vector<1x128xf32>
    %34 = vector.extract_strided_slice %7 {offsets = [0, 2], sizes = [32, 1], strides = [1, 1]} : vector<32x8xf32> to vector<32x1xf32>
    %35 = vector.broadcast %34 : vector<32x1xf32> to vector<32x128xf32>
    %36 = vector.broadcast %33 : vector<1x128xf32> to vector<32x128xf32>
    %37 = arith.mulf %35, %36 : vector<32x128xf32>
    %38 = arith.addf %30, %37 : vector<32x128xf32>
    %39 = vector.extract_strided_slice %11 {offsets = [0, 3], sizes = [1, 64], strides = [1, 1]} : vector<1x71xf32> to vector<1x64xf32>
    %40 = vector.extract_strided_slice %15 {offsets = [0, 3], sizes = [1, 64], strides = [1, 1]} : vector<1x71xf32> to vector<1x64xf32>
    %41 = tpu.concatenate %39, %40 in 1 : vector<1x64xf32>, vector<1x64xf32> -> vector<1x128xf32>
    %42 = vector.extract_strided_slice %7 {offsets = [0, 3], sizes = [32, 1], strides = [1, 1]} : vector<32x8xf32> to vector<32x1xf32>
    %43 = vector.broadcast %42 : vector<32x1xf32> to vector<32x128xf32>
    %44 = vector.broadcast %41 : vector<1x128xf32> to vector<32x128xf32>
    %45 = arith.mulf %43, %44 : vector<32x128xf32>
    %46 = arith.addf %38, %45 : vector<32x128xf32>
    %47 = vector.extract_strided_slice %11 {offsets = [0, 4], sizes = [1, 64], strides = [1, 1]} : vector<1x71xf32> to vector<1x64xf32>
    %48 = vector.extract_strided_slice %15 {offsets = [0, 4], sizes = [1, 64], strides = [1, 1]} : vector<1x71xf32> to vector<1x64xf32>
    %49 = tpu.concatenate %47, %48 in 1 : vector<1x64xf32>, vector<1x64xf32> -> vector<1x128xf32>
    %50 = vector.extract_strided_slice %7 {offsets = [0, 4], sizes = [32, 1], strides = [1, 1]} : vector<32x8xf32> to vector<32x1xf32>
    %51 = vector.broadcast %50 : vector<32x1xf32> to vector<32x128xf32>
    %52 = vector.broadcast %49 : vector<1x128xf32> to vector<32x128xf32>
    %53 = arith.mulf %51, %52 : vector<32x128xf32>
    %54 = arith.addf %46, %53 : vector<32x128xf32>
    %55 = vector.extract_strided_slice %11 {offsets = [0, 5], sizes = [1, 64], strides = [1, 1]} : vector<1x71xf32> to vector<1x64xf32>
    %56 = vector.extract_strided_slice %15 {offsets = [0, 5], sizes = [1, 64], strides = [1, 1]} : vector<1x71xf32> to vector<1x64xf32>
    %57 = tpu.concatenate %55, %56 in 1 : vector<1x64xf32>, vector<1x64xf32> -> vector<1x128xf32>
    %58 = vector.extract_strided_slice %7 {offsets = [0, 5], sizes = [32, 1], strides = [1, 1]} : vector<32x8xf32> to vector<32x1xf32>
    %59 = vector.broadcast %58 : vector<32x1xf32> to vector<32x128xf32>
    %60 = vector.broadcast %57 : vector<1x128xf32> to vector<32x128xf32>
    %61 = arith.mulf %59, %60 : vector<32x128xf32>
    %62 = arith.addf %54, %61 : vector<32x128xf32>
    %63 = vector.extract_strided_slice %11 {offsets = [0, 6], sizes = [1, 64], strides = [1, 1]} : vector<1x71xf32> to vector<1x64xf32>
    %64 = vector.extract_strided_slice %15 {offsets = [0, 6], sizes = [1, 64], strides = [1, 1]} : vector<1x71xf32> to vector<1x64xf32>
    %65 = tpu.concatenate %63, %64 in 1 : vector<1x64xf32>, vector<1x64xf32> -> vector<1x128xf32>
    %66 = vector.extract_strided_slice %7 {offsets = [0, 6], sizes = [32, 1], strides = [1, 1]} : vector<32x8xf32> to vector<32x1xf32>
    %67 = vector.broadcast %66 : vector<32x1xf32> to vector<32x128xf32>
    %68 = vector.broadcast %65 : vector<1x128xf32> to vector<32x128xf32>
    %69 = arith.mulf %67, %68 : vector<32x128xf32>
    %70 = arith.addf %62, %69 : vector<32x128xf32>
    %71 = vector.extract_strided_slice %11 {offsets = [0, 7], sizes = [1, 64], strides = [1, 1]} : vector<1x71xf32> to vector<1x64xf32>
    %72 = vector.extract_strided_slice %15 {offsets = [0, 7], sizes = [1, 64], strides = [1, 1]} : vector<1x71xf32> to vector<1x64xf32>
    %73 = tpu.concatenate %71, %72 in 1 : vector<1x64xf32>, vector<1x64xf32> -> vector<1x128xf32>
    %74 = vector.extract_strided_slice %7 {offsets = [0, 7], sizes = [32, 1], strides = [1, 1]} : vector<32x8xf32> to vector<32x1xf32>
    %75 = vector.broadcast %74 : vector<32x1xf32> to vector<32x128xf32>
    %76 = vector.broadcast %73 : vector<1x128xf32> to vector<32x128xf32>
    %77 = arith.mulf %75, %76 : vector<32x128xf32>
    %78 = arith.addf %70, %77 : vector<32x128xf32>
    %cst_10 = arith.constant dense<0.000000e+00> : vector<32xf32>
    %79 = vector.multi_reduction <add>, %78, %cst_10 [1] : vector<32x128xf32> to vector<32xf32>
    %80 = vector.shape_cast %79 : vector<32xf32> to vector<32x1xf32>
    %81 = arith.mulf %78, %78 : vector<32x128xf32>
    %cst_11 = arith.constant dense<0.000000e+00> : vector<32xf32>
    %82 = vector.multi_reduction <add>, %81, %cst_11 [1] : vector<32x128xf32> to vector<32xf32>
    %83 = vector.shape_cast %82 : vector<32xf32> to vector<32x1xf32>
    %cst_12 = arith.constant 1.280000e+02 : f32
    %84 = vector.broadcast %cst_12 : f32 to vector<32x1xf32>
    %85 = arith.divf %80, %84 : vector<32x1xf32>
    %cst_13 = arith.constant 1.280000e+02 : f32
    %86 = vector.broadcast %cst_13 : f32 to vector<32x1xf32>
    %87 = arith.divf %83, %86 : vector<32x1xf32>
    %88 = arith.mulf %85, %85 : vector<32x1xf32>
    %89 = arith.subf %87, %88 : vector<32x1xf32>
    %cst_14 = arith.constant 0.000000e+00 : f32
    %90 = vector.broadcast %cst_14 : f32 to vector<32x1xf32>
    %91 = arith.maximumf %89, %90 : vector<32x1xf32>
    %c0_15 = arith.constant 0 : index
    %c0_16 = arith.constant 0 : index
    %92 = vector.load %arg3[%c0_15, %c0_16] : memref<32x1xf32, #tpu.memory_space<vmem>>, vector<32x1xf32>
    %cst_17 = arith.constant 9.99999974E-6 : f32
    %93 = vector.broadcast %cst_17 : f32 to vector<32x1xf32>
    %94 = arith.addf %91, %93 : vector<32x1xf32>
    %95 = math.rsqrt %94 : vector<32x1xf32>
    %96 = arith.mulf %92, %95 : vector<32x1xf32>
    %c0_18 = arith.constant 0 : index
    %c0_19 = arith.constant 0 : index
    %97 = vector.load %arg4[%c0_18, %c0_19] : memref<32x1xf32, #tpu.memory_space<vmem>>, vector<32x1xf32>
    %98 = arith.mulf %85, %96 : vector<32x1xf32>
    %99 = arith.subf %97, %98 : vector<32x1xf32>
    %100 = vector.broadcast %96 : vector<32x1xf32> to vector<32x128xf32>
    %101 = arith.mulf %78, %100 : vector<32x128xf32>
    %102 = vector.broadcast %99 : vector<32x1xf32> to vector<32x128xf32>
    %103 = arith.addf %101, %102 : vector<32x128xf32>
    %cst_20 = arith.constant 0.000000e+00 : f32
    %104 = vector.broadcast %cst_20 : f32 to vector<32x128xf32>
    %105 = arith.maximumf %103, %104 : vector<32x128xf32>
    %106 = vector.broadcast %6 : vector<1x128xf32> to vector<32x128xf32>
    %107 = arith.addf %105, %106 : vector<32x128xf32>
    %108 = vector.extract_strided_slice %107 {offsets = [0, 0], sizes = [32, 64], strides = [1, 1]} : vector<32x128xf32> to vector<32x64xf32>
    %109 = vector.extract_strided_slice %108 {offsets = [0, 0], sizes = [32, 57], strides = [1, 1]} : vector<32x64xf32> to vector<32x57xf32>
    %110 = vector.extract_strided_slice %108 {offsets = [0, 1], sizes = [32, 57], strides = [1, 1]} : vector<32x64xf32> to vector<32x57xf32>
    %111 = vector.extract_strided_slice %108 {offsets = [0, 2], sizes = [32, 57], strides = [1, 1]} : vector<32x64xf32> to vector<32x57xf32>
    %112 = vector.extract_strided_slice %108 {offsets = [0, 3], sizes = [32, 57], strides = [1, 1]} : vector<32x64xf32> to vector<32x57xf32>
    %113 = vector.extract_strided_slice %108 {offsets = [0, 4], sizes = [32, 57], strides = [1, 1]} : vector<32x64xf32> to vector<32x57xf32>
    %114 = vector.extract_strided_slice %108 {offsets = [0, 5], sizes = [32, 57], strides = [1, 1]} : vector<32x64xf32> to vector<32x57xf32>
    %115 = vector.extract_strided_slice %108 {offsets = [0, 6], sizes = [32, 57], strides = [1, 1]} : vector<32x64xf32> to vector<32x57xf32>
    %116 = vector.extract_strided_slice %108 {offsets = [0, 7], sizes = [32, 57], strides = [1, 1]} : vector<32x64xf32> to vector<32x57xf32>
    %117 = tpu.concatenate %109, %110, %111, %112, %113, %114, %115, %116 in 0 : vector<32x57xf32>, vector<32x57xf32>, vector<32x57xf32>, vector<32x57xf32>, vector<32x57xf32>, vector<32x57xf32>, vector<32x57xf32>, vector<32x57xf32> -> vector<256x57xf32>
    %118 = vector.extract_strided_slice %107 {offsets = [0, 64], sizes = [32, 64], strides = [1, 1]} : vector<32x128xf32> to vector<32x64xf32>
    %119 = vector.extract_strided_slice %118 {offsets = [0, 0], sizes = [32, 57], strides = [1, 1]} : vector<32x64xf32> to vector<32x57xf32>
    %120 = vector.extract_strided_slice %118 {offsets = [0, 1], sizes = [32, 57], strides = [1, 1]} : vector<32x64xf32> to vector<32x57xf32>
    %121 = vector.extract_strided_slice %118 {offsets = [0, 2], sizes = [32, 57], strides = [1, 1]} : vector<32x64xf32> to vector<32x57xf32>
    %122 = vector.extract_strided_slice %118 {offsets = [0, 3], sizes = [32, 57], strides = [1, 1]} : vector<32x64xf32> to vector<32x57xf32>
    %123 = vector.extract_strided_slice %118 {offsets = [0, 4], sizes = [32, 57], strides = [1, 1]} : vector<32x64xf32> to vector<32x57xf32>
    %124 = vector.extract_strided_slice %118 {offsets = [0, 5], sizes = [32, 57], strides = [1, 1]} : vector<32x64xf32> to vector<32x57xf32>
    %125 = vector.extract_strided_slice %118 {offsets = [0, 6], sizes = [32, 57], strides = [1, 1]} : vector<32x64xf32> to vector<32x57xf32>
    %126 = vector.extract_strided_slice %118 {offsets = [0, 7], sizes = [32, 57], strides = [1, 1]} : vector<32x64xf32> to vector<32x57xf32>
    %127 = tpu.concatenate %119, %120, %121, %122, %123, %124, %125, %126 in 0 : vector<32x57xf32>, vector<32x57xf32>, vector<32x57xf32>, vector<32x57xf32>, vector<32x57xf32>, vector<32x57xf32>, vector<32x57xf32>, vector<32x57xf32> -> vector<256x57xf32>
    %128 = tpu.concatenate %117, %127 in 1 : vector<256x57xf32>, vector<256x57xf32> -> vector<256x114xf32>
    %c0_21 = arith.constant 0 : index
    %c0_22 = arith.constant 0 : index
    %129 = vector.load %arg5[%c0_21, %c0_22] : memref<32x256xf32, #tpu.memory_space<vmem>>, vector<32x256xf32>
    %cst_23 = arith.constant dense<0.000000e+00> : vector<32x114xf32>
    %130 = tpu.matmul %129, %128, %cst_23 {dimension_numbers = #tpu.dot_dimension_numbers<[1], [0], [0], [1], [0, 0, 1, 1], [], []>} : vector<32x256xf32>, vector<256x114xf32>, vector<32x114xf32> -> vector<32x114xf32>
    %c0_24 = arith.constant 0 : index
    %c0_25 = arith.constant 0 : index
    %131 = vector.load %arg7[%c0_24, %c0_25] : memref<114x58xf32, #tpu.memory_space<vmem>>, vector<114x58xf32>
    %cst_26 = arith.constant dense<0.000000e+00> : vector<32x58xf32>
    %132 = tpu.matmul %130, %131, %cst_26 {dimension_numbers = #tpu.dot_dimension_numbers<[1], [0], [0], [1], [0, 0, 1, 1], [], []>} : vector<32x114xf32>, vector<114x58xf32>, vector<32x58xf32> -> vector<32x58xf32>
    %c0_27 = arith.constant 0 : index
    %c0_28 = arith.constant 0 : index
    %133 = vector.load %arg6[%c0_27, %c0_28] : memref<32x1xf32, #tpu.memory_space<vmem>>, vector<32x1xf32>
    %134 = vector.broadcast %133 : vector<32x1xf32> to vector<32x58xf32>
    %135 = arith.addf %132, %134 : vector<32x58xf32>
    %136 = vector.extract_strided_slice %135 {offsets = [0, 0], sizes = [32, 29], strides = [1, 1]} : vector<32x58xf32> to vector<32x29xf32>
    %cst_29 = arith.constant 0.000000e+00 : f32
    %137 = vector.broadcast %cst_29 : f32 to vector<32x3xf32>
    %cst_30 = arith.constant 0.000000e+00 : f32
    %138 = vector.broadcast %cst_30 : f32 to vector<32x4xf32>
    %139 = tpu.concatenate %137, %136, %138 in 1 : vector<32x3xf32>, vector<32x29xf32>, vector<32x4xf32> -> vector<32x36xf32>
    %140 = vector.extract_strided_slice %139 {offsets = [0, 0], sizes = [32, 29], strides = [1, 1]} : vector<32x36xf32> to vector<32x29xf32>
    %141 = vector.extract_strided_slice %139 {offsets = [0, 1], sizes = [32, 29], strides = [1, 1]} : vector<32x36xf32> to vector<32x29xf32>
    %142 = vector.extract_strided_slice %139 {offsets = [0, 2], sizes = [32, 29], strides = [1, 1]} : vector<32x36xf32> to vector<32x29xf32>
    %143 = vector.extract_strided_slice %139 {offsets = [0, 3], sizes = [32, 29], strides = [1, 1]} : vector<32x36xf32> to vector<32x29xf32>
    %144 = vector.extract_strided_slice %139 {offsets = [0, 4], sizes = [32, 29], strides = [1, 1]} : vector<32x36xf32> to vector<32x29xf32>
    %145 = vector.extract_strided_slice %139 {offsets = [0, 5], sizes = [32, 29], strides = [1, 1]} : vector<32x36xf32> to vector<32x29xf32>
    %146 = vector.extract_strided_slice %139 {offsets = [0, 6], sizes = [32, 29], strides = [1, 1]} : vector<32x36xf32> to vector<32x29xf32>
    %147 = vector.extract_strided_slice %139 {offsets = [0, 7], sizes = [32, 29], strides = [1, 1]} : vector<32x36xf32> to vector<32x29xf32>
    %148 = tpu.concatenate %140, %141, %142, %143, %144, %145, %146, %147 in 0 : vector<32x29xf32>, vector<32x29xf32>, vector<32x29xf32>, vector<32x29xf32>, vector<32x29xf32>, vector<32x29xf32>, vector<32x29xf32>, vector<32x29xf32> -> vector<256x29xf32>
    %149 = vector.extract_strided_slice %135 {offsets = [0, 29], sizes = [32, 29], strides = [1, 1]} : vector<32x58xf32> to vector<32x29xf32>
    %cst_31 = arith.constant 0.000000e+00 : f32
    %150 = vector.broadcast %cst_31 : f32 to vector<32x3xf32>
    %cst_32 = arith.constant 0.000000e+00 : f32
    %151 = vector.broadcast %cst_32 : f32 to vector<32x4xf32>
    %152 = tpu.concatenate %150, %149, %151 in 1 : vector<32x3xf32>, vector<32x29xf32>, vector<32x4xf32> -> vector<32x36xf32>
    %153 = vector.extract_strided_slice %152 {offsets = [0, 0], sizes = [32, 29], strides = [1, 1]} : vector<32x36xf32> to vector<32x29xf32>
    %154 = vector.extract_strided_slice %152 {offsets = [0, 1], sizes = [32, 29], strides = [1, 1]} : vector<32x36xf32> to vector<32x29xf32>
    %155 = vector.extract_strided_slice %152 {offsets = [0, 2], sizes = [32, 29], strides = [1, 1]} : vector<32x36xf32> to vector<32x29xf32>
    %156 = vector.extract_strided_slice %152 {offsets = [0, 3], sizes = [32, 29], strides = [1, 1]} : vector<32x36xf32> to vector<32x29xf32>
    %157 = vector.extract_strided_slice %152 {offsets = [0, 4], sizes = [32, 29], strides = [1, 1]} : vector<32x36xf32> to vector<32x29xf32>
    %158 = vector.extract_strided_slice %152 {offsets = [0, 5], sizes = [32, 29], strides = [1, 1]} : vector<32x36xf32> to vector<32x29xf32>
    %159 = vector.extract_strided_slice %152 {offsets = [0, 6], sizes = [32, 29], strides = [1, 1]} : vector<32x36xf32> to vector<32x29xf32>
    %160 = vector.extract_strided_slice %152 {offsets = [0, 7], sizes = [32, 29], strides = [1, 1]} : vector<32x36xf32> to vector<32x29xf32>
    %161 = tpu.concatenate %153, %154, %155, %156, %157, %158, %159, %160 in 0 : vector<32x29xf32>, vector<32x29xf32>, vector<32x29xf32>, vector<32x29xf32>, vector<32x29xf32>, vector<32x29xf32>, vector<32x29xf32>, vector<32x29xf32> -> vector<256x29xf32>
    %162 = tpu.concatenate %148, %161 in 1 : vector<256x29xf32>, vector<256x29xf32> -> vector<256x58xf32>
    %c0_33 = arith.constant 0 : index
    %c0_34 = arith.constant 0 : index
    %163 = vector.load %arg8[%c0_33, %c0_34] : memref<32x256xf32, #tpu.memory_space<vmem>>, vector<32x256xf32>
    %cst_35 = arith.constant dense<0.000000e+00> : vector<32x58xf32>
    %164 = tpu.matmul %163, %162, %cst_35 {dimension_numbers = #tpu.dot_dimension_numbers<[1], [0], [0], [1], [0, 0, 1, 1], [], []>} : vector<32x256xf32>, vector<256x58xf32>, vector<32x58xf32> -> vector<32x58xf32>
    %cst_36 = arith.constant dense<0.000000e+00> : vector<32xf32>
    %165 = vector.multi_reduction <add>, %164, %cst_36 [1] : vector<32x58xf32> to vector<32xf32>
    %166 = vector.shape_cast %165 : vector<32xf32> to vector<32x1xf32>
    %167 = arith.mulf %164, %164 : vector<32x58xf32>
    %cst_37 = arith.constant dense<0.000000e+00> : vector<32xf32>
    %168 = vector.multi_reduction <add>, %167, %cst_37 [1] : vector<32x58xf32> to vector<32xf32>
    %169 = vector.shape_cast %168 : vector<32xf32> to vector<32x1xf32>
    %cst_38 = arith.constant 5.800000e+01 : f32
    %170 = vector.broadcast %cst_38 : f32 to vector<32x1xf32>
    %171 = arith.divf %166, %170 : vector<32x1xf32>
    %cst_39 = arith.constant 5.800000e+01 : f32
    %172 = vector.broadcast %cst_39 : f32 to vector<32x1xf32>
    %173 = arith.divf %169, %172 : vector<32x1xf32>
    %174 = arith.mulf %171, %171 : vector<32x1xf32>
    %175 = arith.subf %173, %174 : vector<32x1xf32>
    %cst_40 = arith.constant 0.000000e+00 : f32
    %176 = vector.broadcast %cst_40 : f32 to vector<32x1xf32>
    %177 = arith.maximumf %175, %176 : vector<32x1xf32>
    %c0_41 = arith.constant 0 : index
    %c0_42 = arith.constant 0 : index
    %178 = vector.load %arg9[%c0_41, %c0_42] : memref<32x1xf32, #tpu.memory_space<vmem>>, vector<32x1xf32>
    %cst_43 = arith.constant 9.99999974E-6 : f32
    %179 = vector.broadcast %cst_43 : f32 to vector<32x1xf32>
    %180 = arith.addf %177, %179 : vector<32x1xf32>
    %181 = math.rsqrt %180 : vector<32x1xf32>
    %182 = arith.mulf %178, %181 : vector<32x1xf32>
    %c0_44 = arith.constant 0 : index
    %c0_45 = arith.constant 0 : index
    %183 = vector.load %arg10[%c0_44, %c0_45] : memref<32x1xf32, #tpu.memory_space<vmem>>, vector<32x1xf32>
    %184 = arith.mulf %171, %182 : vector<32x1xf32>
    %185 = arith.subf %183, %184 : vector<32x1xf32>
    %186 = vector.broadcast %182 : vector<32x1xf32> to vector<32x58xf32>
    %187 = arith.mulf %164, %186 : vector<32x58xf32>
    %188 = vector.broadcast %185 : vector<32x1xf32> to vector<32x58xf32>
    %189 = arith.addf %187, %188 : vector<32x58xf32>
    %cst_46 = arith.constant 0.000000e+00 : f32
    %190 = vector.broadcast %cst_46 : f32 to vector<32x58xf32>
    %191 = arith.maximumf %189, %190 : vector<32x58xf32>
    %192 = arith.addf %191, %135 : vector<32x58xf32>
    %193 = vector.extract_strided_slice %192 {offsets = [0, 0], sizes = [32, 29], strides = [1, 1]} : vector<32x58xf32> to vector<32x29xf32>
    %194 = vector.extract_strided_slice %193 {offsets = [0, 0], sizes = [32, 22], strides = [1, 1]} : vector<32x29xf32> to vector<32x22xf32>
    %195 = vector.extract_strided_slice %193 {offsets = [0, 1], sizes = [32, 22], strides = [1, 1]} : vector<32x29xf32> to vector<32x22xf32>
    %196 = vector.extract_strided_slice %193 {offsets = [0, 2], sizes = [32, 22], strides = [1, 1]} : vector<32x29xf32> to vector<32x22xf32>
    %197 = vector.extract_strided_slice %193 {offsets = [0, 3], sizes = [32, 22], strides = [1, 1]} : vector<32x29xf32> to vector<32x22xf32>
    %198 = vector.extract_strided_slice %193 {offsets = [0, 4], sizes = [32, 22], strides = [1, 1]} : vector<32x29xf32> to vector<32x22xf32>
    %199 = vector.extract_strided_slice %193 {offsets = [0, 5], sizes = [32, 22], strides = [1, 1]} : vector<32x29xf32> to vector<32x22xf32>
    %200 = vector.extract_strided_slice %193 {offsets = [0, 6], sizes = [32, 22], strides = [1, 1]} : vector<32x29xf32> to vector<32x22xf32>
    %201 = vector.extract_strided_slice %193 {offsets = [0, 7], sizes = [32, 22], strides = [1, 1]} : vector<32x29xf32> to vector<32x22xf32>
    %202 = tpu.concatenate %194, %195, %196, %197, %198, %199, %200, %201 in 0 : vector<32x22xf32>, vector<32x22xf32>, vector<32x22xf32>, vector<32x22xf32>, vector<32x22xf32>, vector<32x22xf32>, vector<32x22xf32>, vector<32x22xf32> -> vector<256x22xf32>
    %203 = vector.extract_strided_slice %192 {offsets = [0, 29], sizes = [32, 29], strides = [1, 1]} : vector<32x58xf32> to vector<32x29xf32>
    %204 = vector.extract_strided_slice %203 {offsets = [0, 0], sizes = [32, 22], strides = [1, 1]} : vector<32x29xf32> to vector<32x22xf32>
    %205 = vector.extract_strided_slice %203 {offsets = [0, 1], sizes = [32, 22], strides = [1, 1]} : vector<32x29xf32> to vector<32x22xf32>
    %206 = vector.extract_strided_slice %203 {offsets = [0, 2], sizes = [32, 22], strides = [1, 1]} : vector<32x29xf32> to vector<32x22xf32>
    %207 = vector.extract_strided_slice %203 {offsets = [0, 3], sizes = [32, 22], strides = [1, 1]} : vector<32x29xf32> to vector<32x22xf32>
    %208 = vector.extract_strided_slice %203 {offsets = [0, 4], sizes = [32, 22], strides = [1, 1]} : vector<32x29xf32> to vector<32x22xf32>
    %209 = vector.extract_strided_slice %203 {offsets = [0, 5], sizes = [32, 22], strides = [1, 1]} : vector<32x29xf32> to vector<32x22xf32>
    %210 = vector.extract_strided_slice %203 {offsets = [0, 6], sizes = [32, 22], strides = [1, 1]} : vector<32x29xf32> to vector<32x22xf32>
    %211 = vector.extract_strided_slice %203 {offsets = [0, 7], sizes = [32, 22], strides = [1, 1]} : vector<32x29xf32> to vector<32x22xf32>
    %212 = tpu.concatenate %204, %205, %206, %207, %208, %209, %210, %211 in 0 : vector<32x22xf32>, vector<32x22xf32>, vector<32x22xf32>, vector<32x22xf32>, vector<32x22xf32>, vector<32x22xf32>, vector<32x22xf32>, vector<32x22xf32> -> vector<256x22xf32>
    %213 = tpu.concatenate %202, %212 in 1 : vector<256x22xf32>, vector<256x22xf32> -> vector<256x44xf32>
    %c0_47 = arith.constant 0 : index
    %c0_48 = arith.constant 0 : index
    %214 = vector.load %arg11[%c0_47, %c0_48] : memref<32x256xf32, #tpu.memory_space<vmem>>, vector<32x256xf32>
    %cst_49 = arith.constant dense<0.000000e+00> : vector<32x44xf32>
    %215 = tpu.matmul %214, %213, %cst_49 {dimension_numbers = #tpu.dot_dimension_numbers<[1], [0], [0], [1], [0, 0, 1, 1], [], []>} : vector<32x256xf32>, vector<256x44xf32>, vector<32x44xf32> -> vector<32x44xf32>
    %c0_50 = arith.constant 0 : index
    %c0_51 = arith.constant 0 : index
    %216 = vector.load %arg13[%c0_50, %c0_51] : memref<44x22xf32, #tpu.memory_space<vmem>>, vector<44x22xf32>
    %cst_52 = arith.constant dense<0.000000e+00> : vector<32x22xf32>
    %217 = tpu.matmul %215, %216, %cst_52 {dimension_numbers = #tpu.dot_dimension_numbers<[1], [0], [0], [1], [0, 0, 1, 1], [], []>} : vector<32x44xf32>, vector<44x22xf32>, vector<32x22xf32> -> vector<32x22xf32>
    %c0_53 = arith.constant 0 : index
    %c0_54 = arith.constant 0 : index
    %218 = vector.load %arg12[%c0_53, %c0_54] : memref<32x1xf32, #tpu.memory_space<vmem>>, vector<32x1xf32>
    %219 = vector.broadcast %218 : vector<32x1xf32> to vector<32x22xf32>
    %220 = arith.addf %217, %219 : vector<32x22xf32>
    %221 = tpu.transpose %220, [1, 0] : vector<32x22xf32> -> vector<22x32xf32>
    %222 = vector.extract_strided_slice %221 {offsets = [0, 0], sizes = [11, 32], strides = [1, 1]} : vector<22x32xf32> to vector<11x32xf32>
    %cst_55 = arith.constant 0.000000e+00 : f32
    %223 = vector.broadcast %cst_55 : f32 to vector<3x32xf32>
    %cst_56 = arith.constant 0.000000e+00 : f32
    %224 = vector.broadcast %cst_56 : f32 to vector<4x32xf32>
    %225 = tpu.concatenate %223, %222, %224 in 0 : vector<3x32xf32>, vector<11x32xf32>, vector<4x32xf32> -> vector<18x32xf32>
    %226 = vector.extract_strided_slice %225 {offsets = [0, 0], sizes = [11, 32], strides = [1, 1]} : vector<18x32xf32> to vector<11x32xf32>
    %227 = vector.extract_strided_slice %225 {offsets = [1, 0], sizes = [11, 32], strides = [1, 1]} : vector<18x32xf32> to vector<11x32xf32>
    %228 = vector.extract_strided_slice %225 {offsets = [2, 0], sizes = [11, 32], strides = [1, 1]} : vector<18x32xf32> to vector<11x32xf32>
    %229 = vector.extract_strided_slice %225 {offsets = [3, 0], sizes = [11, 32], strides = [1, 1]} : vector<18x32xf32> to vector<11x32xf32>
    %230 = vector.extract_strided_slice %225 {offsets = [4, 0], sizes = [11, 32], strides = [1, 1]} : vector<18x32xf32> to vector<11x32xf32>
    %231 = vector.extract_strided_slice %225 {offsets = [5, 0], sizes = [11, 32], strides = [1, 1]} : vector<18x32xf32> to vector<11x32xf32>
    %232 = vector.extract_strided_slice %225 {offsets = [6, 0], sizes = [11, 32], strides = [1, 1]} : vector<18x32xf32> to vector<11x32xf32>
    %233 = vector.extract_strided_slice %225 {offsets = [7, 0], sizes = [11, 32], strides = [1, 1]} : vector<18x32xf32> to vector<11x32xf32>
    %234 = tpu.concatenate %226, %227, %228, %229, %230, %231, %232, %233 in 1 : vector<11x32xf32>, vector<11x32xf32>, vector<11x32xf32>, vector<11x32xf32>, vector<11x32xf32>, vector<11x32xf32>, vector<11x32xf32>, vector<11x32xf32> -> vector<11x256xf32>
    %235 = vector.extract_strided_slice %221 {offsets = [11, 0], sizes = [11, 32], strides = [1, 1]} : vector<22x32xf32> to vector<11x32xf32>
    %cst_57 = arith.constant 0.000000e+00 : f32
    %236 = vector.broadcast %cst_57 : f32 to vector<3x32xf32>
    %cst_58 = arith.constant 0.000000e+00 : f32
    %237 = vector.broadcast %cst_58 : f32 to vector<4x32xf32>
    %238 = tpu.concatenate %236, %235, %237 in 0 : vector<3x32xf32>, vector<11x32xf32>, vector<4x32xf32> -> vector<18x32xf32>
    %239 = vector.extract_strided_slice %238 {offsets = [0, 0], sizes = [11, 32], strides = [1, 1]} : vector<18x32xf32> to vector<11x32xf32>
    %240 = vector.extract_strided_slice %238 {offsets = [1, 0], sizes = [11, 32], strides = [1, 1]} : vector<18x32xf32> to vector<11x32xf32>
    %241 = vector.extract_strided_slice %238 {offsets = [2, 0], sizes = [11, 32], strides = [1, 1]} : vector<18x32xf32> to vector<11x32xf32>
    %242 = vector.extract_strided_slice %238 {offsets = [3, 0], sizes = [11, 32], strides = [1, 1]} : vector<18x32xf32> to vector<11x32xf32>
    %243 = vector.extract_strided_slice %238 {offsets = [4, 0], sizes = [11, 32], strides = [1, 1]} : vector<18x32xf32> to vector<11x32xf32>
    %244 = vector.extract_strided_slice %238 {offsets = [5, 0], sizes = [11, 32], strides = [1, 1]} : vector<18x32xf32> to vector<11x32xf32>
    %245 = vector.extract_strided_slice %238 {offsets = [6, 0], sizes = [11, 32], strides = [1, 1]} : vector<18x32xf32> to vector<11x32xf32>
    %246 = vector.extract_strided_slice %238 {offsets = [7, 0], sizes = [11, 32], strides = [1, 1]} : vector<18x32xf32> to vector<11x32xf32>
    %247 = tpu.concatenate %239, %240, %241, %242, %243, %244, %245, %246 in 1 : vector<11x32xf32>, vector<11x32xf32>, vector<11x32xf32>, vector<11x32xf32>, vector<11x32xf32>, vector<11x32xf32>, vector<11x32xf32>, vector<11x32xf32> -> vector<11x256xf32>
    %248 = tpu.concatenate %234, %247 in 0 : vector<11x256xf32>, vector<11x256xf32> -> vector<22x256xf32>
    %c0_59 = arith.constant 0 : index
    %c0_60 = arith.constant 0 : index
    %249 = vector.load %arg14[%c0_59, %c0_60] : memref<256x32xf32, #tpu.memory_space<vmem>>, vector<256x32xf32>
    %cst_61 = arith.constant dense<0.000000e+00> : vector<22x32xf32>
    %250 = tpu.matmul %248, %249, %cst_61 {dimension_numbers = #tpu.dot_dimension_numbers<[1], [0], [0], [1], [0, 0, 1, 1], [], []>} : vector<22x256xf32>, vector<256x32xf32>, vector<22x32xf32> -> vector<22x32xf32>
    %cst_62 = arith.constant dense<0.000000e+00> : vector<32xf32>
    %251 = vector.multi_reduction <add>, %250, %cst_62 [0] : vector<22x32xf32> to vector<32xf32>
    %252 = vector.shape_cast %251 : vector<32xf32> to vector<1x32xf32>
    %253 = arith.mulf %250, %250 : vector<22x32xf32>
    %cst_63 = arith.constant dense<0.000000e+00> : vector<32xf32>
    %254 = vector.multi_reduction <add>, %253, %cst_63 [0] : vector<22x32xf32> to vector<32xf32>
    %255 = vector.shape_cast %254 : vector<32xf32> to vector<1x32xf32>
    %cst_64 = arith.constant 2.200000e+01 : f32
    %256 = vector.broadcast %cst_64 : f32 to vector<1x32xf32>
    %257 = arith.divf %252, %256 : vector<1x32xf32>
    %cst_65 = arith.constant 2.200000e+01 : f32
    %258 = vector.broadcast %cst_65 : f32 to vector<1x32xf32>
    %259 = arith.divf %255, %258 : vector<1x32xf32>
    %260 = arith.mulf %257, %257 : vector<1x32xf32>
    %261 = arith.subf %259, %260 : vector<1x32xf32>
    %cst_66 = arith.constant 0.000000e+00 : f32
    %262 = vector.broadcast %cst_66 : f32 to vector<1x32xf32>
    %263 = arith.maximumf %261, %262 : vector<1x32xf32>
    %c0_67 = arith.constant 0 : index
    %c0_68 = arith.constant 0 : index
    %264 = vector.load %arg15[%c0_67, %c0_68] : memref<1x32xf32, #tpu.memory_space<vmem>>, vector<1x32xf32>
    %cst_69 = arith.constant 9.99999974E-6 : f32
    %265 = vector.broadcast %cst_69 : f32 to vector<1x32xf32>
    %266 = arith.addf %263, %265 : vector<1x32xf32>
    %267 = math.rsqrt %266 : vector<1x32xf32>
    %268 = arith.mulf %264, %267 : vector<1x32xf32>
    %c0_70 = arith.constant 0 : index
    %c0_71 = arith.constant 0 : index
    %269 = vector.load %arg16[%c0_70, %c0_71] : memref<1x32xf32, #tpu.memory_space<vmem>>, vector<1x32xf32>
    %270 = arith.mulf %257, %268 : vector<1x32xf32>
    %271 = arith.subf %269, %270 : vector<1x32xf32>
    %272 = vector.broadcast %268 : vector<1x32xf32> to vector<22x32xf32>
    %273 = arith.mulf %250, %272 : vector<22x32xf32>
    %274 = vector.broadcast %271 : vector<1x32xf32> to vector<22x32xf32>
    %275 = arith.addf %273, %274 : vector<22x32xf32>
    %cst_72 = arith.constant 0.000000e+00 : f32
    %276 = vector.broadcast %cst_72 : f32 to vector<22x32xf32>
    %277 = arith.maximumf %275, %276 : vector<22x32xf32>
    %278 = arith.addf %277, %221 : vector<22x32xf32>
    %279 = vector.extract_strided_slice %278 {offsets = [0, 0], sizes = [11, 32], strides = [1, 1]} : vector<22x32xf32> to vector<11x32xf32>
    %280 = vector.extract_strided_slice %279 {offsets = [0, 0], sizes = [4, 32], strides = [1, 1]} : vector<11x32xf32> to vector<4x32xf32>
    %281 = vector.extract_strided_slice %279 {offsets = [1, 0], sizes = [4, 32], strides = [1, 1]} : vector<11x32xf32> to vector<4x32xf32>
    %282 = vector.extract_strided_slice %279 {offsets = [2, 0], sizes = [4, 32], strides = [1, 1]} : vector<11x32xf32> to vector<4x32xf32>
    %283 = vector.extract_strided_slice %279 {offsets = [3, 0], sizes = [4, 32], strides = [1, 1]} : vector<11x32xf32> to vector<4x32xf32>
    %284 = vector.extract_strided_slice %279 {offsets = [4, 0], sizes = [4, 32], strides = [1, 1]} : vector<11x32xf32> to vector<4x32xf32>
    %285 = vector.extract_strided_slice %279 {offsets = [5, 0], sizes = [4, 32], strides = [1, 1]} : vector<11x32xf32> to vector<4x32xf32>
    %286 = vector.extract_strided_slice %279 {offsets = [6, 0], sizes = [4, 32], strides = [1, 1]} : vector<11x32xf32> to vector<4x32xf32>
    %287 = vector.extract_strided_slice %279 {offsets = [7, 0], sizes = [4, 32], strides = [1, 1]} : vector<11x32xf32> to vector<4x32xf32>
    %288 = tpu.concatenate %280, %281, %282, %283, %284, %285, %286, %287 in 1 : vector<4x32xf32>, vector<4x32xf32>, vector<4x32xf32>, vector<4x32xf32>, vector<4x32xf32>, vector<4x32xf32>, vector<4x32xf32>, vector<4x32xf32> -> vector<4x256xf32>
    %289 = vector.extract_strided_slice %278 {offsets = [11, 0], sizes = [11, 32], strides = [1, 1]} : vector<22x32xf32> to vector<11x32xf32>
    %290 = vector.extract_strided_slice %289 {offsets = [0, 0], sizes = [4, 32], strides = [1, 1]} : vector<11x32xf32> to vector<4x32xf32>
    %291 = vector.extract_strided_slice %289 {offsets = [1, 0], sizes = [4, 32], strides = [1, 1]} : vector<11x32xf32> to vector<4x32xf32>
    %292 = vector.extract_strided_slice %289 {offsets = [2, 0], sizes = [4, 32], strides = [1, 1]} : vector<11x32xf32> to vector<4x32xf32>
    %293 = vector.extract_strided_slice %289 {offsets = [3, 0], sizes = [4, 32], strides = [1, 1]} : vector<11x32xf32> to vector<4x32xf32>
    %294 = vector.extract_strided_slice %289 {offsets = [4, 0], sizes = [4, 32], strides = [1, 1]} : vector<11x32xf32> to vector<4x32xf32>
    %295 = vector.extract_strided_slice %289 {offsets = [5, 0], sizes = [4, 32], strides = [1, 1]} : vector<11x32xf32> to vector<4x32xf32>
    %296 = vector.extract_strided_slice %289 {offsets = [6, 0], sizes = [4, 32], strides = [1, 1]} : vector<11x32xf32> to vector<4x32xf32>
    %297 = vector.extract_strided_slice %289 {offsets = [7, 0], sizes = [4, 32], strides = [1, 1]} : vector<11x32xf32> to vector<4x32xf32>
    %298 = tpu.concatenate %290, %291, %292, %293, %294, %295, %296, %297 in 1 : vector<4x32xf32>, vector<4x32xf32>, vector<4x32xf32>, vector<4x32xf32>, vector<4x32xf32>, vector<4x32xf32>, vector<4x32xf32>, vector<4x32xf32> -> vector<4x256xf32>
    %299 = tpu.concatenate %288, %298 in 0 : vector<4x256xf32>, vector<4x256xf32> -> vector<8x256xf32>
    %c0_73 = arith.constant 0 : index
    %c0_74 = arith.constant 0 : index
    %300 = vector.load %arg17[%c0_73, %c0_74] : memref<256x32xf32, #tpu.memory_space<vmem>>, vector<256x32xf32>
    %cst_75 = arith.constant dense<0.000000e+00> : vector<8x32xf32>
    %301 = tpu.matmul %299, %300, %cst_75 {dimension_numbers = #tpu.dot_dimension_numbers<[1], [0], [0], [1], [0, 0, 1, 1], [], []>} : vector<8x256xf32>, vector<256x32xf32>, vector<8x32xf32> -> vector<8x32xf32>
    %c0_76 = arith.constant 0 : index
    %c0_77 = arith.constant 0 : index
    %302 = vector.load %arg19[%c0_76, %c0_77] : memref<4x8xf32, #tpu.memory_space<vmem>>, vector<4x8xf32>
    %cst_78 = arith.constant dense<0.000000e+00> : vector<4x32xf32>
    %303 = tpu.matmul %302, %301, %cst_78 {dimension_numbers = #tpu.dot_dimension_numbers<[1], [0], [0], [1], [0, 0, 1, 1], [], []>} : vector<4x8xf32>, vector<8x32xf32>, vector<4x32xf32> -> vector<4x32xf32>
    %c0_79 = arith.constant 0 : index
    %c0_80 = arith.constant 0 : index
    %304 = vector.load %arg18[%c0_79, %c0_80] : memref<1x32xf32, #tpu.memory_space<vmem>>, vector<1x32xf32>
    %305 = vector.broadcast %304 : vector<1x32xf32> to vector<4x32xf32>
    %306 = arith.addf %303, %305 : vector<4x32xf32>
    %307 = vector.extract_strided_slice %306 {offsets = [0, 0], sizes = [2, 32], strides = [1, 1]} : vector<4x32xf32> to vector<2x32xf32>
    %cst_81 = arith.constant 0.000000e+00 : f32
    %308 = vector.broadcast %cst_81 : f32 to vector<1x32xf32>
    %cst_82 = arith.constant 0.000000e+00 : f32
    %309 = vector.broadcast %cst_82 : f32 to vector<2x32xf32>
    %310 = tpu.concatenate %308, %307, %309 in 0 : vector<1x32xf32>, vector<2x32xf32>, vector<2x32xf32> -> vector<5x32xf32>
    %311 = vector.extract_strided_slice %310 {offsets = [0, 0], sizes = [2, 32], strides = [1, 1]} : vector<5x32xf32> to vector<2x32xf32>
    %312 = vector.extract_strided_slice %310 {offsets = [1, 0], sizes = [2, 32], strides = [1, 1]} : vector<5x32xf32> to vector<2x32xf32>
    %313 = vector.extract_strided_slice %310 {offsets = [2, 0], sizes = [2, 32], strides = [1, 1]} : vector<5x32xf32> to vector<2x32xf32>
    %314 = vector.extract_strided_slice %310 {offsets = [3, 0], sizes = [2, 32], strides = [1, 1]} : vector<5x32xf32> to vector<2x32xf32>
    %315 = tpu.concatenate %311, %312, %313, %314 in 1 : vector<2x32xf32>, vector<2x32xf32>, vector<2x32xf32>, vector<2x32xf32> -> vector<2x128xf32>
    %316 = vector.extract_strided_slice %306 {offsets = [2, 0], sizes = [2, 32], strides = [1, 1]} : vector<4x32xf32> to vector<2x32xf32>
    %cst_83 = arith.constant 0.000000e+00 : f32
    %317 = vector.broadcast %cst_83 : f32 to vector<1x32xf32>
    %cst_84 = arith.constant 0.000000e+00 : f32
    %318 = vector.broadcast %cst_84 : f32 to vector<2x32xf32>
    %319 = tpu.concatenate %317, %316, %318 in 0 : vector<1x32xf32>, vector<2x32xf32>, vector<2x32xf32> -> vector<5x32xf32>
    %320 = vector.extract_strided_slice %319 {offsets = [0, 0], sizes = [2, 32], strides = [1, 1]} : vector<5x32xf32> to vector<2x32xf32>
    %321 = vector.extract_strided_slice %319 {offsets = [1, 0], sizes = [2, 32], strides = [1, 1]} : vector<5x32xf32> to vector<2x32xf32>
    %322 = vector.extract_strided_slice %319 {offsets = [2, 0], sizes = [2, 32], strides = [1, 1]} : vector<5x32xf32> to vector<2x32xf32>
    %323 = vector.extract_strided_slice %319 {offsets = [3, 0], sizes = [2, 32], strides = [1, 1]} : vector<5x32xf32> to vector<2x32xf32>
    %324 = tpu.concatenate %320, %321, %322, %323 in 1 : vector<2x32xf32>, vector<2x32xf32>, vector<2x32xf32>, vector<2x32xf32> -> vector<2x128xf32>
    %325 = tpu.concatenate %315, %324 in 0 : vector<2x128xf32>, vector<2x128xf32> -> vector<4x128xf32>
    %c0_85 = arith.constant 0 : index
    %c0_86 = arith.constant 0 : index
    %326 = vector.load %arg20[%c0_85, %c0_86] : memref<128x64xf32, #tpu.memory_space<vmem>>, vector<128x64xf32>
    %cst_87 = arith.constant dense<0.000000e+00> : vector<4x64xf32>
    %327 = tpu.matmul %325, %326, %cst_87 {dimension_numbers = #tpu.dot_dimension_numbers<[1], [0], [0], [1], [0, 0, 1, 1], [], []>} : vector<4x128xf32>, vector<128x64xf32>, vector<4x64xf32> -> vector<4x64xf32>
    %c0_88 = arith.constant 0 : index
    %c0_89 = arith.constant 0 : index
    %328 = vector.load %arg21[%c0_88, %c0_89] : memref<1x64xf32, #tpu.memory_space<vmem>>, vector<1x64xf32>
    %329 = vector.broadcast %328 : vector<1x64xf32> to vector<4x64xf32>
    %330 = arith.addf %327, %329 : vector<4x64xf32>
    %331 = vector.extract_strided_slice %330 {offsets = [0, 0], sizes = [2, 64], strides = [1, 1]} : vector<4x64xf32> to vector<2x64xf32>
    %c0_90 = arith.constant 0 : index
    %c0_91 = arith.constant 0 : index
    %c0_92 = arith.constant 0 : index
    %332 = vector.load %arg22[%c0_90, %c0_91, %c0_92] : memref<2x2x64xf32, #tpu.memory_space<vmem>>, vector<1x2x64xf32>
    %333 = vector.shape_cast %332 : vector<1x2x64xf32> to vector<2x64xf32>
    %334 = vector.shape_cast %331 : vector<2x64xf32> to vector<1x2x64xf32>
    tpu.vector_store %arg22[%c0_90, %c0_91, %c0_92], %334 {strides = array<i32>} : memref<2x2x64xf32, #tpu.memory_space<vmem>>, vector<1x2x64xf32>,
    %335 = vector.extract_strided_slice %330 {offsets = [2, 0], sizes = [2, 64], strides = [1, 1]} : vector<4x64xf32> to vector<2x64xf32>
    %c1 = arith.constant 1 : index
    %c0_93 = arith.constant 0 : index
    %c0_94 = arith.constant 0 : index
    %336 = vector.load %arg22[%c1, %c0_93, %c0_94] : memref<2x2x64xf32, #tpu.memory_space<vmem>>, vector<1x2x64xf32>
    %337 = vector.shape_cast %336 : vector<1x2x64xf32> to vector<2x64xf32>
    %338 = vector.shape_cast %335 : vector<2x64xf32> to vector<1x2x64xf32>
    tpu.vector_store %arg22[%c1, %c0_93, %c0_94], %338 {strides = array<i32>} : memref<2x2x64xf32, #tpu.memory_space<vmem>>, vector<1x2x64xf32>,
    return
  }
}

</mosaic_0001>

<bundles_post_ra>
// kernel: downsampling_forward.1
= control target key start
LH: loop header
LB: loop body
LE: loop exit
PB: predicated region body
PF: predicated region fallthrough
CT: control target
= control target key end

     0   :  { %s5381_s0 = inlined_call_operand.vmem [shape: f32[2,1,128], index: 0, kind: input, shape index: {}]   ;;  %s5382_s1 = inlined_call_operand.vmem [shape: f32[128,64], index: 1, kind: input, shape index: {}]   ;;  %s5383_s2 = inlined_call_operand.vmem [shape: f32[32,8], index: 2, kind: input, shape index: {}]   ;;  %s5384_s3 = inlined_call_operand.vmem [shape: f32[32,1], index: 3, kind: input, shape index: {}]   ;;  %s5385_s4 = inlined_call_operand.vmem [shape: f32[32,1], index: 4, kind: input, shape index: {}]   ;;  %s5386_s5 = inlined_call_operand.vmem [shape: f32[32,256], index: 5, kind: input, shape index: {}]   ;;  %s5387_s6 = inlined_call_operand.vmem [shape: f32[32,1], index: 6, kind: input, shape index: {}]   ;;  %s5388_s7 = inlined_call_operand.vmem [shape: f32[114,58], index: 7, kind: input, shape index: {}]   ;;  %s5389_s8 = inlined_call_operand.vmem [shape: f32[32,256], index: 8, kind: input, shape index: {}]   ;;  %s5390_s9 = inlined_call_operand.vmem [shape: f32[32,1], index: 9, kind: input, shape index: {}]   ;;  %s5391_s10 = inlined_call_operand.vmem [shape: f32[32,1], index: 10, kind: input, shape index: {}]   ;;  %s5392_s11 = inlined_call_operand.vmem [shape: f32[32,256], index: 11, kind: input, shape index: {}]   ;;  %s5393_s12 = inlined_call_operand.vmem [shape: f32[32,1], index: 12, kind: input, shape index: {}]   ;;  %s5394_s13 = inlined_call_operand.vmem [shape: f32[44,22], index: 13, kind: input, shape index: {}]   ;;  %s5395_s14 = inlined_call_operand.vmem [shape: f32[256,32], index: 14, kind: input, shape index: {}]   ;;  %s5396_s15 = inlined_call_operand.vmem [shape: f32[1,32], index: 15, kind: input, shape index: {}]   ;;  %s5397_s16 = inlined_call_operand.vmem [shape: f32[1,32], index: 16, kind: input, shape index: {}]   ;;  %s5398_s17 = inlined_call_operand.vmem [shape: f32[256,32], index: 17, kind: input, shape index: {}]   ;;  %s5399_s18 = inlined_call_operand.vmem [shape: f32[1,32], index: 18, kind: input, shape index: {}]   ;;  %s5400_s19 = inlined_call_operand.vmem [shape: f32[4,8], index: 19, kind: input, shape index: {}]   ;;  %s5401_s20 = inlined_call_operand.vmem [shape: f32[128,64], index: 20, kind: input, shape index: {}]   ;;  %s5402_s21 = inlined_call_operand.vmem [shape: f32[1,64], index: 21, kind: input, shape index: {}]   ;;  %s5403_s22 = inlined_call_operand.hbm [shape: f32[2,2,64], index: 22, kind: output, shape index: {}]  }
   0x1   :  { %5427 = sst [smem:[#allocation5_spill]] %s5381_s0 }
   0x2   :  { %5428 = sst [smem:[#allocation6_spill]] %s5382_s1 }
   0x3   :  { %5429 = sst [smem:[#allocation7_spill]] %s5383_s2 }
   0x4   :  { %5430 = sst [smem:[#allocation8_spill]] %s5384_s3 }
   0x5   :  { %5431 = sst [smem:[#allocation9_spill]] %s5385_s4 }
   0x6   :  { %5432 = sst [smem:[#allocation10_spill]] %s5386_s5 }
   0x7   :  { %5433 = sst [smem:[#allocation11_spill]] %s5387_s6 }
   0x8   :  { %s5434_s29 = sld [smem:[#allocation6_spill]]  ;;  %v3466_v1 = vmov 0.0   ;;  %vm3467_vm0 = vmmov 0  }
   0x9   :  { %3137 = vmatprep.subr.mxu0 %v3466_v1  ;;  %3169 = vmatprep.mubr.msk.f32.mxu0 %vm3467_vm0, %v3466_v1 }
   0xe   :  { %v89_v0 = vld [vmem:[%s5434_s29 + $0x78] sm:$0xff]  ;;  %v88_v2 = vld [vmem:[%s5434_s29 + $0x70] sm:$0xff]  ;;  %v87_v3 = vld [vmem:[%s5434_s29 + $0x68] sm:$0xff] }
   0xf   :  { %3138 = vmatpush3.msra.mxu0 %v89_v0  ;;  %v86_v4 = vld [vmem:[%s5434_s29 + $0x60] sm:$0xff] }
  0x10   :  { %3139 = vmatprep.subr.mxu0 %v3466_v1 }
  0x11   :  { %3140 = vmatpush3.msra.mxu0 %v88_v2 }
  0x12   :  { %3141 = vmatprep.subr.mxu0 %v3466_v1 }
  0x13   :  { %3142 = vmatpush3.msra.mxu0 %v87_v3 }
  0x14   :  { %27 = vsyncpa [#allocation3], 0  ;;  %3143 = vmatprep.subr.mxu0 %v3466_v1  ;;  %v85_v5 = vld [vmem:[%s5434_s29 + $0x58] sm:$0xff]  ;;  %v84_v6 = vld [vmem:[%s5434_s29 + $0x50] sm:$0xff]  ;;  %v3468_v9 = vmov 1966171168   ;;  %v96_v11 = vlaneseq }
  0x15   :  { %3144 = vmatpush3.msra.mxu0 %v86_v4  ;;  %v83_v7 = vld [vmem:[%s5434_s29 + $0x48] sm:$0xff]  ;;  %v82_v8 = vld [vmem:[%s5434_s29 + $0x40] sm:$0xff]  ;;  %v94_v10 = vunpack.c.l.s4 %v3468_v9  ;;  %v81_v12 = vld [vmem:[%s5434_s29 + $0x38] sm:$0xff]  ;;  %s5435_s24 = sld [smem:[#allocation5_spill]]  ;;  %v3469_v29 = vmov 0   ;;  %v3470_v30 = vmov 1  }
  0x16   :  { %3145 = vmatprep.subr.mxu0 %v3466_v1  ;;  %v80_v13 = vld [vmem:[%s5434_s29 + $0x30] sm:$0xff]  ;;  %v3656_v15 = vshrl.u32 %v96_v11, 7  ;;  %v79_v18 = vld [vmem:[%s5434_s29 + $0x28] sm:$0xff]  ;;  %v78_v19 = vld [vmem:[%s5434_s29 + $0x20] sm:$0xff]  ;;  %s5436_s26 = sld [smem:[#allocation7_spill]]  ;;  %3300 = vset.pattern.permute.xlu1 %v3469_v29  ;;  %v3471_v32 = vmov 2  }
  0x17   :  { %3146 = vmatpush3.msra.mxu0 %v85_v5  ;;  %v95_v14 = vunpack.c.0.s8 %v94_v10  ;;  %v77_v22 = vld [vmem:[%s5434_s29 + $0x18] sm:$0xff]  ;;  %v76_v23 = vld [vmem:[%s5434_s29 + $0x10] sm:$0xff]  ;;  %v75_v25 = vld [vmem:[%s5434_s29 + $0x8] sm:$0xff]  ;;  %3301 = vset.pattern.permute.xlu0 %v3470_v30  ;;  %v3472_v35 = vmov 4   ;;  %s5411_s4 = smov 64   ;;  %vm183_vm1 = vcmask 523264  }
  0x18   :  { %3147 = vmatprep.subr.mxu0 %v3466_v1  ;;  %v74_v26 = vld [vmem:[%s5434_s29] sm:$0xff]  ;;  %s3474_s0 = smov 67   ;;  %s5413_s23 = smov 3   ;;  %v3476_v41 = vmov 3   ;;  %v3477_v42 = vmov 6   ;;  %v3478_v43 = vmov 5  }
  0x19   :  { %3148 = vmatpush3.msra.mxu0 %v84_v6  ;;  %v98_v21 = vsub.s32 %v95_v14, %v3656_v15  ;;  %v3479_v44 = vmov 7   ;;  %vm193_vm2 = vcmask 23552   ;;  %vm195_vm3 = vcmask 547840   ;;  %s5417_s1 = smov 127   ;;  %s3481_s5 = smov 63  }
  0x1a   :  { %3149 = vmatprep.subr.mxu0 %v3466_v1  ;;  %s5421_s6 = smov 126   ;;  %s3484_s25 = smov 60   ;;  %vm960_vm4 = vcmask 1041408   ;;  %vm782_vm5 = vcmask 465920   ;;  %vm947_vm6 = vcmask 932864   ;;  %vm1069_vm7 = vcmask 261120  }
  0x1b   :  { %3150 = vmatpush3.msra.mxu0 %v83_v7  ;;  %v72_v16 = vld [vmem:[%s5435_s24] sm:$0x1]  ;;  %v73_v17 = vld [vmem:[%s5435_s24 + $0x1] sm:$0x1]  ;;  %s3482_s24 = smov 62   ;;  %s5419_s2 = smov 123  }
  0x1c   :  { %3151 = vmatprep.subr.mxu0 %v3466_v1  ;;  %v92_v20 = vcombine.low %v72_v16, %v73_v17  ;;  %v3693_v28 = vld [vmem:[%s5436_s26 + $0x18] sm:$0xff]  ;;  %v3700_v31 = vld [vmem:[%s5436_s26 + $0x10] sm:$0xff]  ;;  %v3707_v33 = vld [vmem:[%s5436_s26 + $0x8] sm:$0xff]  ;;  %s3487_s29 = smov 61   ;;  %s3488_s27 = smov 58   ;;  %vm1338_vm8 = vcmask 236544  }
  0x1d   :  { %3152 = vmatpush3.msra.mxu0 %v82_v8  ;;  %224 = vperm.xlu1 %3300, %v3693_v28   ;;  %v3714_v34 = vld [vmem:[%s5436_s26] sm:$0xff]  ;;  %s3485_s26 = smov 125   ;;  %s5415_s3 = smov 124   ;;  %vm1464_vm9 = vcmask 474112   ;;  %vm1770_vm10 = vcmask 179200   ;;  %vm1939_vm11 = vcmask 1043456  }
  0x1e   :  { %3153 = vmatprep.subr.mxu0 %v3466_v1  ;;  %v99_v24 = vrot.slane %v92_v20, %v98_v21  ;;  %s5425_s28 = smov 121   ;;  %s3491_s30 = smov 59   ;;  %vm1926_vm12 = vcmask 359424   ;;  %vm2062_vm13 = vcmask 1042432   ;;  %vm2069_vm14 = vcmask 1045504  }
  0x1f   :  { %3154 = vmatpush3.msra.mxu0 %v81_v12  ;;  %vm2073_vm15 = vcmask 1046528  }
  0x20   :  { %3155 = vmatprep.subr.mxu0 %v3466_v1  ;;  %v106_v27 = vrot.slane %v99_v24, %v98_v21 }
  0x21   :  { %3156 = vmatpush3.msra.mxu0 %v80_v13  ;;  %219 = vperm.xlu1 %3300, %v3700_v31  }
  0x22   :  { %3157 = vmatprep.subr.mxu0 %v3466_v1 }
  0x23   :  { %3158 = vmatpush3.msra.mxu0 %v79_v18 }
  0x24   :  { %3159 = vmatprep.subr.mxu0 %v3466_v1 }
  0x25   :  { %3160 = vmatpush3.msra.mxu0 %v78_v19  ;;  %3302 = vset.pattern.permute.xlu1 %v3471_v32 }
  0x26   :  { %3161 = vmatprep.subr.mxu0 %v3466_v1  ;;  %291 = vperm.xlu1 %3302, %v3693_v28  }
  0x27   :  { %3162 = vmatpush3.msra.mxu0 %v77_v22 }
  0x28   :  { %3163 = vmatprep.subr.mxu0 %v3466_v1 }
  0x29   :  { %3164 = vmatpush3.msra.mxu0 %v76_v23 }
  0x2a   :  { %3165 = vmatprep.subr.mxu0 %v3466_v1  ;;  %3304 = vset.pattern.permute.xlu1 %v3470_v30 }
  0x2b   :  { %3166 = vmatpush3.msra.mxu0 %v75_v25  ;;  %248 = vperm.xlu1 %3304, %v3707_v33  }
  0x2c   :  { %3167 = vmatprep.subr.mxu0 %v3466_v1 }
  0x2d   :  { %3168 = vmatpush3.msra.mxu0 %v74_v26 }
  0x2e   :  { %3170 = vmatmul.mubr.f32.vlgmr.msra.gmra.mxu0 %v106_v27  ;;  %v3812_v27 = vsub.s32 0, %v3656_v15 }
  0x2f   :  { %3305 = vset.pattern.permute.xlu1 %v3471_v32 }
  0x30   :  { %287 = vperm.xlu1 %3305, %v3700_v31  }
  0x34   :  { %3306 = vset.pattern.permute.xlu1 %v3469_v29 }
  0x35   :  { %209 = vperm.xlu1 %3306, %v3714_v34  }
  0x39   :  { %3307 = vset.pattern.permute.xlu1 %v3470_v30 }
  0x3a   :  { %244 = vperm.xlu1 %3307, %v3714_v34  }
  0x3e   :  { %3310 = vset.pattern.permute.xlu1 %v3472_v35 }
  0x3f   :  { %361 = vperm.xlu1 %3310, %v3693_v28  }
  0x43   :  { %3311 = vset.pattern.permute.xlu1 %v3471_v32 }
  0x44   :  { %279 = vperm.xlu1 %3311, %v3714_v34  }
  0x48   :  { %3312 = vset.pattern.permute.xlu1 %v3472_v35 }
  0x98   :  { %v3750_v45 = vpop.permute.xlu1 %224 }
  0x9c   :  { %v3752_v46 = vpop.permute.xlu1 %219 }
  0xa1   :  { %v3754_v47 = vpop.permute.xlu1 %291 }
  0xa6   :  { %v3756_v48 = vpop.permute.xlu1 %248 }
  0xab   :  { %v3758_v49 = vpop.permute.xlu1 %287 }
  0xb0   :  { %v3760_v50 = vpop.permute.xlu1 %209 }
  0xb5   :  { %v3762_v51 = vpop.permute.xlu1 %244 }
  0xba   :  { %v3766_v53 = vpop.permute.xlu1 %361 }
  0xbf   :  { %v3770_v55 = vpop.permute.xlu1 %279 }
  0xee   :  { %v174_v36 = vpop.f32.mrf.mxu0 }
  0xef   :  { %v179_v37 = vrot.slane %v174_v36, 1 }
  0xf0   :  { %v3171_v38 = vpop.f32.mrf.mxu0 }
  0xf1   :  { %180 = vrot.lane.b32.xlu0 %v179_v37, %s5411_s4 }
  0xf5   :  { %256 = vperm.xlu0 %3301, %v3693_v28  }
  0xf9   :  { %252 = vperm.xlu0 %3301, %v3700_v31  }
  0xfd   :  { %3303 = vset.pattern.permute.xlu0 %v3469_v29 }
  0xfe   :  { %214 = vperm.xlu0 %3303, %v3707_v33  }
 0x102   :  { %3308 = vset.pattern.permute.xlu0 %v3471_v32 }
 0x163   :  { %v181_v39 = vpop.permute.xlu0 %180 }
 0x164   :  { %v3727_v40 = vsel %vm183_vm1, %v174_v36, %v181_v39 }
 0x165   :  { %197 = vrot.lane.b32.xlu1 %v3727_v40, %s3474_s0  ;;  %190 = vrot.lane.b32.xlu0 %v3727_v40, %s5413_s23  ;;  %s5423_s0 = smov 122   ;;  %s5446_s23 = smov 127  }
 0x169   :  { %357 = vperm.xlu1 %3312, %v3700_v31   ;;  %283 = vperm.xlu0 %3308, %v3707_v33  }
 0x16d   :  { %3314 = vset.pattern.permute.xlu1 %v3476_v41  ;;  %3309 = vset.pattern.permute.xlu0 %v3476_v41 }
 0x16e   :  { %314 = vperm.xlu1 %3314, %v3714_v34   ;;  %326 = vperm.xlu0 %3309, %v3693_v28  }
 0x170   :  { %v3764_v52 = vpop.permute.xlu0 %256 }
 0x172   :  { %3315 = vset.pattern.permute.xlu1 %v3472_v35  ;;  %322 = vperm.xlu0 %3309, %v3700_v31  }
 0x173   :  { %353 = vperm.xlu1 %3315, %v3707_v33  }
 0x174   :  { %v3768_v54 = vpop.permute.xlu0 %252 }
 0x176   :  { %318 = vperm.xlu0 %3309, %v3707_v33  }
 0x177   :  { %3316 = vset.pattern.permute.xlu1 %v3477_v42 }
 0x178   :  { %431 = vperm.xlu1 %3316, %v3693_v28  }
 0x179   :  { %v3772_v56 = vpop.permute.xlu0 %214 }
 0x17a   :  { %3313 = vset.pattern.permute.xlu0 %v3478_v43 }
 0x17b   :  { %396 = vperm.xlu0 %3313, %v3693_v28  }
 0x17c   :  { %3318 = vset.pattern.permute.xlu1 %v3478_v43 }
 0x17d   :  { %388 = vperm.xlu1 %3318, %v3707_v33  }
 0x17f   :  { %392 = vperm.xlu0 %3313, %v3700_v31  }
 0x181   :  { %3319 = vset.pattern.permute.xlu1 %v3477_v42 }
 0x182   :  { %427 = vperm.xlu1 %3319, %v3700_v31  }
 0x183   :  { %3317 = vset.pattern.permute.xlu0 %v3472_v35 }
 0x184   :  { %349 = vperm.xlu0 %3317, %v3714_v34  }
 0x186   :  { %3321 = vset.pattern.permute.xlu1 %v3478_v43 }
 0x187   :  { %384 = vperm.xlu1 %3321, %v3714_v34  }
 0x188   :  { %3320 = vset.pattern.permute.xlu0 %v3479_v44 }
 0x189   :  { %466 = vperm.xlu0 %3320, %v3693_v28  }
 0x18b   :  { %3322 = vset.pattern.permute.xlu1 %v3477_v42 }
 0x18c   :  { %423 = vperm.xlu1 %3322, %v3707_v33  }
 0x18d   :  { %462 = vperm.xlu0 %3320, %v3700_v31  }
 0x190   :  { %419 = vperm.xlu1 %3322, %v3714_v34  }
 0x194   :  { %3323 = vset.pattern.permute.xlu1 %v3479_v44 }
 0x1d7   :  { %v198_v57 = vpop.permute.xlu1 %197  ;;  %v191_v58 = vpop.permute.xlu0 %190 }
 0x1d8   :  { %v200_v59 = vsel %vm193_vm2, 0.0, %v198_v57  ;;  %v194_v60 = vsel %vm193_vm2, 0.0, %v191_v58 }
 0x1d9   :  { %v201_v61 = vsel %vm195_vm3, %v200_v59, 0.0  ;;  %v196_v62 = vsel %vm195_vm3, %v194_v60, 0.0  ;;  %vm2128_vm3 = vcmask 1040384  }
 0x1da   :  { %203 = vrot.lane.b32.xlu1 %v201_v61, %s5411_s4  ;;  %236 = vrot.lane.b32.xlu0 %v196_v62, %s5417_s1  ;;  %s5445_s4 = smov 123  }
 0x1de   :  { %239 = vrot.lane.b32.xlu1 %v201_v61, %s3481_s5  ;;  %274 = vrot.lane.b32.xlu0 %v201_v61, %s3482_s24  ;;  %s3493_s5 = smov 57  }
 0x1e2   :  { %271 = vrot.lane.b32.xlu1 %v196_v62, %s5421_s6  ;;  %344 = vrot.lane.b32.xlu0 %v201_v61, %s3484_s25 }
 0x1e4   :  { %v358_v63 = vpop.permute.xlu1 %357  ;;  %v284_v0 = vpop.permute.xlu0 %283 }
 0x1e6   :  { %306 = vrot.lane.b32.xlu1 %v196_v62, %s3485_s26  ;;  %376 = vrot.lane.b32.xlu0 %v196_v62, %s5419_s2 }
 0x1e9   :  { %v3788_v2 = vpop.permute.xlu1 %314  ;;  %v327_v3 = vpop.permute.xlu0 %326 }
 0x1ea   :  { %309 = vrot.lane.b32.xlu1 %v201_v61, %s3487_s29  ;;  %414 = vrot.lane.b32.xlu0 %v201_v61, %s3488_s27  ;;  %s5437_s29 = sld [smem:[#allocation8_spill]]  ;;  %s5444_s27 = smov 126  }
 0x1ed   :  { %v323_v5 = vpop.permute.xlu0 %322 }
 0x1ee   :  { %341 = vrot.lane.b32.xlu1 %v196_v62, %s5415_s3  ;;  %446 = vrot.lane.b32.xlu0 %v196_v62, %s5425_s28  ;;  %v3790_v4 = vpop.permute.xlu1 %353  ;;  %s5439_s3 = smov 124  }
 0x1f1   :  { %v319_v7 = vpop.permute.xlu0 %318 }
 0x1f2   :  { %379 = vrot.lane.b32.xlu1 %v201_v61, %s3491_s30  ;;  %458 = vperm.xlu0 %3320, %v3707_v33   ;;  %s5438_s30 = sld [smem:[#allocation9_spill]] }
 0x1f3   :  { %v3792_v6 = vpop.permute.xlu1 %431 }
 0x1f6   :  { %411 = vrot.lane.b32.xlu1 %v196_v62, %s5423_s0  ;;  %3325 = vset.pattern.permute.xlu0 %v3469_v29  ;;  %v397_v9 = vpop.permute.xlu0 %396 }
 0x1f8   :  { %v3794_v8 = vpop.permute.xlu1 %388 }
 0x1fa   :  { %449 = vrot.lane.b32.xlu1 %v201_v61, %s3493_s5  ;;  %v393_v11 = vpop.permute.xlu0 %392  ;;  %s3495_s5 = smov 29  }
 0x1fd   :  { %v3796_v10 = vpop.permute.xlu1 %427 }
 0x1fe   :  { %454 = vperm.xlu1 %3323, %v3714_v34  }
 0x1ff   :  { %v3800_v13 = vpop.permute.xlu0 %349 }
 0x202   :  { %3324 = vset.pattern.permute.xlu1 %v3469_v29  ;;  %v3798_v12 = vpop.permute.xlu1 %384 }
 0x204   :  { %v3804_v16 = vpop.permute.xlu0 %466 }
 0x207   :  { %v3802_v14 = vpop.permute.xlu1 %423 }
 0x208   :  { %v3808_v18 = vpop.permute.xlu0 %462 }
 0x20b   :  { %v3806_v17 = vpop.permute.xlu1 %419 }
 0x24c   :  { %v204_v19 = vpop.permute.xlu1 %203  ;;  %v237_v20 = vpop.permute.xlu0 %236 }
 0x24d   :  { %v206_v28 = vsel %vm183_vm1, %v196_v62, %v204_v19 }
 0x24e   :  { %v230_v33 = vrot.slane %v206_v28, %v3812_v27 }
 0x250   :  { %v240_v21 = vpop.permute.xlu1 %239  ;;  %v275_v22 = vpop.permute.xlu0 %274  ;;  %v234_v41 = vmul.f32 %v230_v33, %v3750_v45  ;;  %v233_v43 = vmul.f32 %v230_v33, %v3752_v46 }
 0x251   :  { %v242_v25 = vsel %vm183_vm1, %v237_v20, %v240_v21 }
 0x252   :  { %v262_v31 = vrot.slane %v242_v25, %v3812_v27 }
 0x254   :  { %v272_v23 = vpop.permute.xlu1 %271  ;;  %v345_v26 = vpop.permute.xlu0 %344  ;;  %v266_v37 = vmul.f32 %v262_v31, %v3764_v52  ;;  %v265_v39 = vmul.f32 %v262_v31, %v3768_v54  ;;  %v264_v59 = vmul.f32 %v262_v31, %v3756_v48 }
 0x255   :  { %v277_v29 = vsel %vm183_vm1, %v272_v23, %v275_v22 }
 0x256   :  { %v297_v34 = vrot.slane %v277_v29, %v3812_v27  ;;  %v270_v52 = vadd.f32 %v266_v37, %v234_v41  ;;  %v269_v62 = vadd.f32 %v265_v39, %v233_v43 }
 0x258   :  { %v307_v24 = vpop.permute.xlu1 %306  ;;  %v377_v35 = vpop.permute.xlu0 %376  ;;  %v301_v42 = vmul.f32 %v297_v34, %v3754_v47  ;;  %v300_v44 = vmul.f32 %v297_v34, %v3758_v49  ;;  %v232_v47 = vmul.f32 %v230_v33, %v3772_v56  ;;  %v299_v20 = vmul.f32 %v297_v34, %v284_v0 }
 0x25a   :  { %v305_v46 = vadd.f32 %v301_v42, %v270_v52  ;;  %v304_v21 = vadd.f32 %v300_v44, %v269_v62  ;;  %v298_v42 = vmul.f32 %v297_v34, %v3770_v55 }
 0x25c   :  { %v310_v30 = vpop.permute.xlu1 %309  ;;  %v415_v54 = vpop.permute.xlu0 %414 }
 0x25d   :  { %v312_v32 = vsel %vm183_vm1, %v307_v24, %v310_v30  ;;  %v268_v24 = vadd.f32 %v264_v59, %v232_v47 }
 0x25e   :  { %v332_v15 = vrot.slane %v312_v32, %v3812_v27 }
 0x25f   :  { %v303_v30 = vadd.f32 %v299_v20, %v268_v24 }
 0x260   :  { %v342_v36 = vpop.permute.xlu1 %341  ;;  %v336_v60 = vmul.f32 %v332_v15, %v327_v3  ;;  %v335_v19 = vmul.f32 %v332_v15, %v323_v5  ;;  %v334_v48 = vmul.f32 %v332_v15, %v319_v7  ;;  %v447_v0 = vpop.permute.xlu0 %446  ;;  %v263_v7 = vmul.f32 %v262_v31, %v3762_v51 }
 0x261   :  { %v347_v38 = vsel %vm183_vm1, %v342_v36, %v345_v26  ;;  %v333_v59 = vmul.f32 %v332_v15, %v3788_v2 }
 0x262   :  { %v367_v57 = vrot.slane %v347_v38, %v3812_v27  ;;  %v340_v25 = vadd.f32 %v336_v60, %v305_v46  ;;  %v339_v28 = vadd.f32 %v335_v19, %v304_v21  ;;  %v338_v38 = vadd.f32 %v334_v48, %v303_v30 }
 0x264   :  { %v380_v58 = vpop.permute.xlu1 %379  ;;  %v370_v49 = vmul.f32 %v367_v57, %v358_v63  ;;  %v371_v22 = vmul.f32 %v367_v57, %v3766_v53  ;;  %v369_v56 = vmul.f32 %v367_v57, %v3790_v4  ;;  %v231_v4 = vmul.f32 %v230_v33, %v3760_v50 }
 0x265   :  { %v382_v61 = vsel %vm183_vm1, %v377_v35, %v380_v58  ;;  %v368_v33 = vmul.f32 %v367_v57, %v3800_v13 }
 0x266   :  { %v402_v45 = vrot.slane %v382_v61, %v3812_v27  ;;  %v375_v35 = vadd.f32 %v371_v22, %v340_v25  ;;  %v374_v53 = vadd.f32 %v370_v49, %v339_v28  ;;  %v373_v43 = vadd.f32 %v369_v56, %v338_v38 }
 0x267   :  { %v267_v58 = vadd.f32 %v263_v7, %v231_v4 }
 0x268   :  { %v412_v23 = vpop.permute.xlu1 %411  ;;  %v406_v5 = vmul.f32 %v402_v45, %v397_v9  ;;  %v405_v29 = vmul.f32 %v402_v45, %v393_v11  ;;  %v404_v11 = vmul.f32 %v402_v45, %v3794_v8  ;;  %v403_v34 = vmul.f32 %v402_v45, %v3798_v12 }
 0x269   :  { %v417_v3 = vsel %vm183_vm1, %v412_v23, %v415_v54  ;;  %v302_v55 = vadd.f32 %v298_v42, %v267_v58 }
 0x26a   :  { %v437_v26 = vrot.slane %v417_v3, %v3812_v27  ;;  %v410_v39 = vadd.f32 %v406_v5, %v375_v35  ;;  %v409_v41 = vadd.f32 %v405_v29, %v374_v53  ;;  %v408_v8 = vadd.f32 %v404_v11, %v373_v43 }
 0x26c   :  { %v450_v32 = vpop.permute.xlu1 %449  ;;  %v441_v63 = vmul.f32 %v437_v26, %v3792_v6  ;;  %v440_v36 = vmul.f32 %v437_v26, %v3796_v10  ;;  %v439_v6 = vmul.f32 %v437_v26, %v3802_v14  ;;  %v438_v62 = vmul.f32 %v437_v26, %v3806_v17 }
 0x26d   :  { %v452_v37 = vsel %vm183_vm1, %v447_v0, %v450_v32  ;;  %v459_v52 = vpop.permute.xlu0 %458 }
 0x26e   :  { %v472_v9 = vrot.slane %v452_v37, %v3812_v27  ;;  %v445_v44 = vadd.f32 %v441_v63, %v410_v39  ;;  %v444_v51 = vadd.f32 %v440_v36, %v409_v41  ;;  %v443_v14 = vadd.f32 %v439_v6, %v408_v8  ;;  %v524_v6 = vld [vmem:[%s5437_s29 + $0x10] sm:$0xff] }
 0x270   :  { %v476_v10 = vmul.f32 %v472_v9, %v3804_v16  ;;  %v475_v31 = vmul.f32 %v472_v9, %v3808_v18  ;;  %v474_v60 = vmul.f32 %v472_v9, %v459_v52  ;;  %v337_v18 = vadd.f32 %v333_v59, %v302_v55  ;;  %v523_v52 = vld [vmem:[%s5437_s29 + $0x8] sm:$0xff] }
 0x272   :  { %v3849_v61 = vadd.f32 %v476_v10, %v445_v44  ;;  %v3851_v50 = vadd.f32 %v475_v31, %v444_v51  ;;  %v3856_v16 = vadd.f32 %v474_v60, %v443_v14  ;;  %v372_v15 = vadd.f32 %v368_v33, %v337_v18  ;;  %v525_v51 = vld [vmem:[%s5437_s29 + $0x18] sm:$0xff]  ;;  %v522_v60 = vld [vmem:[%s5437_s29] sm:$0xff]  ;;  %s5441_s29 = sld [smem:[#allocation11_spill]] }
 0x274   :  { %487 = vadd.xlane.f32.xlu0 %v3849_v61  ;;  %485 = vadd.xlane.f32.xlu1 %v3851_v50  ;;  %v491_v2 = vmul.f32 %v3851_v50, %v3851_v50  ;;  %v407_v57 = vadd.f32 %v403_v34, %v372_v15  ;;  %v492_v54 = vmul.f32 %v3849_v61, %v3849_v61  ;;  %v540_v15 = vld [vmem:[%s5438_s30 + $0x10] sm:$0xff] }
 0x275   :  { %v490_v47 = vmul.f32 %v3856_v16, %v3856_v16 }
 0x276   :  { %v442_v20 = vadd.f32 %v438_v62, %v407_v57  ;;  %v539_v57 = vld [vmem:[%s5438_s30 + $0x8] sm:$0xff] }
 0x278   :  { %497 = vadd.xlane.f32.xlu1 %v491_v2  ;;  %483 = vadd.xlane.f32.xlu0 %v3856_v16  ;;  %v541_v2 = vld [vmem:[%s5438_s30 + $0x18] sm:$0xff] }
 0x279   :  { %v455_v13 = vpop.permute.xlu1 %454 }
 0x27a   :  { %v473_v19 = vmul.f32 %v472_v9, %v455_v13 }
 0x27c   :  { %499 = vadd.xlane.f32.xlu0 %v492_v54  ;;  %495 = vadd.xlane.f32.xlu1 %v490_v47  ;;  %v3867_v46 = vadd.f32 %v473_v19, %v442_v20  ;;  %v538_v47 = vld [vmem:[%s5438_s30] sm:$0xff]  ;;  %s5440_s30 = sld [smem:[#allocation10_spill]] }
 0x27e   :  { %v489_v12 = vmul.f32 %v3867_v46, %v3867_v46 }
 0x280   :  { %481 = vadd.xlane.f32.xlu0 %v3867_v46 }
 0x284   :  { %493 = vadd.xlane.f32.xlu0 %v489_v12 }
 0x2fd   :  { %v486_v17 = vpop.xlane.xlu1 %485  ;;  %v488_v45 = vpop.xlane.xlu0 %487 }
 0x2fe   :  { %v504_v21 = vmul.f32 0.0078125, %v486_v17  ;;  %v505_v49 = vmul.f32 0.0078125, %v488_v45 }
 0x300   :  { %v512_v24 = vmul.f32 %v504_v21, %v504_v21  ;;  %v513_v26 = vmul.f32 %v505_v49, %v505_v49 }
 0x301   :  { %v498_v22 = vpop.xlane.xlu1 %497  ;;  %v484_v23 = vpop.xlane.xlu0 %483 }
 0x302   :  { %v508_v48 = vmul.f32 0.0078125, %v498_v22  ;;  %v503_v3 = vmul.f32 0.0078125, %v484_v23 }
 0x304   :  { %v516_v25 = vsub.f32 %v508_v48, %v512_v24  ;;  %v511_v30 = vmul.f32 %v503_v3, %v503_v3  ;;  %v605_v24 = vrot.slane %v3727_v40, %v3812_v27 }
 0x305   :  { %v496_v5 = vpop.xlane.xlu1 %495  ;;  %v500_v28 = vpop.xlane.xlu0 %499 }
 0x306   :  { %v520_v29 = vmax.f32 %v516_v25, 0.0  ;;  %v507_v56 = vmul.f32 0.0078125, %v496_v5  ;;  %v509_v0 = vmul.f32 0.0078125, %v500_v28 }
 0x308   :  { %v528_v32 = vadd.f32 1e-05, %v520_v29  ;;  %v515_v35 = vsub.f32 %v507_v56, %v511_v30  ;;  %v517_v63 = vsub.f32 %v509_v0, %v513_v26 }
 0x309   :  { %v482_v53 = vpop.xlane.xlu0 %481 }
 0x30a   :  { %3426 = vrsqrt.f32 %v528_v32  ;;  %v519_v36 = vmax.f32 %v515_v35, 0.0  ;;  %v521_v7 = vmax.f32 %v517_v63, 0.0  ;;  %v502_v37 = vmul.f32 0.0078125, %v482_v53 }
 0x30c   :  { %v529_v38 = vadd.f32 1e-05, %v521_v7  ;;  %v527_v9 = vadd.f32 1e-05, %v519_v36  ;;  %v510_v39 = vmul.f32 %v502_v37, %v502_v37 }
 0x30d   :  { %v494_v11 = vpop.xlane.xlu0 %493 }
 0x30e   :  { %v506_v41 = vmul.f32 0.0078125, %v494_v11  ;;  %3428 = vrsqrt.f32 %v529_v38 }
 0x30f   :  { %3430 = vrsqrt.f32 %v527_v9 }
 0x310   :  { %v514_v4 = vsub.f32 %v506_v41, %v510_v39 }
 0x312   :  { %v518_v42 = vmax.f32 %v514_v4, 0.0 }
 0x314   :  { %v526_v43 = vadd.f32 1e-05, %v518_v42 }
 0x316   :  { %3432 = vrsqrt.f32 %v526_v43 }
 0x317   :  { %v3427_v44 = vpop.eup %3426 }
 0x318   :  { %v536_v10 = vmul.f32 %v3427_v44, %v524_v6 }
 0x31a   :  { %562 = vperm.xlu0 %3325, %v536_v10   ;;  %v544_v34 = vmul.f32 %v536_v10, %v504_v21 }
 0x31b   :  { %v3429_v31 = vpop.eup %3428 }
 0x31c   :  { %v537_v58 = vmul.f32 %v3429_v31, %v525_v51  ;;  %v3431_v59 = vpop.eup %3430  ;;  %v548_v62 = vsub.f32 %v540_v15, %v544_v34  ;;  %v926_v34 = vld [vmem:[%s5441_s29 + $0x18] sm:$0xff] }
 0x31d   :  { %v535_v8 = vmul.f32 %v3431_v59, %v523_v52 }
 0x31e   :  { %567 = vperm.xlu1 %3324, %v537_v58   ;;  %v545_v14 = vmul.f32 %v537_v58, %v505_v49 }
 0x31f   :  { %v543_v13 = vmul.f32 %v535_v8, %v503_v3 }
 0x320   :  { %v549_v18 = vsub.f32 %v541_v2, %v545_v14 }
 0x321   :  { %v547_v19 = vsub.f32 %v539_v57, %v543_v13  ;;  %v924_v13 = vld [vmem:[%s5441_s29 + $0x8] sm:$0xff]  ;;  %v922_v57 = vld [vmem:[%s5388_s7 + $0x70] sm:$0x3] }
 0x322   :  { %557 = vperm.xlu1 %3324, %v535_v8   ;;  %3172 = vmatprep.subr.msk.mxu0 %vm960_vm4, %v922_v57 }
 0x323   :  { %v3433_v55 = vpop.eup %3432  ;;  %3173 = vmatpush3.msk.msra.mxu0 %vm960_vm4, %v922_v57 }
 0x324   :  { %v534_v33 = vmul.f32 %v3433_v55, %v522_v60  ;;  %v816_v55 = vld [vmem:[%s5440_s30 + $0x8] sm:$0xff] }
 0x325   :  { %887 = vmatprep.mubr.f32.mxu1 %v816_v55 }
 0x326   :  { %552 = vperm.xlu1 %3324, %v534_v33   ;;  %v542_v54 = vmul.f32 %v534_v33, %v502_v37 }
 0x328   :  { %v546_v20 = vsub.f32 %v538_v47, %v542_v54  ;;  %v923_v54 = vld [vmem:[%s5441_s29] sm:$0xff] }
 0x329   :  { %v920_v47 = vld [vmem:[%s5388_s7 + $0x60] sm:$0xff] }
 0x32a   :  { %591 = vperm.xlu1 %3324, %v549_v18  }
 0x32e   :  { %586 = vperm.xlu1 %3324, %v548_v62   ;;  %v925_v62 = vld [vmem:[%s5441_s29 + $0x10] sm:$0xff]  ;;  %s5443_s29 = smov 122  }
 0x332   :  { %581 = vperm.xlu1 %3324, %v547_v19   ;;  %v921_v19 = vld [vmem:[%s5388_s7 + $0x68] sm:$0xff] }
 0x333   :  { %3174 = vmatprep.subr.mxu0 %v921_v19 }
 0x334   :  { %3175 = vmatpush3.msra.mxu0 %v921_v19 }
 0x335   :  { %3176 = vmatprep.subr.mxu0 %v920_v47 }
 0x336   :  { %576 = vperm.xlu1 %3324, %v546_v20   ;;  %v919_v20 = vld [vmem:[%s5388_s7 + $0x58] sm:$0xff]  ;;  %3177 = vmatpush3.msra.mxu0 %v920_v47 }
 0x337   :  { %3178 = vmatprep.subr.mxu0 %v919_v20 }
 0x338   :  { %3179 = vmatpush3.msra.mxu0 %v919_v20 }
 0x395   :  { %v563_v49 = vpop.permute.xlu0 %562 }
 0x396   :  { %v572_v48 = vmul.f32 %v563_v49, %v3851_v50  ;;  %v914_v49 = vld [vmem:[%s5388_s7 + $0x30] sm:$0xff] }
 0x399   :  { %v568_v12 = vpop.permute.xlu1 %567 }
 0x39a   :  { %v573_v21 = vmul.f32 %v568_v12, %v3849_v61  ;;  %v918_v12 = vld [vmem:[%s5388_s7 + $0x50] sm:$0xff] }
 0x39b   :  { %3180 = vmatprep.subr.mxu0 %v918_v12 }
 0x39c   :  { %3181 = vmatpush3.msra.mxu0 %v918_v12 }
 0x39d   :  { %v558_v17 = vpop.permute.xlu1 %557 }
 0x39e   :  { %v571_v28 = vmul.f32 %v558_v17, %v3856_v16  ;;  %v917_v17 = vld [vmem:[%s5388_s7 + $0x48] sm:$0xff] }
 0x39f   :  { %3182 = vmatprep.subr.mxu0 %v917_v17 }
 0x3a0   :  { %3183 = vmatpush3.msra.mxu0 %v917_v17 }
 0x3a1   :  { %v553_v45 = vpop.permute.xlu1 %552 }
 0x3a2   :  { %v570_v0 = vmul.f32 %v553_v45, %v3867_v46  ;;  %v916_v45 = vld [vmem:[%s5388_s7 + $0x40] sm:$0xff] }
 0x3a3   :  { %3184 = vmatprep.subr.mxu0 %v916_v45 }
 0x3a4   :  { %3185 = vmatpush3.msra.mxu0 %v916_v45 }
 0x3a5   :  { %v592_v22 = vpop.permute.xlu1 %591 }
 0x3a6   :  { %v597_v23 = vadd.f32 %v592_v22, %v573_v21  ;;  %v915_v21 = vld [vmem:[%s5388_s7 + $0x38] sm:$0xff]  ;;  %v913_v22 = vld [vmem:[%s5388_s7 + $0x28] sm:$0xff] }
 0x3a7   :  { %3186 = vmatprep.subr.mxu0 %v915_v21 }
 0x3a8   :  { %v601_v3 = vmax.f32 %v597_v23, 0.0  ;;  %3187 = vmatpush3.msra.mxu0 %v915_v21  ;;  %v912_v23 = vld [vmem:[%s5388_s7 + $0x20] sm:$0xff] }
 0x3a9   :  { %v587_v25 = vpop.permute.xlu1 %586  ;;  %3188 = vmatprep.subr.mxu0 %v914_v49 }
 0x3aa   :  { %v3900_v26 = vadd.f32 %v605_v24, %v601_v3  ;;  %v596_v5 = vadd.f32 %v587_v25, %v572_v48  ;;  %3189 = vmatpush3.msra.mxu0 %v914_v49 }
 0x3ab   :  { %3190 = vmatprep.subr.mxu0 %v913_v22 }
 0x3ac   :  { %v600_v29 = vmax.f32 %v596_v5, 0.0  ;;  %692 = vrot.lane.b32.xlu1 %v3900_v26, %s5425_s28  ;;  %3191 = vmatpush3.msra.mxu0 %v913_v22 }
 0x3ad   :  { %v582_v61 = vpop.permute.xlu1 %581  ;;  %3192 = vmatprep.subr.mxu0 %v912_v23 }
 0x3ae   :  { %v3905_v30 = vadd.f32 %v605_v24, %v600_v29  ;;  %v595_v56 = vadd.f32 %v582_v61, %v571_v28  ;;  %3193 = vmatpush3.msra.mxu0 %v912_v23 }
 0x3b0   :  { %v599_v40 = vmax.f32 %v595_v56, 0.0  ;;  %644 = vrot.lane.b32.xlu1 %v3900_v26, %s3485_s26  ;;  %690 = vrot.lane.b32.xlu0 %v3905_v30, %s5425_s28 }
 0x3b1   :  { %v577_v50 = vpop.permute.xlu1 %576 }
 0x3b2   :  { %v3912_v32 = vadd.f32 %v605_v24, %v599_v40  ;;  %v594_v16 = vadd.f32 %v577_v50, %v570_v0 }
 0x3b4   :  { %v598_v35 = vmax.f32 %v594_v16, 0.0  ;;  %642 = vrot.lane.b32.xlu1 %v3905_v30, %s3485_s26  ;;  %688 = vrot.lane.b32.xlu0 %v3912_v32, %s5425_s28 }
 0x3b6   :  { %v3918_v63 = vadd.f32 %v605_v24, %v598_v35 }
 0x3b8   :  { %640 = vrot.lane.b32.xlu1 %v3912_v32, %s3485_s26  ;;  %686 = vrot.lane.b32.xlu0 %v3918_v63, %s5425_s28 }
 0x3bc   :  { %638 = vrot.lane.b32.xlu1 %v3918_v63, %s3485_s26  ;;  %680 = vrot.lane.b32.xlu0 %v3900_v26, %s5423_s0 }
 0x3c0   :  { %632 = vrot.lane.b32.xlu1 %v3900_v26, %s5421_s6  ;;  %678 = vrot.lane.b32.xlu0 %v3905_v30, %s5423_s0 }
 0x3c4   :  { %630 = vrot.lane.b32.xlu1 %v3905_v30, %s5421_s6  ;;  %676 = vrot.lane.b32.xlu0 %v3912_v32, %s5423_s0 }
 0x3c8   :  { %628 = vrot.lane.b32.xlu1 %v3912_v32, %s5421_s6  ;;  %674 = vrot.lane.b32.xlu0 %v3918_v63, %s5423_s0  ;;  %s5442_s0 = smov 3  }
 0x3cc   :  { %626 = vrot.lane.b32.xlu1 %v3918_v63, %s5421_s6  ;;  %668 = vrot.lane.b32.xlu0 %v3900_v26, %s5419_s2 }
 0x3d0   :  { %620 = vrot.lane.b32.xlu1 %v3900_v26, %s5417_s1  ;;  %666 = vrot.lane.b32.xlu0 %v3905_v30, %s5419_s2 }
 0x3d4   :  { %618 = vrot.lane.b32.xlu1 %v3905_v30, %s5417_s1  ;;  %664 = vrot.lane.b32.xlu0 %v3912_v32, %s5419_s2 }
 0x3d8   :  { %616 = vrot.lane.b32.xlu1 %v3912_v32, %s5417_s1  ;;  %662 = vrot.lane.b32.xlu0 %v3918_v63, %s5419_s2 }
 0x3dc   :  { %614 = vrot.lane.b32.xlu1 %v3918_v63, %s5417_s1  ;;  %656 = vrot.lane.b32.xlu0 %v3900_v26, %s5439_s3 }
 0x3e0   :  { %654 = vrot.lane.b32.xlu1 %v3905_v30, %s5439_s3  ;;  %652 = vrot.lane.b32.xlu0 %v3912_v32, %s5439_s3 }
 0x3e4   :  { %650 = vrot.lane.b32.xlu1 %v3918_v63, %s5439_s3 }
 0x41e   :  { %v3966_v46 = vpop.permute.xlu1 %692 }
 0x41f   :  { %752 = vrot.lane.b32.xlu0 %v3966_v46, %s5425_s28 }
 0x422   :  { %v3970_v53 = vpop.permute.xlu1 %644  ;;  %v3972_v36 = vpop.permute.xlu0 %690 }
 0x423   :  { %720 = vrot.lane.b32.xlu1 %v3970_v53, %s5425_s28  ;;  %750 = vrot.lane.b32.xlu0 %v3972_v36, %s5425_s28 }
 0x426   :  { %v3978_v7 = vpop.permute.xlu1 %642  ;;  %v3980_v37 = vpop.permute.xlu0 %688 }
 0x427   :  { %718 = vrot.lane.b32.xlu1 %v3978_v7, %s5425_s28  ;;  %748 = vrot.lane.b32.xlu0 %v3980_v37, %s5425_s28 }
 0x42a   :  { %v3986_v38 = vpop.permute.xlu1 %640  ;;  %v3988_v9 = vpop.permute.xlu0 %686 }
 0x42b   :  { %716 = vrot.lane.b32.xlu1 %v3986_v38, %s5425_s28  ;;  %746 = vrot.lane.b32.xlu0 %v3988_v9, %s5425_s28 }
 0x42e   :  { %v3994_v11 = vpop.permute.xlu1 %638  ;;  %v3996_v39 = vpop.permute.xlu0 %680 }
 0x42f   :  { %714 = vrot.lane.b32.xlu1 %v3994_v11, %s5425_s28  ;;  %744 = vrot.lane.b32.xlu0 %v3996_v39, %s5425_s28 }
 0x432   :  { %v4002_v41 = vpop.permute.xlu1 %632  ;;  %v4004_v4 = vpop.permute.xlu0 %678 }
 0x433   :  { %712 = vrot.lane.b32.xlu1 %v4002_v41, %s5425_s28  ;;  %742 = vrot.lane.b32.xlu0 %v4004_v4, %s5425_s28 }
 0x436   :  { %v4010_v42 = vpop.permute.xlu1 %630  ;;  %v4012_v43 = vpop.permute.xlu0 %676 }
 0x437   :  { %710 = vrot.lane.b32.xlu1 %v4010_v42, %s5425_s28  ;;  %740 = vrot.lane.b32.xlu0 %v4012_v43, %s5425_s28 }
 0x43a   :  { %v4018_v6 = vpop.permute.xlu1 %628  ;;  %v4020_v44 = vpop.permute.xlu0 %674 }
 0x43b   :  { %708 = vrot.lane.b32.xlu1 %v4018_v6, %s5425_s28  ;;  %738 = vrot.lane.b32.xlu0 %v4020_v44, %s5425_s28 }
 0x43e   :  { %v4026_v10 = vpop.permute.xlu1 %626  ;;  %v4028_v51 = vpop.permute.xlu0 %668 }
 0x43f   :  { %706 = vrot.lane.b32.xlu1 %v4026_v10, %s5425_s28  ;;  %736 = vrot.lane.b32.xlu0 %v4028_v51, %s5425_s28 }
 0x442   :  { %v4034_v31 = vpop.permute.xlu1 %620  ;;  %v4036_v58 = vpop.permute.xlu0 %666 }
 0x443   :  { %704 = vrot.lane.b32.xlu1 %v4034_v31, %s5425_s28  ;;  %734 = vrot.lane.b32.xlu0 %v4036_v58, %s5425_s28 }
 0x446   :  { %v4042_v59 = vpop.permute.xlu1 %618  ;;  %v4044_v52 = vpop.permute.xlu0 %664 }
 0x447   :  { %702 = vrot.lane.b32.xlu1 %v4042_v59, %s5425_s28  ;;  %732 = vrot.lane.b32.xlu0 %v4044_v52, %s5425_s28 }
 0x44a   :  { %v4050_v8 = vpop.permute.xlu1 %616  ;;  %v4052_v60 = vpop.permute.xlu0 %662 }
 0x44b   :  { %700 = vrot.lane.b32.xlu1 %v4050_v8, %s5425_s28  ;;  %730 = vrot.lane.b32.xlu0 %v4052_v60, %s5425_s28 }
 0x44e   :  { %v4061_v33 = vpop.permute.xlu1 %614  ;;  %v4063_v14 = vpop.permute.xlu0 %656 }
 0x44f   :  { %698 = vrot.lane.b32.xlu1 %v4061_v33, %s5425_s28  ;;  %728 = vrot.lane.b32.xlu0 %v4063_v14, %s5425_s28 }
 0x452   :  { %v4069_v2 = vpop.permute.xlu1 %654  ;;  %v4071_v18 = vpop.permute.xlu0 %652 }
 0x453   :  { %726 = vrot.lane.b32.xlu1 %v4069_v2, %s5425_s28  ;;  %724 = vrot.lane.b32.xlu0 %v4071_v18, %s5425_s28 }
 0x456   :  { %v4080_v15 = vpop.permute.xlu1 %650 }
 0x457   :  { %722 = vrot.lane.b32.xlu1 %v4080_v15, %s5425_s28  ;;  %944 = vperm.xlu0 %3325, %v926_v34  }
 0x45b   :  { %939 = vperm.xlu1 %3324, %v925_v62   ;;  %934 = vperm.xlu0 %3325, %v924_v13  }
 0x45f   :  { %929 = vperm.xlu1 %3324, %v923_v54  }
 0x491   :  { %v753_v24 = vpop.permute.xlu0 %752 }
 0x492   :  { %v814_v48 = vsel %vm782_vm5, %v3966_v46, %v753_v24 }
 0x493   :  { %2881 = vmatprep.subr.mxu1 %v814_v48 }
 0x495   :  { %v721_v3 = vpop.permute.xlu1 %720  ;;  %v751_v25 = vpop.permute.xlu0 %750 }
 0x496   :  { %v798_v5 = vsel %vm782_vm5, %v3970_v53, %v721_v3  ;;  %v813_v28 = vsel %vm782_vm5, %v3972_v36, %v751_v25  ;;  %v786_v25 = vsel %vm782_vm5, %v3900_v26, %v3966_v46  ;;  %v784_v26 = vsel %vm782_vm5, %v3912_v32, %v3980_v37  ;;  %v817_v32 = vld [vmem:[%s5440_s30 + $0x10] sm:$0xff] }
 0x497   :  { %2882 = vmatpush3.msra.mxu1 %v798_v5 }
 0x498   :  { %2883 = vmatprep.subr.mxu1 %v813_v28 }
 0x499   :  { %v719_v29 = vpop.permute.xlu1 %718  ;;  %v749_v61 = vpop.permute.xlu0 %748 }
 0x49a   :  { %v797_v56 = vsel %vm782_vm5, %v3978_v7, %v719_v29  ;;  %v812_v0 = vsel %vm782_vm5, %v3980_v37, %v749_v61  ;;  %v820_v37 = vld [vmem:[%s5440_s30 + $0x28] sm:$0xff]  ;;  %v910_v29 = vld [vmem:[%s5388_s7 + $0x10] sm:$0xff] }
 0x49b   :  { %2884 = vmatpush3.msra.mxu1 %v797_v56  ;;  %v909_v61 = vld [vmem:[%s5388_s7 + $0x8] sm:$0xff]  ;;  %v908_v56 = vld [vmem:[%s5388_s7] sm:$0xff] }
 0x49c   :  { %2885 = vmatprep.subr.mxu1 %v812_v0 }
 0x49d   :  { %v717_v40 = vpop.permute.xlu1 %716  ;;  %v747_v50 = vpop.permute.xlu0 %746 }
 0x49e   :  { %v796_v16 = vsel %vm782_vm5, %v3986_v38, %v717_v40  ;;  %v811_v35 = vsel %vm782_vm5, %v3988_v9, %v747_v50 }
 0x49f   :  { %2886 = vmatpush3.msra.mxu1 %v796_v16 }
 0x4a0   :  { %2887 = vmatprep.subr.mxu1 %v811_v35 }
 0x4a1   :  { %v715_v53 = vpop.permute.xlu1 %714  ;;  %v745_v55 = vpop.permute.xlu0 %744 }
 0x4a2   :  { %v795_v7 = vsel %vm782_vm5, %v3994_v11, %v715_v53  ;;  %v810_v34 = vsel %vm782_vm5, %v3996_v39, %v745_v55 }
 0x4a3   :  { %2888 = vmatpush3.msra.mxu1 %v795_v7 }
 0x4a4   :  { %2889 = vmatprep.subr.mxu1 %v810_v34 }
 0x4a5   :  { %v713_v62 = vpop.permute.xlu1 %712  ;;  %v743_v13 = vpop.permute.xlu0 %742 }
 0x4a6   :  { %v794_v38 = vsel %vm782_vm5, %v4002_v41, %v713_v62  ;;  %v809_v57 = vsel %vm782_vm5, %v4004_v4, %v743_v13 }
 0x4a7   :  { %2890 = vmatpush3.msra.mxu1 %v794_v38 }
 0x4a8   :  { %2891 = vmatprep.subr.mxu1 %v809_v57 }
 0x4a9   :  { %v711_v19 = vpop.permute.xlu1 %710  ;;  %v741_v54 = vpop.permute.xlu0 %740 }
 0x4aa   :  { %v793_v11 = vsel %vm782_vm5, %v4010_v42, %v711_v19  ;;  %v808_v39 = vsel %vm782_vm5, %v4012_v43, %v741_v54 }
 0x4ab   :  { %2892 = vmatpush3.msra.mxu1 %v793_v11 }
 0x4ac   :  { %2893 = vmatprep.subr.mxu1 %v808_v39 }
 0x4ad   :  { %v709_v47 = vpop.permute.xlu1 %708  ;;  %v739_v20 = vpop.permute.xlu0 %738 }
 0x4ae   :  { %v792_v41 = vsel %vm782_vm5, %v4018_v6, %v709_v47  ;;  %v807_v4 = vsel %vm782_vm5, %v4020_v44, %v739_v20 }
 0x4af   :  { %2894 = vmatpush3.msra.mxu1 %v792_v41 }
 0x4b0   :  { %2895 = vmatprep.subr.mxu1 %v807_v4 }
 0x4b1   :  { %v707_v12 = vpop.permute.xlu1 %706  ;;  %v737_v17 = vpop.permute.xlu0 %736 }
 0x4b2   :  { %v791_v42 = vsel %vm782_vm5, %v4026_v10, %v707_v12  ;;  %v806_v43 = vsel %vm782_vm5, %v4028_v51, %v737_v17 }
 0x4b3   :  { %2896 = vmatpush3.msra.mxu1 %v791_v42 }
 0x4b4   :  { %2897 = vmatprep.subr.mxu1 %v806_v43 }
 0x4b5   :  { %v705_v45 = vpop.permute.xlu1 %704  ;;  %v735_v21 = vpop.permute.xlu0 %734 }
 0x4b6   :  { %v790_v6 = vsel %vm782_vm5, %v4034_v31, %v705_v45  ;;  %v805_v44 = vsel %vm782_vm5, %v4036_v58, %v735_v21 }
 0x4b7   :  { %2898 = vmatpush3.msra.mxu1 %v790_v6 }
 0x4b8   :  { %2899 = vmatprep.subr.mxu1 %v805_v44 }
 0x4b9   :  { %v703_v49 = vpop.permute.xlu1 %702  ;;  %v733_v22 = vpop.permute.xlu0 %732 }
 0x4ba   :  { %v789_v10 = vsel %vm782_vm5, %v4042_v59, %v703_v49  ;;  %v804_v51 = vsel %vm782_vm5, %v4044_v52, %v733_v22 }
 0x4bb   :  { %2900 = vmatpush3.msra.mxu1 %v789_v10 }
 0x4bc   :  { %2901 = vmatprep.subr.mxu1 %v804_v51 }
 0x4bd   :  { %v701_v23 = vpop.permute.xlu1 %700  ;;  %v731_v24 = vpop.permute.xlu0 %730 }
 0x4be   :  { %v788_v31 = vsel %vm782_vm5, %v4050_v8, %v701_v23  ;;  %v803_v58 = vsel %vm782_vm5, %v4052_v60, %v731_v24 }
 0x4bf   :  { %2902 = vmatpush3.msra.mxu1 %v788_v31 }
 0x4c0   :  { %2903 = vmatprep.subr.mxu1 %v803_v58 }
 0x4c1   :  { %v699_v48 = vpop.permute.xlu1 %698  ;;  %v729_v3 = vpop.permute.xlu0 %728 }
 0x4c2   :  { %v787_v59 = vsel %vm782_vm5, %v4061_v33, %v699_v48  ;;  %v802_v52 = vsel %vm782_vm5, %v4063_v14, %v729_v3  ;;  %v785_v33 = vsel %vm782_vm5, %v3905_v30, %v3972_v36  ;;  %v783_v30 = vsel %vm782_vm5, %v3918_v63, %v3988_v9  ;;  %v818_v36 = vld [vmem:[%s5440_s30 + $0x18] sm:$0xff]  ;;  %v819_v63 = vld [vmem:[%s5440_s30 + $0x20] sm:$0xff] }
 0x4c3   :  { %2904 = vmatpush3.msra.mxu1 %v787_v59  ;;  %v822_v9 = vld [vmem:[%s5440_s30 + $0x38] sm:$0xff] }
 0x4c4   :  { %2905 = vmatprep.subr.mxu1 %v802_v52 }
 0x4c5   :  { %v727_v8 = vpop.permute.xlu1 %726  ;;  %2906 = vmatpush3.msra.mxu1 %v786_v25  ;;  %v725_v5 = vpop.permute.xlu0 %724 }
 0x4c6   :  { %v801_v60 = vsel %vm782_vm5, %v4069_v2, %v727_v8  ;;  %v800_v14 = vsel %vm782_vm5, %v4071_v18, %v725_v5  ;;  %v815_v2 = vld [vmem:[%s5440_s30] sm:$0xff]  ;;  %v821_v18 = vld [vmem:[%s5440_s30 + $0x30] sm:$0xff] }
 0x4c7   :  { %2907 = vmatprep.subr.mxu1 %v801_v60 }
 0x4c8   :  { %2908 = vmatpush3.msra.mxu1 %v785_v33 }
 0x4c9   :  { %v723_v28 = vpop.permute.xlu1 %722  ;;  %2909 = vmatprep.subr.mxu1 %v800_v14 }
 0x4ca   :  { %2910 = vmatpush3.msra.mxu1 %v784_v26  ;;  %v799_v46 = vsel %vm782_vm5, %v4080_v15, %v723_v28  ;;  %v911_v15 = vld [vmem:[%s5388_s7 + $0x18] sm:$0xff]  ;;  %s3494_s7 = smov 102   ;;  %vm2144_vm5 = vcmask 785408  }
 0x4cb   :  { %2911 = vmatprep.subr.mxu1 %v799_v46  ;;  %3194 = vmatprep.subr.mxu0 %v911_v15 }
 0x4cc   :  { %2912 = vmatpush3.msra.mxu1 %v783_v30  ;;  %3195 = vmatpush3.msra.mxu0 %v911_v15 }
 0x4cd   :  { %888 = vmatmul.mubr.f32.vlgmr.msra.gmra.mxu1 %v815_v2  ;;  %3196 = vmatprep.subr.mxu0 %v910_v29 }
 0x4ce   :  { %892 = vmatprep.mubr.f32.mxu1 %v818_v36  ;;  %3197 = vmatpush3.msra.mxu0 %v910_v29 }
 0x4cf   :  { %3198 = vmatprep.subr.mxu0 %v909_v61 }
 0x4d0   :  { %3199 = vmatpush3.msra.mxu0 %v909_v61 }
 0x4d1   :  { %893 = vmatmul.mubr.f32.gmra.mxu1 %v817_v32  ;;  %3200 = vmatprep.subr.mxu0 %v908_v56 }
 0x4d2   :  { %897 = vmatprep.mubr.f32.mxu1 %v820_v37  ;;  %3201 = vmatpush3.msra.mxu0 %v908_v56  ;;  %v945_v57 = vpop.permute.xlu0 %944 }
 0x4d5   :  { %898 = vmatmul.mubr.f32.gmra.mxu1 %v819_v63 }
 0x4d6   :  { %902 = vmatprep.mubr.f32.mxu1 %v822_v9  ;;  %v940_v19 = vpop.permute.xlu1 %939  ;;  %v935_v54 = vpop.permute.xlu0 %934 }
 0x4d9   :  { %903 = vmatmul.mubr.f32.gmra.mxu1 %v821_v18 }
 0x4da   :  { %v930_v47 = vpop.permute.xlu1 %929 }
 0x58d   :  { %v2913_v0 = vpop.f32.mrf.mxu1 }
 0x58f   :  { %v2914_v40 = vpop.f32.mrf.mxu1 }
 0x590   :  { %v2915_v50 = vadd.f32 %v2914_v40, %v2913_v0 }
 0x591   :  { %v2916_v16 = vpop.f32.mrf.mxu1 }
 0x592   :  { %3202 = vmatprep.mubr.msk.f32.mxu0 %vm947_vm6, %v2915_v50 }
 0x593   :  { %v2917_v35 = vpop.f32.mrf.mxu1 }
 0x594   :  { %v2918_v53 = vadd.f32 %v2917_v35, %v2916_v16 }
 0x595   :  { %v2919_v55 = vpop.f32.mrf.mxu1 }
 0x596   :  { %3203 = vmatmul.mubr.msk.f32.vlgmr.msra.gmra.mxu0 %vm947_vm6, %v2918_v53 }
 0x597   :  { %v2920_v7 = vpop.f32.mrf.mxu1 }
 0x598   :  { %v2921_v34 = vadd.f32 %v2920_v7, %v2919_v55 }
 0x599   :  { %v2922_v62 = vpop.f32.mrf.mxu1 }
 0x59a   :  { %3205 = vmatprep.mubr.msk.f32.mxu0 %vm947_vm6, %v2921_v34 }
 0x59b   :  { %v2923_v13 = vpop.f32.mrf.mxu1 }
 0x59c   :  { %v2924_v38 = vadd.f32 %v2923_v13, %v2922_v62 }
 0x59e   :  { %3206 = vmatmul.mubr.msk.f32.gmra.mxu0 %vm947_vm6, %v2924_v38  ;;  %vm2361_vm6 = vcmask 259072  }
 0x656   :  { %v3204_v11 = vpop.f32.mrf.mxu0 }
 0x657   :  { %v4229_v39 = vadd.f32 %v3204_v11, %v935_v54 }
 0x658   :  { %v1030_v20 = vpop.f32.mrf.mxu0 }
 0x659   :  { %v4231_v41 = vadd.f32 %v1030_v20, %v930_v47  ;;  %1164 = vrot.lane.b32.xlu0 %v4229_v39, %s3494_s7 }
 0x65b   :  { %1162 = vrot.lane.b32.xlu1 %v4231_v41, %s3494_s7 }
 0x65d   :  { %1055 = vrot.lane.b32.xlu0 %v4229_v39, %s5442_s0 }
 0x65e   :  { %v3207_v4 = vpop.f32.mrf.mxu0 }
 0x65f   :  { %v4237_v12 = vadd.f32 %v3207_v4, %v945_v57  ;;  %1053 = vrot.lane.b32.xlu1 %v4231_v41, %s5442_s0 }
 0x660   :  { %v1040_v17 = vpop.f32.mrf.mxu0 }
 0x661   :  { %v4241_v42 = vadd.f32 %v1040_v17, %v940_v19  ;;  %1168 = vrot.lane.b32.xlu0 %v4237_v12, %s3494_s7 }
 0x663   :  { %1166 = vrot.lane.b32.xlu1 %v4241_v42, %s3494_s7 }
 0x665   :  { %1059 = vrot.lane.b32.xlu0 %v4237_v12, %s5442_s0 }
 0x667   :  { %1057 = vrot.lane.b32.xlu1 %v4241_v42, %s5442_s0 }
 0x6cb   :  { %v1165_v43 = vpop.permute.xlu0 %1164 }
 0x6cc   :  { %v1175_v45 = vsel %vm193_vm2, 0.0, %v1165_v43 }
 0x6cd   :  { %v4251_v21 = vsel %vm1069_vm7, %v1175_v45, 0.0  ;;  %v1163_v6 = vpop.permute.xlu1 %1162 }
 0x6ce   :  { %1236 = vrot.lane.b32.xlu0 %v4251_v21, %s5425_s28  ;;  %1204 = vrot.lane.b32.xlu1 %v4251_v21, %s3485_s26  ;;  %v1174_v44 = vsel %vm193_vm2, 0.0, %v1163_v6 }
 0x6cf   :  { %v1056_v49 = vpop.permute.xlu0 %1055  ;;  %v4267_v22 = vsel %vm1069_vm7, %v1174_v44, 0.0 }
 0x6d0   :  { %v1066_v10 = vsel %vm193_vm2, 0.0, %v1056_v49 }
 0x6d1   :  { %v4275_v51 = vsel %vm1069_vm7, %v1066_v10, 0.0  ;;  %v1054_v31 = vpop.permute.xlu1 %1053  ;;  %v1372_v10 = vld [vmem:[%s5389_s8 + $0x8] sm:$0xff] }
 0x6d2   :  { %1228 = vrot.lane.b32.xlu0 %v4251_v21, %s5443_s29  ;;  %1196 = vrot.lane.b32.xlu1 %v4251_v21, %s5444_s27  ;;  %v1065_v52 = vsel %vm193_vm2, 0.0, %v1054_v31 }
 0x6d3   :  { %v1169_v23 = vpop.permute.xlu0 %1168  ;;  %v4307_v25 = vsel %vm1069_vm7, %v1065_v52, 0.0  ;;  %1443 = vmatprep.mubr.f32.mxu1 %v1372_v10 }
 0x6d4   :  { %v1177_v24 = vsel %vm193_vm2, 0.0, %v1169_v23 }
 0x6d5   :  { %v1181_v58 = vsel %vm1069_vm7, %v1177_v24, 0.0  ;;  %v1167_v48 = vpop.permute.xlu1 %1166 }
 0x6d6   :  { %1220 = vrot.lane.b32.xlu0 %v4251_v21, %s5445_s4  ;;  %1188 = vrot.lane.b32.xlu1 %v4251_v21, %s5446_s23  ;;  %v1176_v3 = vsel %vm193_vm2, 0.0, %v1167_v48 }
 0x6d7   :  { %v1180_v59 = vsel %vm1069_vm7, %v1176_v3, 0.0  ;;  %v1060_v33 = vpop.permute.xlu0 %1059 }
 0x6d8   :  { %v1068_v14 = vsel %vm193_vm2, 0.0, %v1060_v33 }
 0x6d9   :  { %v1058_v8 = vpop.permute.xlu1 %1057  ;;  %v4329_v28 = vsel %vm1069_vm7, %v1068_v14, 0.0 }
 0x6da   :  { %1212 = vrot.lane.b32.xlu0 %v4251_v21, %s5439_s3  ;;  %1202 = vrot.lane.b32.xlu1 %v4267_v22, %s3485_s26  ;;  %v1067_v5 = vsel %vm193_vm2, 0.0, %v1058_v8  ;;  %vm2092_vm2 = vcmask 1044480  }
 0x6db   :  { %v4319_v60 = vsel %vm1069_vm7, %v1067_v5, 0.0 }
 0x6de   :  { %1152 = vrot.lane.b32.xlu0 %v4275_v51, %s5425_s28  ;;  %1194 = vrot.lane.b32.xlu1 %v4267_v22, %s5444_s27 }
 0x6e2   :  { %1104 = vrot.lane.b32.xlu0 %v4275_v51, %s3485_s26  ;;  %1186 = vrot.lane.b32.xlu1 %v4267_v22, %s5446_s23 }
 0x6e6   :  { %1140 = vrot.lane.b32.xlu0 %v4275_v51, %s5443_s29  ;;  %1210 = vrot.lane.b32.xlu1 %v4267_v22, %s5439_s3 }
 0x6ea   :  { %1092 = vrot.lane.b32.xlu0 %v4275_v51, %s5444_s27  ;;  %1208 = vrot.lane.b32.xlu1 %v1181_v58, %s3485_s26 }
 0x6ee   :  { %1200 = vrot.lane.b32.xlu1 %v1181_v58, %s5444_s27  ;;  %1234 = vrot.lane.b32.xlu0 %v4267_v22, %s5425_s28 }
 0x6f2   :  { %1192 = vrot.lane.b32.xlu1 %v1181_v58, %s5446_s23  ;;  %1226 = vrot.lane.b32.xlu0 %v4267_v22, %s5443_s29 }
 0x6f6   :  { %1218 = vrot.lane.b32.xlu0 %v4267_v22, %s5445_s4  ;;  %1238 = vrot.lane.b32.xlu1 %v1180_v59, %s5425_s28 }
 0x6fa   :  { %1150 = vrot.lane.b32.xlu0 %v4307_v25, %s5425_s28  ;;  %1198 = vrot.lane.b32.xlu1 %v1180_v59, %s5444_s27 }
 0x6fe   :  { %1102 = vrot.lane.b32.xlu0 %v4307_v25, %s3485_s26  ;;  %1190 = vrot.lane.b32.xlu1 %v1180_v59, %s5446_s23 }
 0x702   :  { %1240 = vrot.lane.b32.xlu0 %v1181_v58, %s5425_s28  ;;  %1214 = vrot.lane.b32.xlu1 %v1180_v59, %s5439_s3 }
 0x706   :  { %1232 = vrot.lane.b32.xlu0 %v1181_v58, %s5443_s29  ;;  %1118 = vrot.lane.b32.xlu1 %v4319_v60, %s5439_s3 }
 0x70a   :  { %1224 = vrot.lane.b32.xlu0 %v1181_v58, %s5445_s4  ;;  %1246 = vrot.lane.b32.xlu1 %v1180_v59, %s3495_s5 }
 0x70e   :  { %1216 = vrot.lane.b32.xlu0 %v1181_v58, %s5439_s3 }
 0x712   :  { %1156 = vrot.lane.b32.xlu0 %v4329_v28, %s5425_s28 }
 0x716   :  { %1108 = vrot.lane.b32.xlu0 %v4329_v28, %s3485_s26 }
 0x71a   :  { %1144 = vrot.lane.b32.xlu0 %v4329_v28, %s5443_s29 }
 0x71e   :  { %1096 = vrot.lane.b32.xlu0 %v4329_v28, %s5444_s27 }
 0x722   :  { %1206 = vrot.lane.b32.xlu0 %v1180_v59, %s3485_s26 }
 0x726   :  { %1138 = vrot.lane.b32.xlu0 %v4307_v25, %s5443_s29 }
 0x72a   :  { %1230 = vrot.lane.b32.xlu0 %v1180_v59, %s5443_s29 }
 0x72e   :  { %1090 = vrot.lane.b32.xlu0 %v4307_v25, %s5444_s27 }
 0x732   :  { %1222 = vrot.lane.b32.xlu0 %v1180_v59, %s5445_s4 }
 0x736   :  { %1132 = vrot.lane.b32.xlu0 %v4329_v28, %s5445_s4 }
 0x73a   :  { %1084 = vrot.lane.b32.xlu0 %v4329_v28, %s5446_s23 }
 0x73e   :  { %1128 = vrot.lane.b32.xlu0 %v4275_v51, %s5445_s4 }
 0x740   :  { %v1237_v26 = vpop.permute.xlu0 %1236  ;;  %v1205_v46 = vpop.permute.xlu1 %1204 }
 0x741   :  { %1300 = vrot.lane.b32.xlu1 %v1237_v26, %s3495_s5 }
 0x742   :  { %1080 = vrot.lane.b32.xlu0 %v4275_v51, %s5446_s23 }
 0x744   :  { %v1229_v2 = vpop.permute.xlu0 %1228  ;;  %v1197_v30 = vpop.permute.xlu1 %1196 }
 0x745   :  { %1268 = vrot.lane.b32.xlu1 %v1205_v46, %s3495_s5 }
 0x746   :  { %1126 = vrot.lane.b32.xlu0 %v4307_v25, %s5445_s4 }
 0x748   :  { %v1221_v36 = vpop.permute.xlu0 %1220  ;;  %v1189_v32 = vpop.permute.xlu1 %1188 }
 0x749   :  { %1292 = vrot.lane.b32.xlu1 %v1229_v2, %s3495_s5 }
 0x74a   :  { %1078 = vrot.lane.b32.xlu0 %v4307_v25, %s5446_s23 }
 0x74c   :  { %v4361_v37 = vpop.permute.xlu0 %1212  ;;  %v1203_v63 = vpop.permute.xlu1 %1202 }
 0x74d   :  { %1260 = vrot.lane.b32.xlu1 %v1197_v30, %s3495_s5 }
 0x74e   :  { %1120 = vrot.lane.b32.xlu0 %v4329_v28, %s5439_s3 }
 0x750   :  { %v4366_v9 = vpop.permute.xlu0 %1152  ;;  %v1195_v18 = vpop.permute.xlu1 %1194 }
 0x751   :  { %1284 = vrot.lane.b32.xlu1 %v1221_v36, %s3495_s5 }
 0x752   :  { %1248 = vrot.lane.b32.xlu0 %v1181_v58, %s3495_s5 }
 0x754   :  { %v4370_v15 = vpop.permute.xlu0 %1104  ;;  %v1187_v29 = vpop.permute.xlu1 %1186 }
 0x755   :  { %1252 = vrot.lane.b32.xlu1 %v1189_v32, %s3495_s5 }
 0x756   :  { %1116 = vrot.lane.b32.xlu0 %v4275_v51, %s5439_s3 }
 0x758   :  { %v4375_v61 = vpop.permute.xlu0 %1140  ;;  %v1211_v56 = vpop.permute.xlu1 %1210 }
 0x75a   :  { %1154 = vrot.lane.b32.xlu0 %v4319_v60, %s5425_s28 }
 0x75c   :  { %v4379_v0 = vpop.permute.xlu0 %1092  ;;  %v1209_v40 = vpop.permute.xlu1 %1208 }
 0x75e   :  { %1106 = vrot.lane.b32.xlu0 %v4319_v60, %s3485_s26 }
 0x760   :  { %v1235_v50 = vpop.permute.xlu0 %1234  ;;  %v1201_v16 = vpop.permute.xlu1 %1200 }
 0x761   :  { %1298 = vrot.lane.b32.xlu1 %v1235_v50, %s3495_s5 }
 0x762   :  { %1142 = vrot.lane.b32.xlu0 %v4319_v60, %s5443_s29 }
 0x764   :  { %v1227_v35 = vpop.permute.xlu0 %1226  ;;  %v1193_v53 = vpop.permute.xlu1 %1192 }
 0x765   :  { %1266 = vrot.lane.b32.xlu1 %v1203_v63, %s3495_s5 }
 0x766   :  { %1094 = vrot.lane.b32.xlu0 %v4319_v60, %s5444_s27 }
 0x768   :  { %v1219_v55 = vpop.permute.xlu0 %1218  ;;  %v1239_v7 = vpop.permute.xlu1 %1238 }
 0x769   :  { %1290 = vrot.lane.b32.xlu1 %v1227_v35, %s3495_s5 }
 0x76a   :  { %1130 = vrot.lane.b32.xlu0 %v4319_v60, %s5445_s4 }
 0x76c   :  { %v4392_v34 = vpop.permute.xlu0 %1150  ;;  %v1199_v62 = vpop.permute.xlu1 %1198 }
 0x76d   :  { %1258 = vrot.lane.b32.xlu1 %v1195_v18, %s3495_s5 }
 0x76e   :  { %1082 = vrot.lane.b32.xlu0 %v4319_v60, %s5446_s23 }
 0x770   :  { %v4397_v13 = vpop.permute.xlu0 %1102  ;;  %v1191_v38 = vpop.permute.xlu1 %1190 }
 0x771   :  { %1282 = vrot.lane.b32.xlu1 %v1219_v55, %s3495_s5 }
 0x772   :  { %1244 = vrot.lane.b32.xlu0 %v4251_v21, %s3495_s5 }
 0x774   :  { %v1241_v57 = vpop.permute.xlu0 %1240  ;;  %v1215_v19 = vpop.permute.xlu1 %1214 }
 0x775   :  { %1250 = vrot.lane.b32.xlu1 %v1187_v29, %s3495_s5 }
 0x776   :  { %1278 = vrot.lane.b32.xlu0 %v1215_v19, %s3495_s5 }
 0x778   :  { %v1233_v54 = vpop.permute.xlu0 %1232  ;;  %v4428_v23 = vpop.permute.xlu1 %1118 }
 0x779   :  { %1304 = vrot.lane.b32.xlu1 %v1241_v57, %s3495_s5 }
 0x77a   :  { %1274 = vrot.lane.b32.xlu0 %v1211_v56, %s3495_s5 }
 0x77c   :  { %v1225_v11 = vpop.permute.xlu0 %1224  ;;  %v4433_v24 = vpop.permute.xlu1 %1246 }
 0x77d   :  { %1272 = vrot.lane.b32.xlu1 %v1209_v40, %s3495_s5 }
 0x780   :  { %v1217_v47 = vpop.permute.xlu0 %1216 }
 0x781   :  { %1296 = vrot.lane.b32.xlu1 %v1233_v54, %s3495_s5 }
 0x784   :  { %v1157_v20 = vpop.permute.xlu0 %1156 }
 0x785   :  { %1264 = vrot.lane.b32.xlu1 %v1201_v16, %s3495_s5 }
 0x788   :  { %v1109_v4 = vpop.permute.xlu0 %1108 }
 0x789   :  { %1288 = vrot.lane.b32.xlu1 %v1225_v11, %s3495_s5 }
 0x78c   :  { %v4410_v17 = vpop.permute.xlu0 %1144 }
 0x78d   :  { %1256 = vrot.lane.b32.xlu1 %v1193_v53, %s3495_s5 }
 0x790   :  { %v4413_v43 = vpop.permute.xlu0 %1096 }
 0x791   :  { %1280 = vrot.lane.b32.xlu1 %v1217_v47, %s3495_s5 }
 0x794   :  { %v1207_v45 = vpop.permute.xlu0 %1206 }
 0x795   :  { %1302 = vrot.lane.b32.xlu1 %v1239_v7, %s3495_s5 }
 0x798   :  { %v4417_v21 = vpop.permute.xlu0 %1138 }
 0x799   :  { %1270 = vrot.lane.b32.xlu1 %v1207_v45, %s3495_s5 }
 0x79c   :  { %v1231_v6 = vpop.permute.xlu0 %1230 }
 0x79d   :  { %1294 = vrot.lane.b32.xlu1 %v1231_v6, %s3495_s5 }
 0x7a0   :  { %v4421_v44 = vpop.permute.xlu0 %1090 }
 0x7a1   :  { %1262 = vrot.lane.b32.xlu1 %v1199_v62, %s3495_s5 }
 0x7a4   :  { %v1223_v49 = vpop.permute.xlu0 %1222 }
 0x7a5   :  { %1286 = vrot.lane.b32.xlu1 %v1223_v49, %s3495_s5 }
 0x7a8   :  { %v4439_v3 = vpop.permute.xlu0 %1132 }
 0x7a9   :  { %1254 = vrot.lane.b32.xlu1 %v1191_v38, %s3495_s5 }
 0x7ac   :  { %v4441_v52 = vpop.permute.xlu0 %1084 }
 0x7ad   :  { %1276 = vrot.lane.b32.xlu1 %v4361_v37, %s3495_s5 }
 0x7b0   :  { %v4445_v5 = vpop.permute.xlu0 %1128 }
 0x7b1   :  { %1114 = vrot.lane.b32.xlu1 %v4307_v25, %s5439_s3 }
 0x7b3   :  { %v1301_v31 = vpop.permute.xlu1 %1300 }
 0x7b4   :  { %v4449_v14 = vpop.permute.xlu0 %1080 }
 0x7b5   :  { %1242 = vrot.lane.b32.xlu1 %v4267_v22, %s3495_s5 }
 0x7b7   :  { %v1269_v58 = vpop.permute.xlu1 %1268 }
 0x7b8   :  { %v4451_v2 = vpop.permute.xlu0 %1126  ;;  %v1352_v6 = vsel %vm1338_vm8, %v4370_v15, %v1269_v58 }
 0x7bb   :  { %v1293_v48 = vpop.permute.xlu1 %1292 }
 0x7bc   :  { %v4453_v30 = vpop.permute.xlu0 %1078 }
 0x7bf   :  { %v1261_v59 = vpop.permute.xlu1 %1260 }
 0x7c0   :  { %v4457_v37 = vpop.permute.xlu0 %1120 }
 0x7c3   :  { %v4443_v8 = vpop.permute.xlu1 %1284 }
 0x7c4   :  { %v4461_v18 = vpop.permute.xlu0 %1248 }
 0x7c7   :  { %v4447_v33 = vpop.permute.xlu1 %1252 }
 0x7c8   :  { %v4464_v50 = vpop.permute.xlu0 %1116 }
 0x7cc   :  { %v1155_v53 = vpop.permute.xlu0 %1154 }
 0x7d0   :  { %v1107_v62 = vpop.permute.xlu0 %1106 }
 0x7d3   :  { %v1299_v26 = vpop.permute.xlu1 %1298 }
 0x7d4   :  { %v1143_v57 = vpop.permute.xlu0 %1142 }
 0x7d7   :  { %v1267_v46 = vpop.permute.xlu1 %1266 }
 0x7d8   :  { %v1095_v11 = vpop.permute.xlu0 %1094 }
 0x7db   :  { %v1291_v22 = vpop.permute.xlu1 %1290 }
 0x7dc   :  { %v1131_v49 = vpop.permute.xlu0 %1130 }
 0x7df   :  { %v1259_v36 = vpop.permute.xlu1 %1258 }
 0x7e0   :  { %v1083_v58 = vpop.permute.xlu0 %1082 }
 0x7e3   :  { %v4455_v32 = vpop.permute.xlu1 %1282 }
 0x7e7   :  { %v4459_v63 = vpop.permute.xlu1 %1250 }
 0x7eb   :  { %v1305_v29 = vpop.permute.xlu1 %1304 }
 0x7ec   :  { %v1370_v56 = vsel %vm1338_vm8, %v1157_v20, %v1305_v29  ;;  %v1367_v29 = vsel %vm1338_vm8, %v4392_v34, %v1299_v26  ;;  %v1364_v34 = vsel %vm1338_vm8, %v4375_v61, %v1293_v48  ;;  %v1347_v26 = vsel %vm1338_vm8, %v4421_v44, %v1259_v36 }
 0x7ed   :  { %2944 = vmatprep.subr.mxu1 %v1370_v56  ;;  %v1351_v56 = vsel %vm1338_vm8, %v4397_v13, %v1267_v46  ;;  %v1348_v13 = vsel %vm1338_vm8, %v4379_v0, %v1261_v59  ;;  %v1344_v44 = vsel %vm1338_vm8, %v4449_v14, %v4447_v33 }
 0x7ef   :  { %v1273_v40 = vpop.permute.xlu1 %1272 }
 0x7f0   :  { %v1354_v16 = vsel %vm1338_vm8, %v1109_v4, %v1273_v40  ;;  %v1368_v4 = vsel %vm1338_vm8, %v4366_v9, %v1301_v31 }
 0x7f1   :  { %2945 = vmatpush3.msra.mxu1 %v1354_v16 }
 0x7f3   :  { %v1297_v35 = vpop.permute.xlu1 %1296 }
 0x7f4   :  { %v1366_v40 = vsel %vm1338_vm8, %v4410_v17, %v1297_v35  ;;  %v1245_v35 = vpop.permute.xlu0 %1244 }
 0x7f7   :  { %v1265_v55 = vpop.permute.xlu1 %1264 }
 0x7f8   :  { %v1350_v9 = vsel %vm1338_vm8, %v4413_v43, %v1265_v55  ;;  %v1363_v43 = vsel %vm1338_vm8, %v4417_v21, %v1291_v22  ;;  %v1360_v21 = vsel %vm1338_vm8, %v4445_v5, %v4443_v8  ;;  %v1343_v22 = vsel %vm1338_vm8, %v4453_v30, %v4459_v63  ;;  %v1279_v36 = vpop.permute.xlu0 %1278 }
 0x7f9   :  { %v1342_v5 = vsel %vm1338_vm8, %v4329_v28, %v4461_v18  ;;  %v1357_v14 = vsel %vm1338_vm8, %v4428_v23, %v1279_v36  ;;  %v1371_v23 = vld [vmem:[%s5389_s8] sm:$0xff]  ;;  %v1376_v18 = vld [vmem:[%s5389_s8 + $0x28] sm:$0xff] }
 0x7fb   :  { %v1289_v7 = vpop.permute.xlu1 %1288 }
 0x7fc   :  { %v1362_v46 = vsel %vm1338_vm8, %v4439_v3, %v1289_v7 }
 0x7ff   :  { %v1257_v38 = vpop.permute.xlu1 %1256 }
 0x800   :  { %v1346_v61 = vsel %vm1338_vm8, %v4441_v52, %v1257_v38  ;;  %v1359_v52 = vsel %vm1338_vm8, %v4451_v2, %v4455_v32  ;;  %v1341_v2 = vsel %vm1338_vm8, %v4319_v60, %v4433_v24  ;;  %v1340_v32 = vsel %vm1338_vm8, %v4275_v51, %v1245_v35  ;;  %v1374_v24 = vld [vmem:[%s5389_s8 + $0x18] sm:$0xff]  ;;  %v1373_v51 = vld [vmem:[%s5389_s8 + $0x10] sm:$0xff] }
 0x803   :  { %v1281_v19 = vpop.permute.xlu1 %1280 }
 0x804   :  { %v1358_v8 = vsel %vm1338_vm8, %v4457_v37, %v1281_v19  ;;  %v1275_v37 = vpop.permute.xlu0 %1274 }
 0x807   :  { %v1303_v54 = vpop.permute.xlu1 %1302 }
 0x808   :  { %v1369_v47 = vsel %vm1338_vm8, %v1155_v53, %v1303_v54  ;;  %v1377_v53 = vld [vmem:[%s5389_s8 + $0x30] sm:$0xff] }
 0x809   :  { %2946 = vmatprep.subr.mxu1 %v1369_v47 }
 0x80b   :  { %v1271_v20 = vpop.permute.xlu1 %1270 }
 0x80c   :  { %v1353_v45 = vsel %vm1338_vm8, %v1107_v62, %v1271_v20 }
 0x80d   :  { %2947 = vmatpush3.msra.mxu1 %v1353_v45 }
 0x80e   :  { %2948 = vmatprep.subr.mxu1 %v1368_v4 }
 0x80f   :  { %2949 = vmatpush3.msra.mxu1 %v1352_v6  ;;  %v1295_v10 = vpop.permute.xlu1 %1294 }
 0x810   :  { %2950 = vmatprep.subr.mxu1 %v1367_v29  ;;  %v1365_v31 = vsel %vm1338_vm8, %v1143_v57, %v1295_v10 }
 0x811   :  { %2951 = vmatpush3.msra.mxu1 %v1351_v56 }
 0x812   :  { %2952 = vmatprep.subr.mxu1 %v1366_v40 }
 0x813   :  { %2953 = vmatpush3.msra.mxu1 %v1350_v9  ;;  %v1263_v15 = vpop.permute.xlu1 %1262 }
 0x814   :  { %v1349_v16 = vsel %vm1338_vm8, %v1095_v11, %v1263_v15  ;;  %2954 = vmatprep.subr.mxu1 %v1365_v31 }
 0x815   :  { %2955 = vmatpush3.msra.mxu1 %v1349_v16 }
 0x816   :  { %2956 = vmatprep.subr.mxu1 %v1364_v34 }
 0x817   :  { %2957 = vmatpush3.msra.mxu1 %v1348_v13  ;;  %v1287_v17 = vpop.permute.xlu1 %1286 }
 0x818   :  { %2958 = vmatprep.subr.mxu1 %v1363_v43  ;;  %v1361_v48 = vsel %vm1338_vm8, %v1131_v49, %v1287_v17 }
 0x819   :  { %2959 = vmatpush3.msra.mxu1 %v1347_v26 }
 0x81a   :  { %2960 = vmatprep.subr.mxu1 %v1362_v46 }
 0x81b   :  { %2961 = vmatpush3.msra.mxu1 %v1346_v61  ;;  %v1255_v0 = vpop.permute.xlu1 %1254 }
 0x81c   :  { %v1345_v59 = vsel %vm1338_vm8, %v1083_v58, %v1255_v0  ;;  %2962 = vmatprep.subr.mxu1 %v1361_v48 }
 0x81d   :  { %2963 = vmatpush3.msra.mxu1 %v1345_v59 }
 0x81e   :  { %2964 = vmatprep.subr.mxu1 %v1360_v21 }
 0x81f   :  { %2965 = vmatpush3.msra.mxu1 %v1344_v44  ;;  %v1277_v3 = vpop.permute.xlu1 %1276 }
 0x820   :  { %2966 = vmatprep.subr.mxu1 %v1359_v52  ;;  %v1356_v30 = vsel %vm1338_vm8, %v4464_v50, %v1277_v3  ;;  %v1378_v50 = vld [vmem:[%s5389_s8 + $0x38] sm:$0xff] }
 0x821   :  { %2967 = vmatpush3.msra.mxu1 %v1343_v22 }
 0x822   :  { %2968 = vmatprep.subr.mxu1 %v1358_v8 }
 0x823   :  { %2969 = vmatpush3.msra.mxu1 %v1342_v5  ;;  %v1115_v33 = vpop.permute.xlu1 %1114 }
 0x824   :  { %2970 = vmatprep.subr.mxu1 %v1357_v14  ;;  %v1355_v63 = vsel %vm1338_vm8, %v1115_v33, %v1275_v37 }
 0x825   :  { %2971 = vmatpush3.msra.mxu1 %v1341_v2 }
 0x826   :  { %2972 = vmatprep.subr.mxu1 %v1356_v30 }
 0x827   :  { %2973 = vmatpush3.msra.mxu1 %v1340_v32  ;;  %v1243_v28 = vpop.permute.xlu1 %1242 }
 0x828   :  { %v1339_v60 = vsel %vm1338_vm8, %v4307_v25, %v1243_v28  ;;  %2974 = vmatprep.subr.mxu1 %v1355_v63  ;;  %v1375_v25 = vld [vmem:[%s5389_s8 + $0x20] sm:$0xff]  ;;  %s5448_s8 = smov 64   ;;  %vm2618_vm8 = vcmask 64512  }
 0x829   :  { %2975 = vmatpush3.msra.mxu1 %v1339_v60 }
 0x82a   :  { %1444 = vmatmul.mubr.f32.vlgmr.msra.gmra.mxu1 %v1371_v23 }
 0x82b   :  { %1448 = vmatprep.mubr.f32.mxu1 %v1374_v24 }
 0x82e   :  { %1449 = vmatmul.mubr.f32.gmra.mxu1 %v1373_v51 }
 0x82f   :  { %1453 = vmatprep.mubr.f32.mxu1 %v1376_v18 }
 0x832   :  { %1454 = vmatmul.mubr.f32.gmra.mxu1 %v1375_v25 }
 0x833   :  { %1458 = vmatprep.mubr.f32.mxu1 %v1378_v50  ;;  %v1516_v50 = vld [vmem:[%s5390_s9 + $0x10] sm:$0xff] }
 0x836   :  { %1459 = vmatmul.mubr.f32.gmra.mxu1 %v1377_v53 }
 0x8ea   :  { %v2976_v55 = vpop.f32.mrf.mxu1 }
 0x8ec   :  { %v2977_v7 = vpop.f32.mrf.mxu1 }
 0x8ed   :  { %v4567_v15 = vadd.f32 %v2977_v7, %v2976_v55  ;;  %v1515_v7 = vld [vmem:[%s5390_s9 + $0x8] sm:$0xff] }
 0x8ee   :  { %v2979_v62 = vpop.f32.mrf.mxu1 }
 0x8ef   :  { %v1465_v58 = vsel %vm1464_vm9, %v4567_v15, 0.0  ;;  %v1477_v16 = vmul.f32 %v4567_v15, %v4567_v15 }
 0x8f0   :  { %v2980_v38 = vpop.f32.mrf.mxu1 }
 0x8f1   :  { %v4547_v57 = vadd.f32 %v2980_v38, %v2979_v62  ;;  %v1481_v34 = vsel %vm1464_vm9, %v1477_v16, 0.0  ;;  %v1532_v62 = vld [vmem:[%s5391_s10 + $0x10] sm:$0xff] }
 0x8f2   :  { %v2982_v19 = vpop.f32.mrf.mxu1 }
 0x8f3   :  { %v1468_v54 = vsel %vm1464_vm9, %v4547_v57, 0.0  ;;  %v1478_v56 = vmul.f32 %v4547_v57, %v4547_v57 }
 0x8f4   :  { %v2983_v11 = vpop.f32.mrf.mxu1  ;;  %1469 = vadd.xlane.f32.xlu0 %v1468_v54 }
 0x8f5   :  { %v4551_v47 = vadd.f32 %v2983_v11, %v2982_v19  ;;  %v1484_v31 = vsel %vm1464_vm9, %v1478_v56, 0.0  ;;  %v1517_v19 = vld [vmem:[%s5390_s9 + $0x18] sm:$0xff] }
 0x8f6   :  { %v2985_v20 = vpop.f32.mrf.mxu1 }
 0x8f7   :  { %v1471_v45 = vsel %vm1464_vm9, %v4551_v47, 0.0  ;;  %v1479_v4 = vmul.f32 %v4551_v47, %v4551_v47 }
 0x8f8   :  { %v2986_v6 = vpop.f32.mrf.mxu1  ;;  %1472 = vadd.xlane.f32.xlu1 %v1471_v45 }
 0x8f9   :  { %v4557_v49 = vadd.f32 %v2986_v6, %v2985_v20  ;;  %v1487_v10 = vsel %vm1464_vm9, %v1479_v4, 0.0  ;;  %v1531_v6 = vld [vmem:[%s5391_s10 + $0x8] sm:$0xff] }
 0x8fb   :  { %v1474_v29 = vsel %vm1464_vm9, %v4557_v49, 0.0  ;;  %v1480_v40 = vmul.f32 %v4557_v49, %v4557_v49 }
 0x8fc   :  { %1488 = vadd.xlane.f32.xlu1 %v1487_v10  ;;  %1475 = vadd.xlane.f32.xlu0 %v1474_v29 }
 0x8fd   :  { %v1490_v9 = vsel %vm1464_vm9, %v1480_v40, 0.0  ;;  %v1533_v40 = vld [vmem:[%s5391_s10 + $0x18] sm:$0xff]  ;;  %vm2833_vm9 = vcmask 519170  }
 0x900   :  { %1485 = vadd.xlane.f32.xlu1 %v1484_v31  ;;  %1491 = vadd.xlane.f32.xlu0 %v1490_v9  ;;  %v1514_v9 = vld [vmem:[%s5390_s9] sm:$0xff]  ;;  %s5447_s9 = smov 121  }
 0x904   :  { %1466 = vadd.xlane.f32.xlu0 %v1465_v58 }
 0x908   :  { %1482 = vadd.xlane.f32.xlu0 %v1481_v34 }
 0x97d   :  { %v1470_v13 = vpop.xlane.xlu0 %1469 }
 0x97e   :  { %v1495_v35 = vmul.f32 0.01724138, %v1470_v13  ;;  %v1530_v13 = vld [vmem:[%s5391_s10] sm:$0xff] }
 0x980   :  { %v1503_v52 = vmul.f32 %v1495_v35, %v1495_v35 }
 0x981   :  { %v1473_v17 = vpop.xlane.xlu1 %1472 }
 0x982   :  { %v1496_v43 = vmul.f32 0.01724138, %v1473_v17 }
 0x984   :  { %v1504_v61 = vmul.f32 %v1496_v43, %v1496_v43 }
 0x985   :  { %v1489_v26 = vpop.xlane.xlu1 %1488  ;;  %v1476_v46 = vpop.xlane.xlu0 %1475 }
 0x986   :  { %v1500_v0 = vmul.f32 0.01724138, %v1489_v26  ;;  %v1497_v48 = vmul.f32 0.01724138, %v1476_v46 }
 0x988   :  { %v1508_v59 = vsub.f32 %v1500_v0, %v1504_v61  ;;  %v1505_v21 = vmul.f32 %v1497_v48, %v1497_v48 }
 0x989   :  { %v1486_v44 = vpop.xlane.xlu1 %1485  ;;  %v1492_v3 = vpop.xlane.xlu0 %1491 }
 0x98a   :  { %v1512_v22 = vmax.f32 %v1508_v59, 0.0  ;;  %v1499_v36 = vmul.f32 0.01724138, %v1486_v44  ;;  %v1501_v8 = vmul.f32 0.01724138, %v1492_v3 }
 0x98c   :  { %v1520_v5 = vadd.f32 1e-05, %v1512_v22  ;;  %v1507_v33 = vsub.f32 %v1499_v36, %v1503_v52  ;;  %v1509_v14 = vsub.f32 %v1501_v8, %v1505_v21 }
 0x98d   :  { %v1467_v2 = vpop.xlane.xlu0 %1466 }
 0x98e   :  { %3434 = vrsqrt.f32 %v1520_v5  ;;  %v1511_v30 = vmax.f32 %v1507_v33, 0.0  ;;  %v1513_v32 = vmax.f32 %v1509_v14, 0.0  ;;  %v1494_v37 = vmul.f32 0.01724138, %v1467_v2 }
 0x990   :  { %v1519_v28 = vadd.f32 1e-05, %v1511_v30  ;;  %v1521_v63 = vadd.f32 1e-05, %v1513_v32  ;;  %v1502_v60 = vmul.f32 %v1494_v37, %v1494_v37 }
 0x991   :  { %v1483_v23 = vpop.xlane.xlu0 %1482 }
 0x992   :  { %3436 = vrsqrt.f32 %v1519_v28  ;;  %v1498_v24 = vmul.f32 0.01724138, %v1483_v23 }
 0x993   :  { %3438 = vrsqrt.f32 %v1521_v63 }
 0x994   :  { %v1506_v51 = vsub.f32 %v1498_v24, %v1502_v60 }
 0x996   :  { %v1510_v18 = vmax.f32 %v1506_v51, 0.0 }
 0x998   :  { %v1518_v25 = vadd.f32 1e-05, %v1510_v18 }
 0x99a   :  { %3440 = vrsqrt.f32 %v1518_v25 }
 0x99b   :  { %v3435_v53 = vpop.eup %3434 }
 0x99c   :  { %v1528_v55 = vmul.f32 %v3435_v53, %v1516_v50 }
 0x99e   :  { %1554 = vperm.xlu0 %3325, %v1528_v55   ;;  %v1536_v38 = vmul.f32 %v1528_v55, %v1496_v43 }
 0x99f   :  { %v3437_v54 = vpop.eup %3436 }
 0x9a0   :  { %v3439_v11 = vpop.eup %3438  ;;  %v1527_v20 = vmul.f32 %v3437_v54, %v1515_v7  ;;  %v1540_v45 = vsub.f32 %v1532_v62, %v1536_v38 }
 0x9a1   :  { %v1529_v4 = vmul.f32 %v3439_v11, %v1517_v19 }
 0x9a2   :  { %1549 = vperm.xlu1 %3324, %v1527_v20   ;;  %1578 = vperm.xlu0 %3325, %v1540_v45   ;;  %v1535_v10 = vmul.f32 %v1527_v20, %v1495_v35  ;;  %v1804_v45 = vld [vmem:[%s5392_s11 + $0x8] sm:$0xff] }
 0x9a3   :  { %v1537_v56 = vmul.f32 %v1529_v4, %v1497_v48  ;;  %1875 = vmatprep.mubr.f32.mxu0 %v1804_v45 }
 0x9a4   :  { %v1539_v29 = vsub.f32 %v1531_v6, %v1535_v10 }
 0x9a5   :  { %v1541_v58 = vsub.f32 %v1533_v40, %v1537_v56  ;;  %v1903_v56 = vld [vmem:[%s5393_s12 + $0x8] sm:$0xff]  ;;  %v1902_v40 = vld [vmem:[%s5393_s12] sm:$0xff] }
 0x9a6   :  { %1559 = vperm.xlu1 %3324, %v1529_v4   ;;  %1573 = vperm.xlu0 %3325, %v1539_v29  }
 0x9a7   :  { %v3441_v31 = vpop.eup %3440 }
 0x9a8   :  { %v1526_v16 = vmul.f32 %v3441_v31, %v1514_v9  ;;  %v1905_v9 = vld [vmem:[%s5393_s12 + $0x18] sm:$0xff]  ;;  %v1904_v31 = vld [vmem:[%s5393_s12 + $0x10] sm:$0xff] }
 0x9aa   :  { %1583 = vperm.xlu1 %3324, %v1541_v58   ;;  %v1534_v34 = vmul.f32 %v1526_v16, %v1494_v37 }
 0x9ac   :  { %v1538_v17 = vsub.f32 %v1530_v13, %v1534_v34 }
 0x9ae   :  { %1544 = vperm.xlu1 %3324, %v1526_v16  }
 0x9b2   :  { %1568 = vperm.xlu1 %3324, %v1538_v17  }
 0xa19   :  { %v1555_v26 = vpop.permute.xlu0 %1554 }
 0xa1a   :  { %v1564_v5 = vmul.f32 %v4551_v47, %v1555_v26 }
 0xa1d   :  { %v1550_v43 = vpop.permute.xlu1 %1549  ;;  %v1579_v35 = vpop.permute.xlu0 %1578 }
 0xa1e   :  { %v1563_v59 = vmul.f32 %v4547_v57, %v1550_v43  ;;  %v1588_v33 = vadd.f32 %v1579_v35, %v1564_v5 }
 0xa21   :  { %v1560_v46 = vpop.permute.xlu1 %1559  ;;  %v1574_v48 = vpop.permute.xlu0 %1573 }
 0xa22   :  { %v1587_v3 = vadd.f32 %v1574_v48, %v1563_v59 }
 0xa24   :  { %v1591_v36 = vmax.f32 %v1587_v3, 0.0 }
 0xa25   :  { %v1584_v61 = vpop.permute.xlu1 %1583 }
 0xa26   :  { %v4610_v57 = vadd.f32 %v1591_v36, %v4229_v39 }
 0xa29   :  { %v1545_v0 = vpop.permute.xlu1 %1544 }
 0xa2a   :  { %v1562_v21 = vmul.f32 %v4567_v15, %v1545_v0  ;;  %v1565_v15 = vmul.f32 %v4557_v49, %v1560_v46 }
 0xa2c   :  { %v1589_v39 = vadd.f32 %v1584_v61, %v1565_v15 }
 0xa2d   :  { %v1569_v44 = vpop.permute.xlu1 %1568 }
 0xa2e   :  { %v1586_v52 = vadd.f32 %v1569_v44, %v1562_v21  ;;  %v1593_v14 = vmax.f32 %v1589_v39, 0.0 }
 0xa30   :  { %v1590_v22 = vmax.f32 %v1586_v52, 0.0  ;;  %v4633_v49 = vadd.f32 %v1593_v14, %v4237_v12 }
 0xa32   :  { %v4602_v8 = vadd.f32 %v1590_v22, %v4231_v41  ;;  %v1592_v41 = vmax.f32 %v1588_v33, 0.0 }
 0xa34   :  { %1626 = vrot.lane.b32.xlu1 %v4602_v8, %s3485_s26  ;;  %1674 = vrot.lane.b32.xlu0 %v4602_v8, %s5447_s9  ;;  %v4622_v47 = vadd.f32 %v1592_v41, %v4241_v42 }
 0xa38   :  { %1662 = vrot.lane.b32.xlu0 %v4602_v8, %s5443_s29  ;;  %1628 = vrot.lane.b32.xlu1 %v4610_v57, %s3485_s26 }
 0xa3c   :  { %1616 = vrot.lane.b32.xlu1 %v4610_v57, %s5444_s27  ;;  %1676 = vrot.lane.b32.xlu0 %v4610_v57, %s5447_s9 }
 0xa40   :  { %1630 = vrot.lane.b32.xlu1 %v4622_v47, %s3485_s26  ;;  %1664 = vrot.lane.b32.xlu0 %v4610_v57, %s5443_s29 }
 0xa44   :  { %1618 = vrot.lane.b32.xlu1 %v4622_v47, %s5444_s27  ;;  %1678 = vrot.lane.b32.xlu0 %v4622_v47, %s5447_s9 }
 0xa48   :  { %1632 = vrot.lane.b32.xlu1 %v4633_v49, %s3485_s26  ;;  %1666 = vrot.lane.b32.xlu0 %v4622_v47, %s5443_s29 }
 0xa4c   :  { %1614 = vrot.lane.b32.xlu1 %v4602_v8, %s5444_s27  ;;  %1680 = vrot.lane.b32.xlu0 %v4633_v49, %s5447_s9 }
 0xa50   :  { %1620 = vrot.lane.b32.xlu1 %v4633_v49, %s5444_s27  ;;  %1654 = vrot.lane.b32.xlu0 %v4622_v47, %s5445_s4 }
 0xa54   :  { %1606 = vrot.lane.b32.xlu1 %v4622_v47, %s5446_s23  ;;  %1668 = vrot.lane.b32.xlu0 %v4633_v49, %s5443_s29 }
 0xa58   :  { %1608 = vrot.lane.b32.xlu1 %v4633_v49, %s5446_s23  ;;  %1652 = vrot.lane.b32.xlu0 %v4610_v57, %s5445_s4 }
 0xa5c   :  { %1604 = vrot.lane.b32.xlu1 %v4610_v57, %s5446_s23  ;;  %1656 = vrot.lane.b32.xlu0 %v4633_v49, %s5445_s4 }
 0xa60   :  { %1602 = vrot.lane.b32.xlu1 %v4602_v8, %s5446_s23  ;;  %1650 = vrot.lane.b32.xlu0 %v4602_v8, %s5445_s4  ;;  %s3496_s23 = smov 32  }
 0xa64   :  { %1642 = vrot.lane.b32.xlu1 %v4622_v47, %s5439_s3  ;;  %1644 = vrot.lane.b32.xlu0 %v4633_v49, %s5439_s3 }
 0xa68   :  { %1638 = vrot.lane.b32.xlu1 %v4602_v8, %s5439_s3  ;;  %1640 = vrot.lane.b32.xlu0 %v4610_v57, %s5439_s3 }
 0xaa6   :  { %v4671_v12 = vpop.permute.xlu1 %1626  ;;  %v4673_v42 = vpop.permute.xlu0 %1674 }
 0xaa7   :  { %1702 = vrot.lane.b32.xlu1 %v4671_v12, %s5447_s9  ;;  %1734 = vrot.lane.b32.xlu0 %v4673_v42, %s5447_s9 }
 0xaaa   :  { %v4679_v2 = vpop.permute.xlu1 %1628  ;;  %v4681_v30 = vpop.permute.xlu0 %1662 }
 0xaab   :  { %1704 = vrot.lane.b32.xlu1 %v4679_v2, %s5447_s9  ;;  %1726 = vrot.lane.b32.xlu0 %v4681_v30, %s5447_s9 }
 0xaae   :  { %v4687_v32 = vpop.permute.xlu1 %1616  ;;  %v4689_v37 = vpop.permute.xlu0 %1676 }
 0xaaf   :  { %1696 = vrot.lane.b32.xlu1 %v4687_v32, %s5447_s9  ;;  %1736 = vrot.lane.b32.xlu0 %v4689_v37, %s5447_s9 }
 0xab2   :  { %v4695_v28 = vpop.permute.xlu1 %1630  ;;  %v4697_v63 = vpop.permute.xlu0 %1664 }
 0xab3   :  { %1706 = vrot.lane.b32.xlu1 %v4695_v28, %s5447_s9  ;;  %1728 = vrot.lane.b32.xlu0 %v4697_v63, %s5447_s9 }
 0xab6   :  { %v4703_v23 = vpop.permute.xlu1 %1618  ;;  %v4705_v60 = vpop.permute.xlu0 %1678 }
 0xab7   :  { %1698 = vrot.lane.b32.xlu1 %v4703_v23, %s5447_s9  ;;  %1738 = vrot.lane.b32.xlu0 %v4705_v60, %s5447_s9 }
 0xaba   :  { %v4711_v24 = vpop.permute.xlu1 %1632  ;;  %v4713_v51 = vpop.permute.xlu0 %1666 }
 0xabb   :  { %1708 = vrot.lane.b32.xlu1 %v4711_v24, %s5447_s9  ;;  %1730 = vrot.lane.b32.xlu0 %v4713_v51, %s5447_s9 }
 0xabe   :  { %v4719_v18 = vpop.permute.xlu1 %1614  ;;  %v4721_v25 = vpop.permute.xlu0 %1680 }
 0xabf   :  { %1694 = vrot.lane.b32.xlu1 %v4719_v18, %s5447_s9  ;;  %1740 = vrot.lane.b32.xlu0 %v4721_v25, %s5447_s9 }
 0xac2   :  { %v4727_v50 = vpop.permute.xlu1 %1620  ;;  %v4729_v53 = vpop.permute.xlu0 %1654 }
 0xac3   :  { %1700 = vrot.lane.b32.xlu1 %v4727_v50, %s5447_s9  ;;  %1722 = vrot.lane.b32.xlu0 %v4729_v53, %s5447_s9 }
 0xac6   :  { %v4735_v55 = vpop.permute.xlu1 %1606  ;;  %v4737_v7 = vpop.permute.xlu0 %1668 }
 0xac7   :  { %1690 = vrot.lane.b32.xlu1 %v4735_v55, %s5447_s9  ;;  %1732 = vrot.lane.b32.xlu0 %v4737_v7, %s5447_s9 }
 0xaca   :  { %v4743_v62 = vpop.permute.xlu1 %1608  ;;  %v4745_v38 = vpop.permute.xlu0 %1652 }
 0xacb   :  { %1692 = vrot.lane.b32.xlu1 %v4743_v62, %s5447_s9  ;;  %1720 = vrot.lane.b32.xlu0 %v4745_v38, %s5447_s9 }
 0xace   :  { %v4751_v19 = vpop.permute.xlu1 %1604  ;;  %v4753_v54 = vpop.permute.xlu0 %1656 }
 0xacf   :  { %1688 = vrot.lane.b32.xlu1 %v4751_v19, %s5447_s9  ;;  %1724 = vrot.lane.b32.xlu0 %v4753_v54, %s5447_s9 }
 0xad2   :  { %v4759_v11 = vpop.permute.xlu1 %1602  ;;  %v4761_v20 = vpop.permute.xlu0 %1650 }
 0xad3   :  { %1686 = vrot.lane.b32.xlu1 %v4759_v11, %s5447_s9  ;;  %1718 = vrot.lane.b32.xlu0 %v4761_v20, %s5447_s9 }
 0xad6   :  { %v4770_v4 = vpop.permute.xlu1 %1642  ;;  %v4772_v6 = vpop.permute.xlu0 %1644 }
 0xad7   :  { %1714 = vrot.lane.b32.xlu1 %v4770_v4, %s5447_s9  ;;  %1716 = vrot.lane.b32.xlu0 %v4772_v6, %s5447_s9 }
 0xada   :  { %v4778_v10 = vpop.permute.xlu1 %1638  ;;  %v4780_v29 = vpop.permute.xlu0 %1640 }
 0xadb   :  { %1710 = vrot.lane.b32.xlu1 %v4778_v10, %s5447_s9  ;;  %1712 = vrot.lane.b32.xlu0 %v4780_v29, %s5447_s9 }
 0xadf   :  { %1913 = vperm.xlu1 %3324, %v1903_v56   ;;  %1908 = vperm.xlu0 %3325, %v1902_v40  }
 0xae3   :  { %1923 = vperm.xlu1 %3324, %v1905_v9   ;;  %1918 = vperm.xlu0 %3325, %v1904_v31  }
 0xb19   :  { %v1703_v58 = vpop.permute.xlu1 %1702  ;;  %v1735_v16 = vpop.permute.xlu0 %1734 }
 0xb1a   :  { %v1799_v15 = vsel %vm1770_vm10, %v4673_v42, %v1735_v16  ;;  %v1783_v39 = vsel %vm1770_vm10, %v4671_v12, %v1703_v58 }
 0xb1d   :  { %v1705_v34 = vpop.permute.xlu1 %1704  ;;  %v1727_v13 = vpop.permute.xlu0 %1726 }
 0xb1e   :  { %v1784_v41 = vsel %vm1770_vm10, %v4679_v2, %v1705_v34 }
 0xb21   :  { %v1697_v17 = vpop.permute.xlu1 %1696  ;;  %v1737_v43 = vpop.permute.xlu0 %1736 }
 0xb22   :  { %v1800_v33 = vsel %vm1770_vm10, %v4689_v37, %v1737_v43 }
 0xb25   :  { %v1707_v26 = vpop.permute.xlu1 %1706  ;;  %v1729_v46 = vpop.permute.xlu0 %1728 }
 0xb26   :  { %v1785_v22 = vsel %vm1770_vm10, %v4695_v28, %v1707_v26  ;;  %v1796_v9 = vsel %vm1770_vm10, %v4697_v63, %v1729_v46  ;;  %v1809_v26 = vld [vmem:[%s5392_s11 + $0x30] sm:$0xff]  ;;  %v1899_v46 = vld [vmem:[%s5394_s13 + $0x18] sm:$0xff] }
 0xb29   :  { %v1699_v35 = vpop.permute.xlu1 %1698  ;;  %v1739_v61 = vpop.permute.xlu0 %1738 }
 0xb2a   :  { %v1801_v52 = vsel %vm1770_vm10, %v4705_v60, %v1739_v61  ;;  %v1781_v56 = vsel %vm1770_vm10, %v4703_v23, %v1699_v35  ;;  %v1898_v35 = vld [vmem:[%s5394_s13 + $0x10] sm:$0xff]  ;;  %v1897_v61 = vld [vmem:[%s5394_s13 + $0x8] sm:$0xff] }
 0xb2d   :  { %v1709_v0 = vpop.permute.xlu1 %1708  ;;  %v1731_v48 = vpop.permute.xlu0 %1730 }
 0xb2e   :  { %v1786_v3 = vsel %vm1770_vm10, %v4711_v24, %v1709_v0  ;;  %v1797_v2 = vsel %vm1770_vm10, %v4713_v51, %v1731_v48  ;;  %v1896_v0 = vld [vmem:[%s5394_s13] sm:$0xff] }
 0xb31   :  { %v1695_v59 = vpop.permute.xlu1 %1694  ;;  %v1741_v21 = vpop.permute.xlu0 %1740 }
 0xb32   :  { %v1802_v44 = vsel %vm1770_vm10, %v4721_v25, %v1741_v21  ;;  %v1779_v51 = vsel %vm1770_vm10, %v4719_v18, %v1695_v59 }
 0xb33   :  { %2988 = vmatprep.subr.mxu0 %v1802_v44 }
 0xb34   :  { %2989 = vmatpush3.msra.mxu0 %v1786_v3 }
 0xb35   :  { %v1701_v36 = vpop.permute.xlu1 %1700  ;;  %2990 = vmatprep.subr.mxu0 %v1801_v52  ;;  %v1723_v5 = vpop.permute.xlu0 %1722 }
 0xb36   :  { %2991 = vmatpush3.msra.mxu0 %v1785_v22  ;;  %v1782_v45 = vsel %vm1770_vm10, %v4727_v50, %v1701_v36  ;;  %v1795_v50 = vsel %vm1770_vm10, %v4681_v30, %v1727_v13 }
 0xb37   :  { %2992 = vmatprep.subr.mxu0 %v1800_v33 }
 0xb38   :  { %2993 = vmatpush3.msra.mxu0 %v1784_v41 }
 0xb39   :  { %v1691_v14 = vpop.permute.xlu1 %1690  ;;  %2994 = vmatprep.subr.mxu0 %v1799_v15  ;;  %v1733_v28 = vpop.permute.xlu0 %1732 }
 0xb3a   :  { %2995 = vmatpush3.msra.mxu0 %v1783_v39  ;;  %v1798_v24 = vsel %vm1770_vm10, %v4737_v7, %v1733_v28  ;;  %v1780_v7 = vsel %vm1770_vm10, %v4687_v32, %v1697_v17  ;;  %v1793_v32 = vsel %vm1770_vm10, %v4729_v53, %v1723_v5  ;;  %v1777_v30 = vsel %vm1770_vm10, %v4735_v55, %v1691_v14 }
 0xb3b   :  { %2996 = vmatprep.subr.mxu0 %v1798_v24 }
 0xb3c   :  { %2997 = vmatpush3.msra.mxu0 %v1782_v45 }
 0xb3d   :  { %v1693_v40 = vpop.permute.xlu1 %1692  ;;  %2998 = vmatprep.subr.mxu0 %v1797_v2  ;;  %v1721_v12 = vpop.permute.xlu0 %1720 }
 0xb3e   :  { %2999 = vmatpush3.msra.mxu0 %v1781_v56  ;;  %v1778_v63 = vsel %vm1770_vm10, %v4743_v62, %v1693_v40  ;;  %v1792_v34 = vsel %vm1770_vm10, %v4745_v38, %v1721_v12  ;;  %v1774_v38 = vsel %vm1770_vm10, %v4633_v49, %v4721_v25  ;;  %v1772_v49 = vsel %vm1770_vm10, %v4610_v57, %v4689_v37  ;;  %v1806_v57 = vld [vmem:[%s5392_s11 + $0x18] sm:$0xff]  ;;  %v1900_v37 = vld [vmem:[%s5394_s13 + $0x20] sm:$0xff] }
 0xb3f   :  { %3000 = vmatprep.subr.mxu0 %v1796_v9 }
 0xb40   :  { %3001 = vmatpush3.msra.mxu0 %v1780_v7 }
 0xb41   :  { %v1689_v31 = vpop.permute.xlu1 %1688  ;;  %3002 = vmatprep.subr.mxu0 %v1795_v50  ;;  %v1725_v23 = vpop.permute.xlu0 %1724 }
 0xb42   :  { %3003 = vmatpush3.msra.mxu0 %v1779_v51  ;;  %v1794_v58 = vsel %vm1770_vm10, %v4753_v54, %v1725_v23  ;;  %v1776_v54 = vsel %vm1770_vm10, %v4751_v19, %v1689_v31  ;;  %v2277_v51 = vld [vmem:[%s5395_s14 + $0xf8] sm:$0xff]  ;;  %v2276_v23 = vld [vmem:[%s5395_s14 + $0xf0] sm:$0xff] }
 0xb43   :  { %3004 = vmatprep.subr.mxu0 %v1794_v58  ;;  %v2261_v31 = vld [vmem:[%s5395_s14 + $0x78] sm:$0xff]  ;;  %3042 = vmatprep.subr.mxu1 %v2277_v51  ;;  %v2260_v58 = vld [vmem:[%s5395_s14 + $0x70] sm:$0xff] }
 0xb44   :  { %3005 = vmatpush3.msra.mxu0 %v1778_v63  ;;  %3043 = vmatpush3.msra.mxu1 %v2261_v31  ;;  %v2275_v63 = vld [vmem:[%s5395_s14 + $0xe8] sm:$0xff] }
 0xb45   :  { %v1687_v16 = vpop.permute.xlu1 %1686  ;;  %3006 = vmatprep.subr.mxu0 %v1793_v32  ;;  %v1719_v18 = vpop.permute.xlu0 %1718  ;;  %3044 = vmatprep.subr.mxu1 %v2276_v23  ;;  %v2259_v32 = vld [vmem:[%s5395_s14 + $0x68] sm:$0xff] }
 0xb46   :  { %3007 = vmatpush3.msra.mxu0 %v1777_v30  ;;  %v1791_v62 = vsel %vm1770_vm10, %v4761_v20, %v1719_v18  ;;  %v1775_v53 = vsel %vm1770_vm10, %v4759_v11, %v1687_v16  ;;  %v1773_v11 = vsel %vm1770_vm10, %v4622_v47, %v4705_v60  ;;  %v1901_v47 = vld [vmem:[%s5394_s13 + $0x28] sm:$0xf]  ;;  %v1771_v60 = vsel %vm1770_vm10, %v4602_v8, %v4673_v42  ;;  %v1807_v42 = vld [vmem:[%s5392_s11 + $0x20] sm:$0xff]  ;;  %v2273_v18 = vld [vmem:[%s5395_s14 + $0xd8] sm:$0xff] }
 0xb47   :  { %3008 = vmatprep.subr.mxu0 %v1792_v34  ;;  %v1808_v8 = vld [vmem:[%s5392_s11 + $0x28] sm:$0xff]  ;;  %3045 = vmatpush3.msra.mxu1 %v2260_v58  ;;  %v2274_v30 = vld [vmem:[%s5395_s14 + $0xe0] sm:$0xff]  ;;  %v2257_v34 = vld [vmem:[%s5395_s14 + $0x58] sm:$0xff] }
 0xb48   :  { %3009 = vmatpush3.msra.mxu0 %v1776_v54  ;;  %3046 = vmatprep.subr.mxu1 %v2275_v63  ;;  %v2258_v16 = vld [vmem:[%s5395_s14 + $0x60] sm:$0xff]  ;;  %v2272_v54 = vld [vmem:[%s5395_s14 + $0xd0] sm:$0xff] }
 0xb49   :  { %v1715_v13 = vpop.permute.xlu1 %1714  ;;  %3010 = vmatprep.subr.mxu0 %v1791_v62  ;;  %v1717_v55 = vpop.permute.xlu0 %1716  ;;  %3047 = vmatpush3.msra.mxu1 %v2259_v32  ;;  %v2256_v62 = vld [vmem:[%s5395_s14 + $0x50] sm:$0xff] }
 0xb4a   :  { %3011 = vmatpush3.msra.mxu0 %v1775_v53  ;;  %v1790_v17 = vsel %vm1770_vm10, %v4772_v6, %v1717_v55  ;;  %v1789_v19 = vsel %vm1770_vm10, %v4770_v4, %v1715_v13  ;;  %v1803_v4 = vld [vmem:[%s5392_s11] sm:$0xff]  ;;  %3048 = vmatprep.subr.mxu1 %v2274_v30  ;;  %v2271_v53 = vld [vmem:[%s5395_s14 + $0xc8] sm:$0xff] }
 0xb4b   :  { %3012 = vmatprep.subr.mxu0 %v1790_v17  ;;  %3049 = vmatpush3.msra.mxu1 %v2258_v16  ;;  %v2255_v13 = vld [vmem:[%s5395_s14 + $0x48] sm:$0xff]  ;;  %v2270_v55 = vld [vmem:[%s5395_s14 + $0xc0] sm:$0xff]  ;;  %v2132_v16 = vrot.slane %v3466_v1, 7 }
 0xb4c   :  { %3013 = vmatpush3.msra.mxu0 %v1774_v38  ;;  %3050 = vmatprep.subr.mxu1 %v2273_v18  ;;  %v2254_v17 = vld [vmem:[%s5395_s14 + $0x40] sm:$0xff] }
 0xb4d   :  { %v1711_v20 = vpop.permute.xlu1 %1710  ;;  %3014 = vmatprep.subr.mxu0 %v1789_v19  ;;  %v1713_v43 = vpop.permute.xlu0 %1712  ;;  %3051 = vmatpush3.msra.mxu1 %v2257_v34  ;;  %v2269_v19 = vld [vmem:[%s5395_s14 + $0xb8] sm:$0xff] }
 0xb4e   :  { %3015 = vmatpush3.msra.mxu0 %v1773_v11  ;;  %v1788_v6 = vsel %vm1770_vm10, %v4780_v29, %v1713_v43  ;;  %v1787_v25 = vsel %vm1770_vm10, %v4778_v10, %v1711_v20  ;;  %v1805_v10 = vld [vmem:[%s5392_s11 + $0x10] sm:$0xff]  ;;  %v1810_v29 = vld [vmem:[%s5392_s11 + $0x38] sm:$0xff]  ;;  %3052 = vmatprep.subr.mxu1 %v2272_v54 }
 0xb4f   :  { %3016 = vmatprep.subr.mxu0 %v1788_v6  ;;  %3053 = vmatpush3.msra.mxu1 %v2256_v62  ;;  %v2253_v20 = vld [vmem:[%s5395_s14 + $0x38] sm:$0xff]  ;;  %v2268_v43 = vld [vmem:[%s5395_s14 + $0xb0] sm:$0xff] }
 0xb50   :  { %3017 = vmatpush3.msra.mxu0 %v1772_v49  ;;  %3054 = vmatprep.subr.mxu1 %v2271_v53  ;;  %v2252_v6 = vld [vmem:[%s5395_s14 + $0x30] sm:$0xff] }
 0xb51   :  { %3018 = vmatprep.subr.mxu0 %v1787_v25  ;;  %3055 = vmatpush3.msra.mxu1 %v2255_v13 }
 0xb52   :  { %3019 = vmatpush3.msra.mxu0 %v1771_v60  ;;  %3056 = vmatprep.subr.mxu1 %v2270_v55 }
 0xb53   :  { %1876 = vmatmul.mubr.f32.vlgmr.msra.gmra.mxu0 %v1803_v4  ;;  %3208 = vmatprep.subr.msk.mxu0 %vm1939_vm11, %v1901_v47  ;;  %v2267_v4 = vld [vmem:[%s5395_s14 + $0xa8] sm:$0xff] }
 0xb54   :  { %1880 = vmatprep.mubr.f32.mxu0 %v1806_v57  ;;  %3209 = vmatpush3.msk.msra.mxu0 %vm1939_vm11, %v1901_v47  ;;  %v2251_v47 = vld [vmem:[%s5395_s14 + $0x28] sm:$0xff] }
 0xb55   :  { %3210 = vmatprep.subr.mxu0 %v1900_v37  ;;  %3057 = vmatpush3.msra.mxu1 %v2254_v17 }
 0xb56   :  { %3211 = vmatpush3.msra.mxu0 %v1900_v37  ;;  %3058 = vmatprep.subr.mxu1 %v2269_v19  ;;  %v2266_v37 = vld [vmem:[%s5395_s14 + $0xa0] sm:$0xff] }
 0xb57   :  { %1881 = vmatmul.mubr.f32.gmra.mxu0 %v1805_v10  ;;  %3212 = vmatprep.subr.mxu0 %v1899_v46  ;;  %v2250_v10 = vld [vmem:[%s5395_s14 + $0x20] sm:$0xff] }
 0xb58   :  { %1885 = vmatprep.mubr.f32.mxu0 %v1808_v8  ;;  %3213 = vmatpush3.msra.mxu0 %v1899_v46 }
 0xb59   :  { %3214 = vmatprep.subr.mxu0 %v1898_v35  ;;  %3059 = vmatpush3.msra.mxu1 %v2253_v20 }
 0xb5a   :  { %3215 = vmatpush3.msra.mxu0 %v1898_v35  ;;  %v1909_v14 = vpop.permute.xlu0 %1908  ;;  %v1914_v45 = vpop.permute.xlu1 %1913  ;;  %3060 = vmatprep.subr.mxu1 %v2268_v43 }
 0xb5b   :  { %1886 = vmatmul.mubr.f32.gmra.mxu0 %v1807_v42  ;;  %3216 = vmatprep.subr.mxu0 %v1897_v61 }
 0xb5c   :  { %1890 = vmatprep.mubr.f32.mxu0 %v1810_v29  ;;  %3217 = vmatpush3.msra.mxu0 %v1897_v61  ;;  %v2265_v61 = vld [vmem:[%s5395_s14 + $0x98] sm:$0xff] }
 0xb5d   :  { %3218 = vmatprep.subr.mxu0 %v1896_v0  ;;  %3061 = vmatpush3.msra.mxu1 %v2252_v6 }
 0xb5e   :  { %3219 = vmatpush3.msra.mxu0 %v1896_v0  ;;  %v1919_v40 = vpop.permute.xlu0 %1918  ;;  %v1924_v7 = vpop.permute.xlu1 %1923  ;;  %3062 = vmatprep.subr.mxu1 %v2267_v4  ;;  %v2249_v0 = vld [vmem:[%s5395_s14 + $0x18] sm:$0xff] }
 0xb5f   :  { %1891 = vmatmul.mubr.f32.gmra.mxu0 %v1809_v26  ;;  %3063 = vmatpush3.msra.mxu1 %v2251_v47 }
 0xb60   :  { %3064 = vmatprep.subr.mxu1 %v2266_v37 }
 0xb61   :  { %3065 = vmatpush3.msra.mxu1 %v2250_v10 }
 0xb62   :  { %3066 = vmatprep.subr.mxu1 %v2265_v61 }
 0xb63   :  { %3067 = vmatpush3.msra.mxu1 %v2249_v0 }
 0xc13   :  { %v3020_v48 = vpop.f32.mrf.mxu0 }
 0xc15   :  { %v3021_v59 = vpop.f32.mrf.mxu0 }
 0xc16   :  { %v3022_v21 = vadd.f32 %v3021_v59, %v3020_v48 }
 0xc17   :  { %v3023_v44 = vpop.f32.mrf.mxu0 }
 0xc18   :  { %3220 = vmatprep.mubr.msk.f32.mxu0 %vm1926_vm12, %v3022_v21  ;;  %v2264_v21 = vld [vmem:[%s5395_s14 + $0x90] sm:$0xff] }
 0xc19   :  { %v3024_v3 = vpop.f32.mrf.mxu0  ;;  %3068 = vmatprep.subr.mxu1 %v2264_v21 }
 0xc1a   :  { %v3025_v52 = vadd.f32 %v3024_v3, %v3023_v44 }
 0xc1b   :  { %v3026_v22 = vpop.f32.mrf.mxu0 }
 0xc1c   :  { %3221 = vmatmul.mubr.msk.f32.vlgmr.msra.gmra.mxu0 %vm1926_vm12, %v3025_v52 }
 0xc1d   :  { %v3027_v36 = vpop.f32.mrf.mxu0 }
 0xc1e   :  { %v3028_v5 = vadd.f32 %v3027_v36, %v3026_v22  ;;  %v2248_v36 = vld [vmem:[%s5395_s14 + $0x10] sm:$0xff] }
 0xc1f   :  { %v3029_v33 = vpop.f32.mrf.mxu0  ;;  %3069 = vmatpush3.msra.mxu1 %v2248_v36 }
 0xc20   :  { %3223 = vmatprep.mubr.msk.f32.mxu0 %vm1926_vm12, %v3028_v5  ;;  %v2263_v5 = vld [vmem:[%s5395_s14 + $0x88] sm:$0xff] }
 0xc21   :  { %v3030_v41 = vpop.f32.mrf.mxu0  ;;  %3070 = vmatprep.subr.mxu1 %v2263_v5 }
 0xc22   :  { %v3031_v15 = vadd.f32 %v3030_v41, %v3029_v33 }
 0xc24   :  { %3224 = vmatmul.mubr.msk.f32.gmra.mxu0 %vm1926_vm12, %v3031_v15  ;;  %v2120_v15 = vrot.slane %v3466_v1, 6 }
 0xcdc   :  { %v3222_v39 = vpop.f32.mrf.mxu0 }
 0xcdd   :  { %v2015_v2 = vadd.f32 %v3222_v39, %v1914_v45  ;;  %v2247_v45 = vld [vmem:[%s5395_s14 + $0x8] sm:$0xff] }
 0xcde   :  { %v2009_v28 = vpop.f32.mrf.mxu0  ;;  %3071 = vmatpush3.msra.mxu1 %v2247_v45 }
 0xcdf   :  { %v2010_v24 = vadd.f32 %v2009_v28, %v1909_v14 }
 0xce1   :  { %2028 = vxpose.xlu0.b32.start [1/4] (short) (narrow) %v2010_v24, 24 }
 0xce4   :  { %v3225_v56 = vpop.f32.mrf.mxu0 }
 0xce5   :  { %2029 = vxpose.xlu0.b32.cont [2/4] (short) (narrow) %v2015_v2, 24  ;;  %v2025_v50 = vadd.f32 %v3225_v56, %v1924_v7 }
 0xce6   :  { %v2019_v12 = vpop.f32.mrf.mxu0 }
 0xce7   :  { %v2020_v9 = vadd.f32 %v2019_v12, %v1919_v40 }
 0xce9   :  { %2030 = vxpose.xlu0.b32.cont [3/4] (short) (narrow) %v2020_v9, 24  ;;  %v2262_v9 = vld [vmem:[%s5395_s14 + $0x80] sm:$0xff] }
 0xcea   :  { %3072 = vmatprep.subr.mxu1 %v2262_v9 }
 0xced   :  { %2031 = vxpose.xlu0.b32.end [4/4] (short) (narrow) %v2025_v50, 24  ;;  %v2246_v50 = vld [vmem:[%s5395_s14] sm:$0xff]  ;;  %s3497_s14 = smov 96  }
 0xcee   :  { %3073 = vmatpush3.msra.mxu1 %v2246_v50 }
 0xcef   :  { %3226 = vmatprep.subr.mxu1 %v3466_v1 }
 0xd5d   :  { %v4955_v38 = vpop.trf.xlu0 }
 0xd5e   :  { %v2063_v11 = vrot.slane %v4955_v38, 5 }
 0xd60   :  { %v4980_v60 = vsel %vm2062_vm13, 0.0, %v2063_v11 }
 0xd61   :  { %v4970_v49 = vpop.trf.xlu0  ;;  %v2074_v46 = vrot.slane %v4980_v60, 1  ;;  %v2107_v35 = vrot.slane %v4980_v60, 5  ;;  %v2083_v33 = vrot.slane %v4980_v60, 2  ;;  %v2117_v41 = vrot.slane %v4980_v60, 6 }
 0xd62   :  { %v2064_v25 = vrot.slane %v4970_v49, 5  ;;  %v2093_v51 = vrot.slane %v4980_v60, 3  ;;  %v2129_v31 = vrot.slane %v4980_v60, 7  ;;  %v5056_v54 = vsel %vm2062_vm13, 0.0, %v4970_v49 }
 0xd63   :  { %v2157_v17 = vrot.slane %v5056_v54, 1  ;;  %v2189_v19 = vrot.slane %v5056_v54, 5  ;;  %v2198_v6 = vrot.slane %v5056_v54, 6  ;;  %v2175_v10 = vrot.slane %v5056_v54, 3 }
 0xd64   :  { %v2065_v57 = vsel %vm2062_vm13, %v2063_v11, %v2064_v25  ;;  %v2166_v11 = vrot.slane %v5056_v54, 2 }
 0xd65   :  { %v4990_v8 = vsel %vm2069_vm14, %v2065_v57, 0.0  ;;  %v4992_v42 = vpop.trf.xlu0 }
 0xd66   :  { %v2075_v29 = vrot.slane %v4990_v8, 1  ;;  %v2108_v26 = vrot.slane %v4990_v8, 5  ;;  %v5006_v48 = vsel %vm2069_vm14, %v4992_v42, 0.0  ;;  %v2084_v52 = vrot.slane %v4990_v8, 2 }
 0xd67   :  { %v2118_v22 = vrot.slane %v4990_v8, 6  ;;  %v2199_v39 = vrot.slane %v5006_v48, 6  ;;  %v2094_v28 = vrot.slane %v4990_v8, 3  ;;  %v2167_v24 = vrot.slane %v5006_v48, 2 }
 0xd68   :  { %v3326_v59 = vpack.i.bf16 %v2075_v29, %v2108_v26  ;;  %v2076_v44 = vsel %vm2073_vm15, %v2074_v46, %v2075_v29  ;;  %v2109_v3 = vsel %vm2062_vm13, %v2107_v35, %v2108_v26  ;;  %v2085_v2 = vsel %vm2069_vm14, %v2083_v33, %v2084_v52 }
 0xd69   :  { %v3331_v14 = vpack.i.bf16 %v2076_v44, %v2109_v3  ;;  %v2119_v56 = vsel %vm960_vm4, %v2117_v41, %v2118_v22  ;;  %v2130_v40 = vrot.slane %v4990_v8, 7  ;;  %v2201_v12 = vsel %vm960_vm4, %v2199_v39, %v2120_v15 }
 0xd6a   :  { %3327 = vrot.lane.b32.xlu1 %v3326_v59, %s3496_s23  ;;  %v3376_v7 = vpack.i.bf16 %v2167_v24, %v2201_v12  ;;  %v3336_v23 = vpack.i.bf16 %v2085_v2, %v2119_v56  ;;  %v2095_v58 = vsel %vm2092_vm2, %v2093_v51, %v2094_v28  ;;  %v2121_v30 = vsel %vm960_vm4, %v2118_v22, %v2120_v15 }
 0xd6b   :  { %v2131_v63 = vsel %vm2128_vm3, %v2129_v31, %v2130_v40  ;;  %v3346_v18 = vpack.i.bf16 %v2084_v52, %v2121_v30  ;;  %v2133_v34 = vsel %vm2128_vm3, %v2130_v40, %v2132_v16  ;;  %v2158_v53 = vrot.slane %v5006_v48, 1 }
 0xd6c   :  { %3377 = vrot.lane.b32.xlu0 %v3376_v7, %s5448_s8  ;;  %v3341_v32 = vpack.i.bf16 %v2095_v58, %v2131_v63  ;;  %v3351_v62 = vpack.i.bf16 %v2094_v28, %v2133_v34  ;;  %v2190_v13 = vrot.slane %v5006_v48, 5  ;;  %v2168_v4 = vsel %vm2069_vm14, %v2166_v11, %v2167_v24 }
 0xd6d   :  { %v2159_v20 = vsel %vm2073_vm15, %v2157_v17, %v2158_v53  ;;  %v2200_v47 = vsel %vm960_vm4, %v2198_v6, %v2199_v39  ;;  %v2176_v57 = vrot.slane %v5006_v48, 3  ;;  %v2209_v37 = vrot.slane %v5006_v48, 7 }
 0xd6e   :  { %3332 = vrot.lane.b32.xlu1 %v3331_v14, %s3496_s23  ;;  %v3356_v55 = vpack.i.bf16 %v2158_v53, %v2190_v13  ;;  %v2191_v43 = vsel %vm2062_vm13, %v2189_v19, %v2190_v13  ;;  %v2208_v29 = vrot.slane %v5056_v54, 7  ;;  %v3366_v26 = vpack.i.bf16 %v2168_v4, %v2200_v47 }
 0xd6f   :  { %v3361_v25 = vpack.i.bf16 %v2159_v20, %v2191_v43  ;;  %v2177_v46 = vsel %vm2092_vm2, %v2175_v10, %v2176_v57  ;;  %v2211_v0 = vsel %vm2128_vm3, %v2209_v37, %v2132_v16  ;;  %v2103_v3 = vrot.slane %v4990_v8, 4 }
 0xd70   :  { %v2210_v35 = vsel %vm2128_vm3, %v2208_v29, %v2209_v37  ;;  %v3381_v59 = vpack.i.bf16 %v2176_v57, %v2211_v0  ;;  %v2102_v41 = vrot.slane %v4980_v60, 4  ;;  %v2184_v58 = vrot.slane %v5056_v54, 4 }
 0xd71   :  { %v3371_v61 = vpack.i.bf16 %v2177_v46, %v2210_v35 }
 0xd72   :  { %3337 = vrot.lane.b32.xlu1 %v3336_v23, %s5448_s8  ;;  %v2104_v39 = vsel %vm1939_vm11, %v2102_v41, %v2103_v3 }
 0xd76   :  { %3342 = vrot.lane.b32.xlu1 %v3341_v32, %s3497_s14 }
 0xd7a   :  { %3347 = vrot.lane.b32.xlu1 %v3346_v18, %s5448_s8 }
 0xd7e   :  { %3352 = vrot.lane.b32.xlu1 %v3351_v62, %s3497_s14 }
 0xd82   :  { %3357 = vrot.lane.b32.xlu1 %v3356_v55, %s3496_s23 }
 0xd86   :  { %3362 = vrot.lane.b32.xlu1 %v3361_v25, %s3496_s23 }
 0xd8a   :  { %3367 = vrot.lane.b32.xlu1 %v3366_v26, %s5448_s8 }
 0xd8e   :  { %3372 = vrot.lane.b32.xlu1 %v3371_v61, %s3497_s14 }
 0xd92   :  { %3382 = vrot.lane.b32.xlu1 %v3381_v59, %s3497_s14 }
 0xddc   :  { %v3328_v21 = vpop.permute.xlu1 %3327 }
 0xddd   :  { %v3330_v31 = vunpack.i.h.bf16 %v3328_v21  ;;  %v3329_v23 = vunpack.i.l.bf16 %v3328_v21 }
 0xdde   :  { %v3378_v13 = vpop.permute.xlu0 %3377 }
 0xddf   :  { %v2141_v62 = vsel %vm1069_vm7, %v4990_v8, %v3330_v31  ;;  %v2148_v53 = vsel %vm1069_vm7, %v2103_v3, %v3329_v23  ;;  %v3380_v37 = vunpack.i.h.bf16 %v3378_v13  ;;  %v3379_v10 = vunpack.i.l.bf16 %v3378_v13 }
 0xde0   :  { %v3333_v44 = vpop.permute.xlu1 %3332 }
 0xde1   :  { %v3335_v22 = vunpack.i.h.bf16 %v3333_v44  ;;  %v3334_v36 = vunpack.i.l.bf16 %v3333_v44 }
 0xde3   :  { %v2140_v14 = vsel %vm1069_vm7, %v4980_v60, %v3335_v22  ;;  %v2147_v45 = vsel %vm1069_vm7, %v2104_v39, %v3334_v36  ;;  %v2185_v60 = vrot.slane %v5006_v48, 4 }
 0xde4   :  { %v3338_v52 = vpop.permute.xlu1 %3337 }
 0xde5   :  { %v3340_v5 = vunpack.i.h.bf16 %v3338_v52  ;;  %v3339_v33 = vunpack.i.l.bf16 %v3338_v52  ;;  %v2186_v16 = vsel %vm1939_vm11, %v2184_v58, %v2185_v60 }
 0xde7   :  { %v2142_v2 = vsel %vm183_vm1, %v2140_v14, %v3340_v5  ;;  %v2149_v56 = vsel %vm183_vm1, %v2147_v45, %v3339_v33 }
 0xde8   :  { %v3343_v15 = vpop.permute.xlu1 %3342 }
 0xde9   :  { %v3345_v28 = vunpack.i.h.bf16 %v3343_v15  ;;  %v3344_v24 = vunpack.i.l.bf16 %v3343_v15 }
 0xdeb   :  { %v2151_v40 = vsel %vm2144_vm5, %v2149_v56, %v3344_v24  ;;  %v2145_v12 = vsel %vm2144_vm5, %v2142_v2, %v3345_v28  ;;  %v2539_v2 = vld [vmem:[%s5398_s17 + $0xf8] sm:$0xff] }
 0xdec   :  { %v3348_v9 = vpop.permute.xlu1 %3347  ;;  %2342 = vmatprep.mubr.f32.mxu1 %v2151_v40  ;;  %v2523_v56 = vld [vmem:[%s5398_s17 + $0x78] sm:$0xff]  ;;  %v2538_v40 = vld [vmem:[%s5398_s17 + $0xf0] sm:$0xff]  ;;  %3083 = vmatprep.subr.mxu0 %v2539_v2 }
 0xded   :  { %2343 = vmatmul.mubr.f32.vlgmr.msra.gmra.mxu1 %v2145_v12  ;;  %v3350_v19 = vunpack.i.h.bf16 %v3348_v9  ;;  %v3349_v20 = vunpack.i.l.bf16 %v3348_v9  ;;  %v2522_v12 = vld [vmem:[%s5398_s17 + $0x70] sm:$0xff]  ;;  %3084 = vmatpush3.msra.mxu0 %v2523_v56  ;;  %v2537_v9 = vld [vmem:[%s5398_s17 + $0xe8] sm:$0xff]  ;;  %v2535_v2 = vld [vmem:[%s5398_s17 + $0xd8] sm:$0xff] }
 0xdee   :  { %3085 = vmatprep.subr.mxu0 %v2538_v40  ;;  %v2519_v56 = vld [vmem:[%s5398_s17 + $0x58] sm:$0xff] }
 0xdef   :  { %v2150_v0 = vsel %vm183_vm1, %v2148_v53, %v3349_v20  ;;  %v2143_v21 = vsel %vm183_vm1, %v2141_v62, %v3350_v19  ;;  %3086 = vmatpush3.msra.mxu0 %v2522_v12 }
 0xdf0   :  { %v3353_v7 = vpop.permute.xlu1 %3352  ;;  %3087 = vmatprep.subr.mxu0 %v2537_v9 }
 0xdf1   :  { %v3355_v43 = vunpack.i.h.bf16 %v3353_v7  ;;  %v3354_v11 = vunpack.i.l.bf16 %v3353_v7  ;;  %v2521_v7 = vld [vmem:[%s5398_s17 + $0x68] sm:$0xff] }
 0xdf2   :  { %3088 = vmatpush3.msra.mxu0 %v2521_v7 }
 0xdf3   :  { %v2152_v22 = vsel %vm2144_vm5, %v2150_v0, %v3354_v11  ;;  %v2146_v36 = vsel %vm2144_vm5, %v2143_v21, %v3355_v43 }
 0xdf4   :  { %v3358_v50 = vpop.permute.xlu1 %3357 }
 0xdf5   :  { %v3360_v55 = vunpack.i.h.bf16 %v3358_v50  ;;  %v3359_v17 = vunpack.i.l.bf16 %v3358_v50  ;;  %v2536_v50 = vld [vmem:[%s5398_s17 + $0xe0] sm:$0xff] }
 0xdf6   :  { %3089 = vmatprep.subr.mxu0 %v2536_v50 }
 0xdf7   :  { %v2219_v26 = vsel %vm1069_vm7, %v5006_v48, %v3360_v55  ;;  %v2225_v46 = vsel %vm1069_vm7, %v2185_v60, %v3359_v17 }
 0xdf8   :  { %v3363_v51 = vpop.permute.xlu1 %3362  ;;  %v2221_v48 = vsel %vm183_vm1, %v2219_v26, %v3380_v37  ;;  %v2227_v5 = vsel %vm183_vm1, %v2225_v46, %v3379_v10 }
 0xdf9   :  { %v3365_v32 = vunpack.i.h.bf16 %v3363_v51  ;;  %v3364_v30 = vunpack.i.l.bf16 %v3363_v51 }
 0xdfb   :  { %v2218_v25 = vsel %vm1069_vm7, %v5056_v54, %v3365_v32  ;;  %v2224_v4 = vsel %vm1069_vm7, %v2186_v16, %v3364_v30 }
 0xdfc   :  { %v3368_v63 = vpop.permute.xlu1 %3367 }
 0xdfd   :  { %v3370_v18 = vunpack.i.h.bf16 %v3368_v63  ;;  %v3369_v34 = vunpack.i.l.bf16 %v3368_v63 }
 0xdff   :  { %v2220_v8 = vsel %vm183_vm1, %v2218_v25, %v3370_v18  ;;  %v2226_v29 = vsel %vm183_vm1, %v2224_v4, %v3369_v34 }
 0xe00   :  { %v3373_v6 = vpop.permute.xlu1 %3372 }
 0xe01   :  { %v3375_v47 = vunpack.i.h.bf16 %v3373_v6  ;;  %v3374_v57 = vunpack.i.l.bf16 %v3373_v6 }
 0xe03   :  { %v2222_v35 = vsel %vm2144_vm5, %v2220_v8, %v3375_v47  ;;  %v2228_v61 = vsel %vm2144_vm5, %v2226_v29, %v3374_v57 }
 0xe04   :  { %v3383_v54 = vpop.permute.xlu1 %3382  ;;  %v2235_v59 = vrot.slane %v2228_v61, 5  ;;  %v2234_v44 = vrot.slane %v2222_v35, 5 }
 0xe05   :  { %v3385_v3 = vunpack.i.h.bf16 %v3383_v54  ;;  %v3384_v52 = vunpack.i.l.bf16 %v3383_v54 }
 0xe06   :  { %v2245_v33 = vsel %vm2062_vm13, %v2152_v22, %v2235_v59  ;;  %v2244_v41 = vsel %vm2062_vm13, %v2146_v36, %v2234_v44  ;;  %v2390_v22 = vld [vmem:[%s5396_s15] sm:$0x1] }
 0xe07   :  { %v2223_v15 = vsel %vm2144_vm5, %v2221_v48, %v3385_v3  ;;  %v2229_v39 = vsel %vm2144_vm5, %v2227_v5, %v3384_v52  ;;  %2347 = vmatprep.mubr.f32.mxu1 %v2245_v33  ;;  %v2394_v5 = vld [vmem:[%s5397_s16] sm:$0x1] }
 0xe08   :  { %2348 = vmatmul.mubr.f32.gmra.mxu1 %v2244_v41  ;;  %v2238_v14 = vrot.slane %v2229_v39, 5  ;;  %v2236_v28 = vrot.slane %v2223_v15, 5 }
 0xe0a   :  { %v2239_v24 = vsel %vm2062_vm13, %v2235_v59, %v2238_v14  ;;  %v2237_v45 = vsel %vm2062_vm13, %v2234_v44, %v2236_v28 }
 0xe0b   :  { %2352 = vmatprep.mubr.f32.mxu1 %v2239_v24 }
 0xe0c   :  { %2353 = vmatmul.mubr.f32.gmra.mxu1 %v2237_v45  ;;  %v2520_v45 = vld [vmem:[%s5398_s17 + $0x60] sm:$0xff] }
 0xe0d   :  { %3228 = vmatprep.mubr.msk.f32.mxu1 %vm3467_vm0, %v3466_v1  ;;  %3090 = vmatpush3.msra.mxu0 %v2520_v45 }
 0xe0e   :  { %3091 = vmatprep.subr.mxu0 %v2535_v2 }
 0xe0f   :  { %3092 = vmatpush3.msra.mxu0 %v2519_v56 }
 0xead   :  { %v3074_v51 = vpop.f32.mrf.mxu1 }
 0xeaf   :  { %v3075_v60 = vpop.f32.mrf.mxu1 }
 0xeb0   :  { %v3076_v23 = vadd.f32 %v3075_v60, %v3074_v51  ;;  %v2518_v60 = vld [vmem:[%s5398_s17 + $0x50] sm:$0xff] }
 0xeb2   :  { %v2370_v30 = vmul.f32 %v3076_v23, %v3076_v23  ;;  %v2358_v62 = vsel %vm1069_vm7, %v3076_v23, 0.0 }
 0xeb4   :  { %v2373_v17 = vsel %vm1069_vm7, %v2370_v30, 0.0 }
 0xec8   :  { %v3077_v31 = vpop.f32.mrf.mxu1 }
 0xeca   :  { %v3078_v58 = vpop.f32.mrf.mxu1 }
 0xecb   :  { %v3079_v63 = vadd.f32 %v3078_v58, %v3077_v31  ;;  %v2533_v31 = vld [vmem:[%s5398_s17 + $0xc8] sm:$0xff] }
 0xecc   :  { %v3080_v32 = vpop.f32.mrf.mxu1 }
 0xecd   :  { %v2359_v16 = vsel %vm1069_vm7, %v3079_v63, 0.0  ;;  %v2371_v18 = vmul.f32 %v3079_v63, %v3079_v63 }
 0xece   :  { %v3081_v34 = vpop.f32.mrf.mxu1  ;;  %v2360_v55 = vadd.f32 %v2359_v16, %v2358_v62 }
 0xecf   :  { %v2374_v53 = vsel %vm1069_vm7, %v2371_v18, 0.0  ;;  %v3082_v13 = vadd.f32 %v3081_v34, %v3080_v32  ;;  %v2532_v32 = vld [vmem:[%s5398_s17 + $0xc0] sm:$0xff] }
 0xed0   :  { %v2375_v43 = vadd.f32 %v2374_v53, %v2373_v17 }
 0xed1   :  { %v2362_v19 = vsel %vm2361_vm6, %v3082_v13, 0.0  ;;  %v2372_v20 = vmul.f32 %v3082_v13, %v3082_v13 }
 0xed2   :  { %v2363_v11 = vadd.f32 %v2362_v19, %v2360_v55  ;;  %v2530_v55 = vld [vmem:[%s5398_s17 + $0xb0] sm:$0xff] }
 0xed3   :  { %v2376_v6 = vsel %vm2361_vm6, %v2372_v20, 0.0 }
 0xed4   :  { %v2364_v25 = vrot.slane %v2363_v11, 4  ;;  %v2377_v4 = vadd.f32 %v2376_v6, %v2375_v43  ;;  %v2514_v6 = vld [vmem:[%s5398_s17 + $0x30] sm:$0xff] }
 0xed6   :  { %v2365_v47 = vadd.f32 %v2364_v25, %v2363_v11  ;;  %v2378_v57 = vrot.slane %v2377_v4, 4  ;;  %v2529_v25 = vld [vmem:[%s5398_s17 + $0xa8] sm:$0xff] }
 0xed8   :  { %v2366_v37 = vrot.slane %v2365_v47, 2  ;;  %v2379_v10 = vadd.f32 %v2378_v57, %v2377_v4  ;;  %v2513_v4 = vld [vmem:[%s5398_s17 + $0x28] sm:$0xff] }
 0xeda   :  { %v2367_v8 = vadd.f32 %v2366_v37, %v2365_v47  ;;  %v2380_v29 = vrot.slane %v2379_v10, 2 }
 0xedc   :  { %v2368_v26 = vrot.slane %v2367_v8, 1  ;;  %v2381_v46 = vadd.f32 %v2380_v29, %v2379_v10  ;;  %v2528_v10 = vld [vmem:[%s5398_s17 + $0xa0] sm:$0xff]  ;;  %v2527_v29 = vld [vmem:[%s5398_s17 + $0x98] sm:$0xff] }
 0xede   :  { %v2369_v35 = vadd.f32 %v2368_v26, %v2367_v8  ;;  %v2382_v61 = vrot.slane %v2381_v46, 1  ;;  %v2512_v8 = vld [vmem:[%s5398_s17 + $0x20] sm:$0xff] }
 0xee0   :  { %v2383_v54 = vadd.f32 %v2382_v61, %v2381_v46  ;;  %v2385_v0 = vmul.f32 0.045454547, %v2369_v35  ;;  %v2511_v35 = vld [vmem:[%s5398_s17 + $0x18] sm:$0xff] }
 0xee2   :  { %v2386_v59 = vmul.f32 0.045454547, %v2383_v54  ;;  %v2387_v21 = vmul.f32 %v2385_v0, %v2385_v0 }
 0xee4   :  { %v2388_v44 = vsub.f32 %v2386_v59, %v2387_v21  ;;  %v2526_v59 = vld [vmem:[%s5398_s17 + $0x90] sm:$0xff] }
 0xee5   :  { %v2510_v21 = vld [vmem:[%s5398_s17 + $0x10] sm:$0xff] }
 0xee6   :  { %v2389_v3 = vmax.f32 %v2388_v44, 0.0  ;;  %v2525_v44 = vld [vmem:[%s5398_s17 + $0x88] sm:$0xff] }
 0xee8   :  { %v2391_v52 = vadd.f32 1e-05, %v2389_v3 }
 0xeea   :  { %3442 = vrsqrt.f32 %v2391_v52 }
 0xef7   :  { %v3443_v36 = vpop.eup %3442 }
 0xef8   :  { %v2393_v48 = vmul.f32 %v3443_v36, %v2390_v22  ;;  %v2509_v22 = vld [vmem:[%s5398_s17 + $0x8] sm:$0xff] }
 0xefa   :  { %v2395_v33 = vmul.f32 %v2393_v48, %v2385_v0  ;;  %v2401_v41 = vrot.slane %v2393_v48, %v3812_v27 }
 0xefc   :  { %v2396_v15 = vsub.f32 %v2394_v5, %v2395_v33  ;;  %v2403_v39 = vmul.f32 %v3076_v23, %v2401_v41  ;;  %v2404_v14 = vmul.f32 %v3079_v63, %v2401_v41  ;;  %v2405_v28 = vmul.f32 %v3082_v13, %v2401_v41  ;;  %v2517_v23 = vld [vmem:[%s5398_s17 + $0x48] sm:$0xff]  ;;  %v2515_v13 = vld [vmem:[%s5398_s17 + $0x38] sm:$0xff]  ;;  %v2524_v33 = vld [vmem:[%s5398_s17 + $0x80] sm:$0xff] }
 0xefd   :  { %v2508_v41 = vld [vmem:[%s5398_s17] sm:$0xff] }
 0xefe   :  { %v2410_v24 = vrot.slane %v2396_v15, %v3812_v27  ;;  %v2534_v27 = vld [vmem:[%s5398_s17 + $0xd0] sm:$0xff] }
 0xeff   :  { %3093 = vmatprep.subr.mxu0 %v2534_v27 }
 0xf00   :  { %v2412_v40 = vadd.f32 %v2410_v24, %v2403_v39  ;;  %v2413_v12 = vadd.f32 %v2410_v24, %v2404_v14  ;;  %v2414_v9 = vadd.f32 %v2410_v24, %v2405_v28  ;;  %3094 = vmatpush3.msra.mxu0 %v2518_v60 }
 0xf01   :  { %3095 = vmatprep.subr.mxu0 %v2533_v31 }
 0xf02   :  { %v2415_v7 = vmax.f32 %v2412_v40, 0.0  ;;  %v2416_v50 = vmax.f32 %v2413_v12, 0.0  ;;  %v2417_v51 = vmax.f32 %v2414_v9, 0.0  ;;  %3096 = vmatpush3.msra.mxu0 %v2517_v23 }
 0xf03   :  { %3097 = vmatprep.subr.mxu0 %v2532_v32 }
 0xf04   :  { %v5176_v58 = vadd.f32 %v2416_v50, %v4970_v49  ;;  %v5179_v63 = vadd.f32 %v2417_v51, %v4992_v42  ;;  %v5185_v30 = vadd.f32 %v2415_v7, %v4955_v38  ;;  %v2516_v42 = vld [vmem:[%s5398_s17 + $0x40] sm:$0xff]  ;;  %v2531_v38 = vld [vmem:[%s5398_s17 + $0xb8] sm:$0xff] }
 0xf05   :  { %3098 = vmatpush3.msra.mxu0 %v2516_v42 }
 0xf06   :  { %v2461_v16 = vrot.slane %v5176_v58, 1  ;;  %v2482_v18 = vrot.slane %v5179_v63, 5  ;;  %v2466_v34 = vrot.slane %v5176_v58, 2  ;;  %v2467_v49 = vrot.slane %v5179_v63, 2  ;;  %3099 = vmatprep.subr.mxu0 %v2531_v38 }
 0xf07   :  { %v2486_v53 = vrot.slane %v5179_v63, 6  ;;  %v2437_v19 = vrot.slane %v5185_v30, 5  ;;  %v2438_v20 = vrot.slane %v5176_v58, 5  ;;  %3100 = vmatpush3.msra.mxu0 %v2515_v13  ;;  %v2422_v11 = vrot.slane %v5185_v30, 1 }
 0xf08   :  { %v3386_v62 = vpack.i.bf16 %v2461_v16, %v2482_v18  ;;  %v2468_v17 = vsel %vm2069_vm14, %v2466_v34, %v2467_v49  ;;  %3101 = vmatprep.subr.mxu0 %v2530_v55  ;;  %v2472_v57 = vrot.slane %v5176_v58, 3  ;;  %v2473_v37 = vrot.slane %v5179_v63, 3 }
 0xf09   :  { %v3391_v43 = vpack.i.bf16 %v2468_v17, %v2486_v53  ;;  %v2439_v47 = vsel %vm2062_vm13, %v2437_v19, %v2438_v20  ;;  %3102 = vmatpush3.msra.mxu0 %v2514_v6  ;;  %v2490_v46 = vrot.slane %v5179_v63, 7  ;;  %v2443_v54 = vrot.slane %v5185_v30, 6 }
 0xf0a   :  { %3387 = vrot.lane.b32.xlu1 %v3386_v62, %s3496_s23  ;;  %3103 = vmatprep.subr.mxu0 %v2529_v25  ;;  %v3396_v26 = vpack.i.bf16 %v2422_v11, %v2439_v47  ;;  %v2474_v61 = vsel %vm2092_vm2, %v2472_v57, %v2473_v37  ;;  %v2444_v0 = vrot.slane %v5176_v58, 6  ;;  %v2426_v52 = vrot.slane %v5185_v30, 2 }
 0xf0b   :  { %3104 = vmatpush3.msra.mxu0 %v2513_v4  ;;  %v3401_v3 = vpack.i.bf16 %v2474_v61, %v2490_v46  ;;  %v2449_v48 = vrot.slane %v5185_v30, 7  ;;  %v2450_v5 = vrot.slane %v5176_v58, 7  ;;  %v2430_v39 = vrot.slane %v5185_v30, 3  ;;  %v2751_v46 = vld [vmem:[%s5401_s20 + $0x70] sm:$0xff]  ;;  %v2749_v61 = vld [vmem:[%s5401_s20 + $0x60] sm:$0xff] }
 0xf0c   :  { %3105 = vmatprep.subr.mxu0 %v2528_v10  ;;  %v2445_v36 = vsel %vm960_vm4, %v2443_v54, %v2444_v0  ;;  %v2478_v56 = vrot.slane %v5176_v58, 4  ;;  %v2479_v40 = vrot.slane %v5179_v63, 4  ;;  %v2434_v62 = vrot.slane %v5185_v30, 4  ;;  %v2748_v54 = vld [vmem:[%s5401_s20 + $0x58] sm:$0xff]  ;;  %v2747_v0 = vld [vmem:[%s5401_s20 + $0x50] sm:$0xff] }
 0xf0d   :  { %3106 = vmatpush3.msra.mxu0 %v2512_v8  ;;  %v3406_v15 = vpack.i.bf16 %v2426_v52, %v2445_v36  ;;  %v2451_v14 = vsel %vm2128_vm3, %v2449_v48, %v2450_v5  ;;  %v2743_v52 = vld [vmem:[%s5401_s20 + $0x30] sm:$0xff] }
 0xf0e   :  { %3392 = vrot.lane.b32.xlu1 %v3391_v43, %s5448_s8  ;;  %3107 = vmatprep.subr.mxu0 %v2527_v29  ;;  %v3411_v28 = vpack.i.bf16 %v2430_v39, %v2451_v14  ;;  %v2480_v31 = vsel %vm1939_vm11, %v2478_v56, %v2479_v40  ;;  %v2610_v29 = vld [vmem:[%s5400_s19] sm:$0xf]  ;;  %v2739_v40 = vld [vmem:[%s5401_s20 + $0x10] sm:$0xff] }
 0xf0f   :  { %3108 = vmatpush3.msra.mxu0 %v2511_v35  ;;  %v2750_v35 = vld [vmem:[%s5401_s20 + $0x68] sm:$0xff] }
 0xf10   :  { %3109 = vmatprep.subr.mxu0 %v2526_v59  ;;  %v2746_v59 = vld [vmem:[%s5401_s20 + $0x48] sm:$0xff] }
 0xf11   :  { %3110 = vmatpush3.msra.mxu0 %v2510_v21  ;;  %v2745_v21 = vld [vmem:[%s5401_s20 + $0x40] sm:$0xff] }
 0xf12   :  { %3397 = vrot.lane.b32.xlu1 %v3396_v26, %s3496_s23  ;;  %3111 = vmatprep.subr.mxu0 %v2525_v44  ;;  %v2752_v26 = vld [vmem:[%s5401_s20 + $0x78] sm:$0xff] }
 0xf13   :  { %3112 = vmatpush3.msra.mxu0 %v2509_v22  ;;  %v2744_v44 = vld [vmem:[%s5401_s20 + $0x38] sm:$0xff]  ;;  %v2742_v22 = vld [vmem:[%s5401_s20 + $0x28] sm:$0xff] }
 0xf14   :  { %3113 = vmatprep.subr.mxu0 %v2524_v33  ;;  %v2741_v33 = vld [vmem:[%s5401_s20 + $0x20] sm:$0xff] }
 0xf15   :  { %3114 = vmatpush3.msra.mxu0 %v2508_v41  ;;  %v2740_v41 = vld [vmem:[%s5401_s20 + $0x18] sm:$0xff] }
 0xf16   :  { %3402 = vrot.lane.b32.xlu1 %v3401_v3, %s3497_s14  ;;  %v2861_v3 = vld [vmem:[%s5399_s18] ss:$0 sm:$0xff] }
 0xf1a   :  { %3407 = vrot.lane.b32.xlu1 %v3406_v15, %s5448_s8 }
 0xf1e   :  { %3412 = vrot.lane.b32.xlu1 %v3411_v28, %s3497_s14 }
 0xf7c   :  { %v3388_v24 = vpop.permute.xlu1 %3387 }
 0xf7d   :  { %v3390_v9 = vunpack.i.h.bf16 %v3388_v24  ;;  %v3389_v27 = vunpack.i.l.bf16 %v3388_v24 }
 0xf7f   :  { %v2494_v32 = vsel %vm1069_vm7, %v5176_v58, %v3390_v9  ;;  %v2497_v16 = vsel %vm1069_vm7, %v2480_v31, %v3389_v27 }
 0xf80   :  { %v3393_v45 = vpop.permute.xlu1 %3392 }
 0xf81   :  { %v3395_v7 = vunpack.i.h.bf16 %v3393_v45  ;;  %v3394_v50 = vunpack.i.l.bf16 %v3393_v45 }
 0xf83   :  { %v2495_v49 = vsel %vm183_vm1, %v2494_v32, %v3395_v7  ;;  %v2498_v63 = vsel %vm183_vm1, %v2497_v16, %v3394_v50  ;;  %v2737_v50 = vld [vmem:[%s5401_s20] sm:$0xff] }
 0xf84   :  { %v3398_v2 = vpop.permute.xlu1 %3397 }
 0xf85   :  { %v3400_v18 = vunpack.i.h.bf16 %v3398_v2  ;;  %v3399_v34 = vunpack.i.l.bf16 %v3398_v2 }
 0xf87   :  { %v2455_v58 = vsel %vm1069_vm7, %v5185_v30, %v3400_v18  ;;  %v2458_v17 = vsel %vm1069_vm7, %v2434_v62, %v3399_v34 }
 0xf88   :  { %v3403_v12 = vpop.permute.xlu1 %3402 }
 0xf89   :  { %v3405_v51 = vunpack.i.h.bf16 %v3403_v12  ;;  %v3404_v60 = vunpack.i.l.bf16 %v3403_v12  ;;  %v2738_v12 = vld [vmem:[%s5401_s20 + $0x8] sm:$0xff] }
 0xf8b   :  { %v2496_v53 = vsel %vm2144_vm5, %v2495_v49, %v3405_v51  ;;  %v2499_v13 = vsel %vm2144_vm5, %v2498_v63, %v3404_v60 }
 0xf8c   :  { %v3408_v23 = vpop.permute.xlu1 %3407  ;;  %v2502_v43 = vrot.slane %v2496_v53, 7  ;;  %v2503_v25 = vrot.slane %v2499_v13, 7 }
 0xf8d   :  { %v3410_v42 = vunpack.i.h.bf16 %v3408_v23  ;;  %v3409_v38 = vunpack.i.l.bf16 %v3408_v23 }
 0xf8f   :  { %v2456_v11 = vsel %vm183_vm1, %v2455_v58, %v3410_v42  ;;  %v2459_v6 = vsel %vm183_vm1, %v2458_v17, %v3409_v38 }
 0xf90   :  { %v3413_v55 = vpop.permute.xlu1 %3412 }
 0xf91   :  { %v3415_v19 = vunpack.i.h.bf16 %v3413_v55  ;;  %v3414_v20 = vunpack.i.l.bf16 %v3413_v55 }
 0xf93   :  { %v2457_v4 = vsel %vm2144_vm5, %v2456_v11, %v3415_v19  ;;  %v2460_v47 = vsel %vm2144_vm5, %v2459_v6, %v3414_v20  ;;  %v2863_v19 = vld [vmem:[%s5402_s21] ss:$0 sm:$0xff] }
 0xf94   :  { %v2507_v57 = vsel %vm1939_vm11, %v2460_v47, %v2503_v25  ;;  %v2506_v37 = vsel %vm1939_vm11, %v2457_v4, %v2502_v43 }
 0xf95   :  { %2604 = vmatprep.mubr.f32.mxu0 %v2507_v57 }
 0xf96   :  { %2605 = vmatmul.mubr.f32.vlgmr.msra.gmra.mxu0 %v2506_v37 }
0x1056   :  { %v3115_v30 = vpop.f32.mrf.mxu0 }
0x1058   :  { %v3116_v10 = vpop.f32.mrf.mxu0 }
0x1059   :  { %v3117_v8 = vadd.f32 %v3116_v10, %v3115_v30 }
0x105b   :  { %3227 = vmatpush3.msra.mxu1 %v3117_v8 }
0x105c   :  { %3229 = vmatmul.mubr.msk.f32.vlgmr.msra.gmra.mxu1 %vm2618_vm8, %v2610_v29  ;;  %3231 = vmatprep.subr.mxu1 %v3466_v1 }
0x105d   :  { %3263 = vmatprep.mubr.msk.f32.mxu1 %vm3467_vm0, %v3466_v1  ;;  %3232 = vmatpush3.msra.mxu1 %v2752_v26  ;;  %vm2830_vm0 = vcmask 517120  }
0x105e   :  { %3233 = vmatprep.subr.mxu1 %v3466_v1 }
0x105f   :  { %3234 = vmatpush3.msra.mxu1 %v2751_v46 }
0x1060   :  { %3235 = vmatprep.subr.mxu1 %v3466_v1 }
0x1061   :  { %3236 = vmatpush3.msra.mxu1 %v2750_v35 }
0x1062   :  { %3237 = vmatprep.subr.mxu1 %v3466_v1 }
0x1063   :  { %3238 = vmatpush3.msra.mxu1 %v2749_v61 }
0x1064   :  { %3239 = vmatprep.subr.mxu1 %v3466_v1 }
0x1065   :  { %3240 = vmatpush3.msra.mxu1 %v2748_v54 }
0x1066   :  { %3241 = vmatprep.subr.mxu1 %v3466_v1 }
0x1067   :  { %3242 = vmatpush3.msra.mxu1 %v2747_v0 }
0x1068   :  { %3243 = vmatprep.subr.mxu1 %v3466_v1 }
0x1069   :  { %3244 = vmatpush3.msra.mxu1 %v2746_v59 }
0x106a   :  { %3245 = vmatprep.subr.mxu1 %v3466_v1 }
0x106b   :  { %3246 = vmatpush3.msra.mxu1 %v2745_v21 }
0x106c   :  { %3247 = vmatprep.subr.mxu1 %v3466_v1 }
0x106d   :  { %3248 = vmatpush3.msra.mxu1 %v2744_v44 }
0x106e   :  { %3249 = vmatprep.subr.mxu1 %v3466_v1 }
0x106f   :  { %3250 = vmatpush3.msra.mxu1 %v2743_v52 }
0x1070   :  { %3251 = vmatprep.subr.mxu1 %v3466_v1 }
0x1071   :  { %3252 = vmatpush3.msra.mxu1 %v2742_v22 }
0x1072   :  { %3253 = vmatprep.subr.mxu1 %v3466_v1 }
0x1073   :  { %3254 = vmatpush3.msra.mxu1 %v2741_v33 }
0x1074   :  { %3255 = vmatprep.subr.mxu1 %v3466_v1 }
0x1075   :  { %3256 = vmatpush3.msra.mxu1 %v2740_v41 }
0x1076   :  { %3257 = vmatprep.subr.mxu1 %v3466_v1 }
0x1077   :  { %3258 = vmatpush3.msra.mxu1 %v2739_v40 }
0x1078   :  { %3259 = vmatprep.subr.mxu1 %v3466_v1 }
0x1079   :  { %3260 = vmatpush3.msra.mxu1 %v2738_v12 }
0x107a   :  { %3261 = vmatprep.subr.mxu1 %v3466_v1 }
0x107b   :  { %3262 = vmatpush3.msra.mxu1 %v2737_v50 }
0x111c   :  { %v2688_v36 = vpop.f32.mrf.mxu1 }
0x111d   :  { %v2689_v48 = vadd.f32 %v2861_v3, %v2688_v36 }
0x111e   :  { %v3230_v5 = vpop.f32.mrf.mxu1 }
0x111f   :  { %v2693_v15 = vrot.slane %v2689_v48, 7  ;;  %v2713_v39 = vrot.slane %v2689_v48, 1 }
0x1121   :  { %v2695_v14 = vsel %vm2128_vm3, 0.0, %v2693_v15  ;;  %v2715_v28 = vsel %vm2128_vm3, 0.0, %v2713_v39 }
0x1122   :  { %v2696_v24 = vsel %vm2062_vm13, %v2695_v14, 0.0  ;;  %v2716_v45 = vsel %vm2062_vm13, %v2715_v28, 0.0 }
0x1123   :  { %v2698_v2 = vrot.slane %v2696_v24, 1  ;;  %v2718_v56 = vrot.slane %v2716_v45, 1  ;;  %v2702_v27 = vrot.slane %v2696_v24, 2  ;;  %v2722_v7 = vrot.slane %v2716_v45, 2 }
0x1124   :  { %v2726_v60 = vrot.slane %v2716_v45, 3  ;;  %v2706_v31 = vrot.slane %v2696_v24, 3 }
0x1125   :  { %v3416_v9 = vpack.i.bf16 %v2698_v2, %v2718_v56  ;;  %v3421_v51 = vpack.i.bf16 %v2702_v27, %v2722_v7 }
0x1127   :  { %3417 = vrot.lane.b32.xlu1 %v3416_v9, %s3496_s23 }
0x112b   :  { %3422 = vrot.lane.b32.xlu1 %v3421_v51, %s5448_s8 }
0x112f   :  { %2727 = vrot.lane.b32.xlu1 %v2726_v60, %s3497_s14 }
0x1133   :  { %2707 = vrot.lane.b32.xlu1 %v2706_v31, %s3497_s14  ;;  %s3498_s14 = smov [#allocation2]  }
0x1134   :  { %s2840_s4 = sshll.u32 %s3498_s14, 4  ;;  %s2841_s4 = int_to_ptr.vmem [resolvable:$true] %s2840_s4 }
0x1135   :  { %s3444_s24 = scalar_lea.vmem %s2841_s4, 64  ;;  %p3449_p1 = scmp.lt.s32.totalorder %s2841_s4, %s2841_s4 }
0x1136   :  { %p3445_p0 = scmp.ne.s32.totalorder %s2841_s4, %s3444_s24  ;;  %p3450_p2 = scmp.lt.s32.totalorder %s3444_s24, %s3444_s24 }
0x1138   :  { %p3451_p3 = por %p3450_p2, %p3449_p1 }
0x113a   :  { %p3452_p4 = pnand %p3451_p3, %p3445_p0 }
0x1199   :  { %v3418_v23 = vpop.permute.xlu1 %3417 }
0x119a   :  { %v3419_v32 = vunpack.i.l.bf16 %v3418_v23  ;;  %v3420_v49 = vunpack.i.h.bf16 %v3418_v23 }
0x119c   :  { %v2730_v34 = vsel %vm1069_vm7, %v2716_v45, %v3419_v32  ;;  %v2710_v62 = vsel %vm1069_vm7, %v2696_v24, %v3420_v49 }
0x119d   :  { %v3423_v16 = vpop.permute.xlu1 %3422 }
0x119e   :  { %v3424_v18 = vunpack.i.l.bf16 %v3423_v16  ;;  %v3425_v1 = vunpack.i.h.bf16 %v3423_v16 }
0x11a0   :  { %v2731_v63 = vsel %vm183_vm1, %v2730_v34, %v3424_v18  ;;  %v2711_v55 = vsel %vm183_vm1, %v2710_v62, %v3425_v1 }
0x11a1   :  { %v2728_v42 = vpop.permute.xlu1 %2727 }
0x11a2   :  { %v2732_v38 = vsel %vm2144_vm5, %v2731_v63, %v2728_v42 }
0x11a3   :  { %v2734_v53 = vrot.slane %v2732_v38, 6 }
0x11a5   :  { %v2708_v13 = vpop.permute.xlu1 %2707 }
0x11a6   :  { %v2712_v58 = vsel %vm2144_vm5, %v2711_v55, %v2708_v13 }
0x11a7   :  { %v2736_v17 = vsel %vm960_vm4, %v2712_v58, %v2734_v53 }
0x11a8   :  { %3264 = vmatmul.mubr.f32.vlgmr.msra.gmra.mxu1 %v2736_v17 }
0x1268   :  { %v2826_v20 = vpop.f32.mrf.mxu1 }
0x1269   :  { %v2827_v43 = vadd.f32 %v2863_v19, %v2826_v20 }
0x126a   :  { %v3265_v11 = vpop.f32.mrf.mxu1 }
0x126b   :  { %2831 = vst.msk [vmem:[#allocation2] sm:$0x3] %vm2830_vm0, %v2827_v43 }
0x126c   :  { %2834 = vst.msk [vmem:[#allocation2] sm:$0xc] %vm2833_vm9, %v2827_v43 }
0x126d   :  { %3455 = shalt.err (!%p3452_p4)
}
0x126e   :  { %s3499_s1 = smov 2  }
0x126f   :  { %2846 = dma.vmem_to_hbm [thread:$0]  %s2841_s4, 64, %s5403_s22, [#allocation3], %s3496_s23, %s3496_s23, %s3499_s1  }
0x1270   :  { %3464 = dma.done.wait [#allocation3], 64  }
0x1271   :  { %3465 = vsyncadd [#allocation3], 4294967232 }
0x1272   :  { %2850 = vsyncpa [#allocation3], 1 }

</bundles_post_ra>
